<compile_context>
chip_gen: v6e
topology: v6e:2x2x1
jax: 0.10.0
libtpu: 0.0.40
codegen_flags: <defaults>
</compile_context>

<pallas_src>
import functools

import jax
import jax.numpy as jnp
import numpy as np
from jax.experimental import pallas as pl
from jax.experimental.pallas import tpu as pltpu


_VMEM_LIMIT = 48 * 1024 * 1024   # explicit scoped-VMEM budget (< v7x 64 MiB)


# --------------------------------------------------------------------------
# Small helpers
# --------------------------------------------------------------------------
def _round_up(x, m):
    return ((x + m - 1) // m) * m


def _choose_tm(M, tm_max=512):
    """Row-tile: large (amortize ~0.35us/step), >=2 grid steps when possible."""
    m8 = _round_up(M, 8)
    tm = min(tm_max, m8)
    if m8 // tm < 2 and m8 >= 16:      # keep both v7x TensorCores busy
        tm = _round_up(m8 // 2, 8)
    return tm, _round_up(M, tm)


def _largest_divisor_leq(n, cap):
    for d in range(min(cap, n), 0, -1):
        if n % d == 0:
            return d
    return 1


# --------------------------------------------------------------------------
# Kernels
# --------------------------------------------------------------------------
def _conv_act_kernel(x_ref, w_ref, b_ref, o_ref, *, slope):
    # (tm, Cin) @ (Cin, Cout) + bias, LeakyReLU(slope).  BN scale pre-folded in W.
    y = jnp.dot(x_ref[...], w_ref[...], preferred_element_type=jnp.float32)
    y = y + b_ref[...]
    o_ref[...] = jnp.maximum(slope * y, y).astype(o_ref.dtype)


def _upsample_rows_kernel(lh_ref, x_ref, o_ref):
    # Height pass per batch element: (H, ht) @ (ht, wt*C).
    o_ref[0] = jnp.dot(lh_ref[...], x_ref[0],
                       preferred_element_type=jnp.float32).astype(o_ref.dtype)


def _upsample_cols_kernel(lw_ref, t_ref, o_ref):
    # Width pass: tb image rows per grid step, each (W, wt) @ (wt, C), unrolled.
    lw = lw_ref[...]
    for i in range(t_ref.shape[0]):
        o_ref[i] = jnp.dot(lw, t_ref[i],
                           preferred_element_type=jnp.float32).astype(o_ref.dtype)


def _fused_tail_kernel(y1_ref, xl_ref, w2_ref, b2_ref, w3a1_ref, w3a2_ref,
                       b3a_ref, w3b_ref, b3b_ref, w4_ref, b4_ref,
                       x_ref, seg_ref, *, slope):
    # conv2 on xl -- its 48-channel output never leaves VMEM.
    y2 = jnp.dot(xl_ref[...], w2_ref[...], preferred_element_type=jnp.float32)
    y2 = y2 + b2_ref[...]
    y2 = jnp.maximum(slope * y2, y2)
    # conv3a with the channel-concat folded in:
    #   [y1 | y2] @ W3a == y1 @ W3a[:256] + y2 @ W3a[256:]
    a = jnp.dot(y1_ref[...], w3a1_ref[...], preferred_element_type=jnp.float32)
    a = a + jnp.dot(y2.astype(w3a2_ref.dtype), w3a2_ref[...],
                    preferred_element_type=jnp.float32)
    a = a + b3a_ref[...]
    a = jnp.maximum(slope * a, a)
    # conv3b
    b = jnp.dot(a.astype(w3b_ref.dtype), w3b_ref[...],
                preferred_element_type=jnp.float32)
    b = b + b3b_ref[...]
    b = jnp.maximum(slope * b, b)
    x_ref[...] = b.astype(x_ref.dtype)
    # conv4: bias only, no activation; Cout zero-padded to a 128-lane multiple.
    seg = jnp.dot(b.astype(w4_ref.dtype), w4_ref[...],
                  preferred_element_type=jnp.float32)
    seg_ref[...] = (seg + b4_ref[...]).astype(seg_ref.dtype)


# --------------------------------------------------------------------------
# Pallas wrappers
# --------------------------------------------------------------------------
def conv1x1_bn_act(x2d, w, bias, slope, out_dtype, tm_max=512):
    """1x1 conv (+ folded BN + LeakyReLU) as a tiled matmul.  x2d: (M, Cin)."""
    M, Cin = x2d.shape
    Cout = w.shape[1]
    tm, Mp = _choose_tm(M, tm_max)
    if Mp != M:
        x2d = jnp.pad(x2d, ((0, Mp - M), (0, 0)))
    out = pl.pallas_call(
        functools.partial(_conv_act_kernel, slope=slope),
        out_shape=jax.ShapeDtypeStruct((Mp, Cout), out_dtype),
        grid_spec=pltpu.PrefetchScalarGridSpec(
            num_scalar_prefetch=0,
            grid=(Mp // tm,),
            in_specs=[
                pl.BlockSpec((tm, Cin), lambda i: (i, 0)),
                pl.BlockSpec((Cin, Cout), lambda i: (0, 0)),   # resident weight
                pl.BlockSpec((1, Cout), lambda i: (0, 0)),     # resident bias
            ],
            out_specs=pl.BlockSpec((tm, Cout), lambda i: (i, 0)),
        ),
        compiler_params=pltpu.CompilerParams(
            dimension_semantics=("parallel",),
            vmem_limit_bytes=_VMEM_LIMIT),
    )(x2d, w, bias)
    return out[:M] if Mp != M else out


def _interp_matrix_np(out_size, in_size):
    """(out, in) row-stochastic 1-D bilinear matrix, align_corners=True (numpy)."""
    if in_size == 1:
        return np.ones((out_size, 1), np.float32)
    if out_size == 1:
        src = np.zeros((1,), np.float64)
    else:
        src = np.arange(out_size, dtype=np.float64) * (
            (in_size - 1) / (out_size - 1))
    lo = np.clip(np.floor(src).astype(np.int64), 0, in_size - 1)
    hi = np.minimum(lo + 1, in_size - 1)
    frac = (src - lo).astype(np.float32)
    m = np.zeros((out_size, in_size), np.float32)
    m[np.arange(out_size), lo] += 1.0 - frac
    m[np.arange(out_size), hi] += frac
    return m


def bilinear_upsample(x_nhwc, out_h, out_w, out_dtype):
    """Separable align_corners=True bilinear resize via two matmul kernels."""
    N, h, w, C = x_nhwc.shape
    lh = jnp.asarray(_interp_matrix_np(out_h, h), out_dtype)
    lw = jnp.asarray(_interp_matrix_np(out_w, w), out_dtype)

    # Pass 1: interpolate along H.   (N, h, w*C) -> (N, H, w*C)
    x = x_nhwc.reshape(N, h, w * C)
    t = pl.pallas_call(
        _upsample_rows_kernel,
        out_shape=jax.ShapeDtypeStruct((N, out_h, w * C), out_dtype),
        grid_spec=pltpu.PrefetchScalarGridSpec(
            num_scalar_prefetch=0, grid=(N,),
            in_specs=[pl.BlockSpec((out_h, h), lambda n: (0, 0)),
                      pl.BlockSpec((1, h, w * C), lambda n: (n, 0, 0))],
            out_specs=pl.BlockSpec((1, out_h, w * C), lambda n: (n, 0, 0))),
        compiler_params=pltpu.CompilerParams(
            dimension_semantics=("parallel",),
            vmem_limit_bytes=_VMEM_LIMIT),
    )(lh, x)

    # Pass 2: interpolate along W.   (N*H, w, C) -> (N*H, W, C)
    B = N * out_h
    t = t.reshape(B, w, C)
    tb = _largest_divisor_leq(B, 16)
    o = pl.pallas_call(
        _upsample_cols_kernel,
        out_shape=jax.ShapeDtypeStruct((B, out_w, C), out_dtype),
        grid_spec=pltpu.PrefetchScalarGridSpec(
            num_scalar_prefetch=0, grid=(B // tb,),
            in_specs=[pl.BlockSpec((out_w, w), lambda i: (0, 0)),
                      pl.BlockSpec((tb, w, C), lambda i: (i, 0, 0))],
            out_specs=pl.BlockSpec((tb, out_w, C), lambda i: (i, 0, 0))),
        compiler_params=pltpu.CompilerParams(
            dimension_semantics=("parallel",),
            vmem_limit_bytes=_VMEM_LIMIT),
    )(lw, t)
    return o.reshape(N, out_h, out_w, C)


def fused_tail(y1_2d, xl_2d, w2, b2, w3a1, w3a2, b3a, w3b, b3b, w4p, b4p,
               slope, tm_max=512):
    """conv2 + concat + conv3a + conv3b + conv4 in one pallas_call."""
    M, C1 = y1_2d.shape
    C2 = xl_2d.shape[1]
    Cmid = w3b.shape[1]
    Cseg = w4p.shape[1]
    tm, Mp = _choose_tm(M, tm_max)
    if Mp != M:
        y1_2d = jnp.pad(y1_2d, ((0, Mp - M), (0, 0)))
        xl_2d = jnp.pad(xl_2d, ((0, Mp - M), (0, 0)))
    const = lambda i: (0, 0)
    row = lambda i: (i, 0)
    x_out, seg_out = pl.pallas_call(
        functools.partial(_fused_tail_kernel, slope=slope),
        out_shape=(jax.ShapeDtypeStruct((Mp, Cmid), jnp.float32),
                   jax.ShapeDtypeStruct((Mp, Cseg), jnp.float32)),
        grid_spec=pltpu.PrefetchScalarGridSpec(
            num_scalar_prefetch=0,
            grid=(Mp // tm,),
            in_specs=[
                pl.BlockSpec((tm, C1), row),
                pl.BlockSpec((tm, C2), row),
                pl.BlockSpec(w2.shape, const),     # weights/biases stay resident
                pl.BlockSpec(b2.shape, const),
                pl.BlockSpec(w3a1.shape, const),
                pl.BlockSpec(w3a2.shape, const),
                pl.BlockSpec(b3a.shape, const),
                pl.BlockSpec(w3b.shape, const),
                pl.BlockSpec(b3b.shape, const),
                pl.BlockSpec(w4p.shape, const),
                pl.BlockSpec(b4p.shape, const),
            ],
            out_specs=[pl.BlockSpec((tm, Cmid), row),
                       pl.BlockSpec((tm, Cseg), row)],
        ),
        compiler_params=pltpu.CompilerParams(
            dimension_semantics=("parallel",),
            vmem_limit_bytes=_VMEM_LIMIT),
    )(y1_2d, xl_2d, w2, b2, w3a1, w3a2, b3a, w3b, b3b, w4p, b4p)
    if Mp != M:
        x_out, seg_out = x_out[:M], seg_out[:M]
    return x_out, seg_out


# --------------------------------------------------------------------------
# Parameters (deterministic synthetic init)
# --------------------------------------------------------------------------
def make_decoder_params(key, num_classes, in_ch1=512, in_ch2=256):
    def conv_w(k, cin, cout):
        return jax.random.normal(k, (cin, cout), jnp.float32) / jnp.sqrt(
            jnp.float32(cin))

    def bn(k, c, eps=1e-5):
        k1, k2, k3, k4 = jax.random.split(k, 4)
        gamma = 1.0 + 0.1 * jax.random.normal(k1, (c,), jnp.float32)
        beta = 0.1 * jax.random.normal(k2, (c,), jnp.float32)
        mean = 0.1 * jax.random.normal(k3, (c,), jnp.float32)
        var = jax.random.uniform(k4, (c,), jnp.float32, minval=0.5, maxval=1.5)
        scale = gamma / jnp.sqrt(var + eps)
        bias = beta - mean * scale
        return scale, bias

    ks = jax.random.split(key, 10)
    p = {}
    p['w1'] = conv_w(ks[0], in_ch1, 256)
    p['s1'], p['b1'] = bn(ks[1], 256)
    p['w2'] = conv_w(ks[2], in_ch2, 48)
    p['s2'], p['b2'] = bn(ks[3], 48)
    p['w3a'] = conv_w(ks[4], 304, 256)
    p['s3a'], p['b3a'] = bn(ks[5], 256)
    p['w3b'] = conv_w(ks[6], 256, 256)
    p['s3b'], p['b3b'] = bn(ks[7], 256)
    p['w4'] = conv_w(ks[8], 256, num_classes)
    p['bias4'] = 0.1 * jax.random.normal(ks[9], (num_classes,), jnp.float32)
    return p


# --------------------------------------------------------------------------
# Forward pass (Pallas)
# --------------------------------------------------------------------------
def decoder_forward(params, xt_nchw, xl_nchw, negative_slope=0.1,
                    compute_dtype=jnp.float32):
    """Returns (seg, x) in NCHW, matching Decoder_Module.forward (eval-mode BN)."""
    N, C1, ht, wt = xt_nchw.shape
    _, C2, h, w = xl_nchw.shape
    cdt = compute_dtype
    f32 = jnp.float32
    c1out = params['w1'].shape[1]          # 256

    # Fold BN scale into the conv weights (bias stays separate, f32).
    w1 = (params['w1'] * params['s1'][None, :]).astype(cdt)
    b1 = params['b1'].reshape(1, -1).astype(f32)
    w2 = (params['w2'] * params['s2'][None, :]).astype(cdt)
    b2 = params['b2'].reshape(1, -1).astype(f32)
    w3a = params['w3a'] * params['s3a'][None, :]
    w3a1 = w3a[:c1out].astype(cdt)         # rows multiplying the conv1/upsample path
    w3a2 = w3a[c1out:].astype(cdt)         # rows multiplying the conv2 path
    b3a = params['b3a'].reshape(1, -1).astype(f32)
    w3b = (params['w3b'] * params['s3b'][None, :]).astype(cdt)
    b3b = params['b3b'].reshape(1, -1).astype(f32)
    nc = params['w4'].shape[1]
    ncp = _round_up(nc, 128)               # lane-dense seg store, sliced afterwards
    w4p = jnp.zeros((params['w4'].shape[0], ncp), cdt).at[:, :nc].set(
        params['w4'].astype(cdt))
    b4p = jnp.zeros((1, ncp), f32).at[:, :nc].set(params['bias4'][None, :])

    xt = jnp.transpose(xt_nchw, (0, 2, 3, 1)).astype(cdt)   # (N, ht, wt, C1)
    xl = jnp.transpose(xl_nchw, (0, 2, 3, 1)).astype(cdt)   # (N, h, w, C2)

    # conv1 (+BN+LeakyReLU), then separable bilinear upsample to (h, w).
    y1 = conv1x1_bn_act(xt.reshape(N * ht * wt, C1), w1, b1, negative_slope, cdt)
    y1 = bilinear_upsample(y1.reshape(N, ht, wt, c1out), h, w, cdt)

    # conv2 + concat + conv3a + conv3b + conv4, fused in one kernel.
    x2d, seg2d = fused_tail(
        y1.reshape(N * h * w, c1out), xl.reshape(N * h * w, C2),
        w2, b2, w3a1, w3a2, b3a, w3b, b3b, w4p, b4p, negative_slope)

    cmid = w3b.shape[1]
    x_nchw = jnp.transpose(x2d.reshape(N, h, w, cmid), (0, 3, 1, 2))
    seg_nchw = jnp.transpose(seg2d[:, :nc].reshape(N, h, w, nc), (0, 3, 1, 2))
    return seg_nchw, x_nchw


# --------------------------------------------------------------------------
# Pure-JAX reference (for correctness check only)
# --------------------------------------------------------------------------
def decoder_reference(params, xt, xl, ns=0.1):
    def conv_bn_act(x, w, s, b, slope):
        y = jnp.einsum('nchw,co->nohw', x, w)
        y = y * s[None, :, None, None] + b[None, :, None, None]
        return jnp.maximum(slope * y, y)

    _, _, ht, wt = xt.shape
    _, _, h, w = xl.shape
    y1 = conv_bn_act(xt, params['w1'], params['s1'], params['b1'], ns)
    lh = jnp.asarray(_interp_matrix_np(h, ht))
    lw = jnp.asarray(_interp_matrix_np(w, wt))
    y1 = jnp.einsum('Hh,Ww,nchw->ncHW', lh, lw, y1)
    y2 = conv_bn_act(xl, params['w2'], params['s2'], params['b2'], ns)
    x = jnp.concatenate([y1, y2], axis=1)
    x = conv_bn_act(x, params['w3a'], params['s3a'], params['b3a'], ns)
    x = conv_bn_act(x, params['w3b'], params['s3b'], params['b3b'], ns)
    seg = (jnp.einsum('nchw,co->nohw', x, params['w4'])
           + params['bias4'][None, :, None, None])
    return seg, x


# --------------------------------------------------------------------------
if __name__ == "__main__":
    key = jax.random.PRNGKey(0)
    k_xt, k_xl, k_params = jax.random.split(key, 3)

    num_classes = 20
    N, ht, wt, h, w = 2, 8, 8, 16, 16          # xt is low-res, xl is high-res
    xt = jax.random.normal(k_xt, (N, 512, ht, wt), jnp.float32)
    xl = jax.random.normal(k_xl, (N, 256, h, w), jnp.float32)
    params = make_decoder_params(k_params, num_classes)

    seg_ref, x_ref = decoder_reference(params, xt, xl)

    # float32 path (exact check)
    fwd_f32 = jax.jit(functools.partial(decoder_forward,
                                        compute_dtype=jnp.float32))
    seg, x = jax.block_until_ready(fwd_f32(params, xt, xl))
    assert seg.shape == (N, num_classes, h, w)
    assert x.shape == (N, 256, h, w)
    np.testing.assert_allclose(np.asarray(seg), np.asarray(seg_ref),
                               rtol=1e-3, atol=1e-3)
    np.testing.assert_allclose(np.asarray(x), np.asarray(x_ref),
                               rtol=1e-3, atol=1e-3)

    # bfloat16 compute path (v6e/v7x MXU-friendly; f32 accumulation), loose check
    fwd_bf16 = jax.jit(functools.partial(decoder_forward,
                                         compute_dtype=jnp.bfloat16))
    seg16, x16 = jax.block_until_ready(fwd_bf16(params, xt, xl))
    np.testing.assert_allclose(np.asarray(seg16), np.asarray(seg_ref),
                               rtol=1e-1, atol=1.5e-1)
    np.testing.assert_allclose(np.asarray(x16), np.asarray(x_ref),
                               rtol=1e-1, atol=1.5e-1)

    print("KERNEL_OK")
</pallas_src>

<mosaic_0001>
module attributes {stable_mosaic.version = 11 : i64} {
  func.func @_upsample_rows_kernel(%arg0: i32, %arg1: memref<16x8xf32, #tpu.memory_space<vmem>>, %arg2: memref<1x8x2048xf32, #tpu.memory_space<vmem>>, %arg3: memref<1x16x2048xf32, #tpu.memory_space<vmem>>) attributes {dimension_semantics = [#tpu.dimension_semantics<parallel>], iteration_bounds = array<i64: 2>, scalar_prefetch = 0 : i64, scratch_operands = 0 : i64, tpu.core_type = #tpu.core_type<tc>, window_params = [{pipeline_mode = #tpu.pipeline_mode<synchronous>, transform_indices = @transform_0, window_bounds = array<i64: 16, 8>}, {transform_indices = @transform_1, window_bounds = array<i64: 1, 8, 2048>}, {transform_indices = @transform_2, window_bounds = array<i64: 1, 16, 2048>}]} {
    %c0 = arith.constant 0 : index
    %c0_0 = arith.constant 0 : index
    %0 = vector.load %arg1[%c0, %c0_0] : memref<16x8xf32, #tpu.memory_space<vmem>>, vector<16x8xf32>
    %c0_1 = arith.constant 0 : index
    %c0_2 = arith.constant 0 : index
    %c0_3 = arith.constant 0 : index
    %1 = vector.load %arg2[%c0_1, %c0_2, %c0_3] : memref<1x8x2048xf32, #tpu.memory_space<vmem>>, vector<1x8x2048xf32>
    %2 = vector.shape_cast %1 : vector<1x8x2048xf32> to vector<8x2048xf32>
    %cst = arith.constant dense<0.000000e+00> : vector<16x2048xf32>
    %3 = tpu.matmul %0, %2, %cst {dimension_numbers = #tpu.dot_dimension_numbers<[1], [0], [0], [1], [0, 0, 1, 1], [], []>} : vector<16x8xf32>, vector<8x2048xf32>, vector<16x2048xf32> -> vector<16x2048xf32>
    %c0_4 = arith.constant 0 : index
    %c0_5 = arith.constant 0 : index
    %c0_6 = arith.constant 0 : index
    %4 = vector.load %arg3[%c0_4, %c0_5, %c0_6] : memref<1x16x2048xf32, #tpu.memory_space<vmem>>, vector<1x16x2048xf32>
    %5 = vector.shape_cast %4 : vector<1x16x2048xf32> to vector<16x2048xf32>
    %6 = vector.shape_cast %3 : vector<16x2048xf32> to vector<1x16x2048xf32>
    tpu.vector_store %arg3[%c0_4, %c0_5, %c0_6], %6 {strides = array<i32>} : memref<1x16x2048xf32, #tpu.memory_space<vmem>>, vector<1x16x2048xf32>,
    return
  }
  func.func @transform_0(%arg0: i32) -> (i32, i32) {
    %c0_i32 = arith.constant 0 : i32
    %c0_i32_0 = arith.constant 0 : i32
    %c0_i32_1 = arith.constant 0 : i32
    return %c0_i32, %c0_i32_0 : i32, i32
  }
  func.func @transform_1(%arg0: i32) -> (i32, i32, i32) {
    %c0_i32 = arith.constant 0 : i32
    %c0_i32_0 = arith.constant 0 : i32
    %c0_i32_1 = arith.constant 0 : i32
    return %arg0, %c0_i32, %c0_i32_0 : i32, i32, i32
  }
  func.func @transform_2(%arg0: i32) -> (i32, i32, i32) {
    %c0_i32 = arith.constant 0 : i32
    %c0_i32_0 = arith.constant 0 : i32
    %c0_i32_1 = arith.constant 0 : i32
    return %arg0, %c0_i32, %c0_i32_0 : i32, i32, i32
  }
}

module attributes {stable_mosaic.version = 11 : i64} {
  func.func @_conv_act_kernel(%arg0: i32, %arg1: memref<64x512xf32, #tpu.memory_space<vmem>>, %arg2: memref<512x256xf32, #tpu.memory_space<vmem>>, %arg3: memref<1x256xf32, #tpu.memory_space<vmem>>, %arg4: memref<64x256xf32, #tpu.memory_space<vmem>>) attributes {dimension_semantics = [#tpu.dimension_semantics<parallel>], iteration_bounds = array<i64: 2>, scalar_prefetch = 0 : i64, scratch_operands = 0 : i64, tpu.core_type = #tpu.core_type<tc>, window_params = [{transform_indices = @transform_0, window_bounds = array<i64: 64, 512>}, {pipeline_mode = #tpu.pipeline_mode<synchronous>, transform_indices = @transform_1, window_bounds = array<i64: 512, 256>}, {pipeline_mode = #tpu.pipeline_mode<synchronous>, transform_indices = @transform_2, window_bounds = array<i64: 1, 256>}, {transform_indices = @transform_3, window_bounds = array<i64: 64, 256>}]} {
    %c0 = arith.constant 0 : index
    %c0_0 = arith.constant 0 : index
    %0 = vector.load %arg1[%c0, %c0_0] : memref<64x512xf32, #tpu.memory_space<vmem>>, vector<64x512xf32>
    %c0_1 = arith.constant 0 : index
    %c0_2 = arith.constant 0 : index
    %1 = vector.load %arg2[%c0_1, %c0_2] : memref<512x256xf32, #tpu.memory_space<vmem>>, vector<512x256xf32>
    %cst = arith.constant dense<0.000000e+00> : vector<64x256xf32>
    %2 = tpu.matmul %0, %1, %cst {dimension_numbers = #tpu.dot_dimension_numbers<[1], [0], [0], [1], [0, 0, 1, 1], [], []>} : vector<64x512xf32>, vector<512x256xf32>, vector<64x256xf32> -> vector<64x256xf32>
    %c0_3 = arith.constant 0 : index
    %c0_4 = arith.constant 0 : index
    %3 = vector.load %arg3[%c0_3, %c0_4] : memref<1x256xf32, #tpu.memory_space<vmem>>, vector<1x256xf32>
    %4 = vector.broadcast %3 : vector<1x256xf32> to vector<64x256xf32>
    %5 = arith.addf %2, %4 : vector<64x256xf32>
    %cst_5 = arith.constant 1.000000e-01 : f32
    %6 = vector.broadcast %cst_5 : f32 to vector<64x256xf32>
    %7 = arith.mulf %6, %5 : vector<64x256xf32>
    %8 = arith.maximumf %7, %5 : vector<64x256xf32>
    %c0_6 = arith.constant 0 : index
    %c0_7 = arith.constant 0 : index
    %9 = vector.load %arg4[%c0_6, %c0_7] : memref<64x256xf32, #tpu.memory_space<vmem>>, vector<64x256xf32>
    tpu.vector_store %arg4[%c0_6, %c0_7], %8 {strides = array<i32>} : memref<64x256xf32, #tpu.memory_space<vmem>>, vector<64x256xf32>,
    return
  }
  func.func @transform_0(%arg0: i32) -> (i32, i32) {
    %c0_i32 = arith.constant 0 : i32
    %c0_i32_0 = arith.constant 0 : i32
    return %arg0, %c0_i32 : i32, i32
  }
  func.func @transform_1(%arg0: i32) -> (i32, i32) {
    %c0_i32 = arith.constant 0 : i32
    %c0_i32_0 = arith.constant 0 : i32
    %c0_i32_1 = arith.constant 0 : i32
    return %c0_i32, %c0_i32_0 : i32, i32
  }
  func.func @transform_2(%arg0: i32) -> (i32, i32) {
    %c0_i32 = arith.constant 0 : i32
    %c0_i32_0 = arith.constant 0 : i32
    %c0_i32_1 = arith.constant 0 : i32
    return %c0_i32, %c0_i32_0 : i32, i32
  }
  func.func @transform_3(%arg0: i32) -> (i32, i32) {
    %c0_i32 = arith.constant 0 : i32
    %c0_i32_0 = arith.constant 0 : i32
    return %arg0, %c0_i32 : i32, i32
  }
}

module attributes {stable_mosaic.version = 11 : i64} {
  func.func @_upsample_cols_kernel(%arg0: i32, %arg1: memref<16x8xf32, #tpu.memory_space<vmem>>, %arg2: memref<16x8x256xf32, #tpu.memory_space<vmem>>, %arg3: memref<16x16x256xf32, #tpu.memory_space<vmem>>) attributes {dimension_semantics = [#tpu.dimension_semantics<parallel>], iteration_bounds = array<i64: 2>, scalar_prefetch = 0 : i64, scratch_operands = 0 : i64, tpu.core_type = #tpu.core_type<tc>, window_params = [{pipeline_mode = #tpu.pipeline_mode<synchronous>, transform_indices = @transform_0, window_bounds = array<i64: 16, 8>}, {transform_indices = @transform_1, window_bounds = array<i64: 16, 8, 256>}, {transform_indices = @transform_2, window_bounds = array<i64: 16, 16, 256>}]} {
    %c0 = arith.constant 0 : index
    %c0_0 = arith.constant 0 : index
    %0 = vector.load %arg1[%c0, %c0_0] : memref<16x8xf32, #tpu.memory_space<vmem>>, vector<16x8xf32>
    %c0_1 = arith.constant 0 : index
    %c0_2 = arith.constant 0 : index
    %c0_3 = arith.constant 0 : index
    %1 = vector.load %arg2[%c0_1, %c0_2, %c0_3] : memref<16x8x256xf32, #tpu.memory_space<vmem>>, vector<1x8x256xf32>
    %2 = vector.shape_cast %1 : vector<1x8x256xf32> to vector<8x256xf32>
    %cst = arith.constant dense<0.000000e+00> : vector<16x256xf32>
    %3 = tpu.matmul %0, %2, %cst {dimension_numbers = #tpu.dot_dimension_numbers<[1], [0], [0], [1], [0, 0, 1, 1], [], []>} : vector<16x8xf32>, vector<8x256xf32>, vector<16x256xf32> -> vector<16x256xf32>
    %c0_4 = arith.constant 0 : index
    %c0_5 = arith.constant 0 : index
    %c0_6 = arith.constant 0 : index
    %4 = vector.load %arg3[%c0_4, %c0_5, %c0_6] : memref<16x16x256xf32, #tpu.memory_space<vmem>>, vector<1x16x256xf32>
    %5 = vector.shape_cast %4 : vector<1x16x256xf32> to vector<16x256xf32>
    %6 = vector.shape_cast %3 : vector<16x256xf32> to vector<1x16x256xf32>
    tpu.vector_store %arg3[%c0_4, %c0_5, %c0_6], %6 {strides = array<i32>} : memref<16x16x256xf32, #tpu.memory_space<vmem>>, vector<1x16x256xf32>,
    %c1 = arith.constant 1 : index
    %c0_7 = arith.constant 0 : index
    %c0_8 = arith.constant 0 : index
    %7 = vector.load %arg2[%c1, %c0_7, %c0_8] : memref<16x8x256xf32, #tpu.memory_space<vmem>>, vector<1x8x256xf32>
    %8 = vector.shape_cast %7 : vector<1x8x256xf32> to vector<8x256xf32>
    %cst_9 = arith.constant dense<0.000000e+00> : vector<16x256xf32>
    %9 = tpu.matmul %0, %8, %cst_9 {dimension_numbers = #tpu.dot_dimension_numbers<[1], [0], [0], [1], [0, 0, 1, 1], [], []>} : vector<16x8xf32>, vector<8x256xf32>, vector<16x256xf32> -> vector<16x256xf32>
    %c1_10 = arith.constant 1 : index
    %c0_11 = arith.constant 0 : index
    %c0_12 = arith.constant 0 : index
    %10 = vector.load %arg3[%c1_10, %c0_11, %c0_12] : memref<16x16x256xf32, #tpu.memory_space<vmem>>, vector<1x16x256xf32>
    %11 = vector.shape_cast %10 : vector<1x16x256xf32> to vector<16x256xf32>
    %12 = vector.shape_cast %9 : vector<16x256xf32> to vector<1x16x256xf32>
    tpu.vector_store %arg3[%c1_10, %c0_11, %c0_12], %12 {strides = array<i32>} : memref<16x16x256xf32, #tpu.memory_space<vmem>>, vector<1x16x256xf32>,
    %c2 = arith.constant 2 : index
    %c0_13 = arith.constant 0 : index
    %c0_14 = arith.constant 0 : index
    %13 = vector.load %arg2[%c2, %c0_13, %c0_14] : memref<16x8x256xf32, #tpu.memory_space<vmem>>, vector<1x8x256xf32>
    %14 = vector.shape_cast %13 : vector<1x8x256xf32> to vector<8x256xf32>
    %cst_15 = arith.constant dense<0.000000e+00> : vector<16x256xf32>
    %15 = tpu.matmul %0, %14, %cst_15 {dimension_numbers = #tpu.dot_dimension_numbers<[1], [0], [0], [1], [0, 0, 1, 1], [], []>} : vector<16x8xf32>, vector<8x256xf32>, vector<16x256xf32> -> vector<16x256xf32>
    %c2_16 = arith.constant 2 : index
    %c0_17 = arith.constant 0 : index
    %c0_18 = arith.constant 0 : index
    %16 = vector.load %arg3[%c2_16, %c0_17, %c0_18] : memref<16x16x256xf32, #tpu.memory_space<vmem>>, vector<1x16x256xf32>
    %17 = vector.shape_cast %16 : vector<1x16x256xf32> to vector<16x256xf32>
    %18 = vector.shape_cast %15 : vector<16x256xf32> to vector<1x16x256xf32>
    tpu.vector_store %arg3[%c2_16, %c0_17, %c0_18], %18 {strides = array<i32>} : memref<16x16x256xf32, #tpu.memory_space<vmem>>, vector<1x16x256xf32>,
    %c3 = arith.constant 3 : index
    %c0_19 = arith.constant 0 : index
    %c0_20 = arith.constant 0 : index
    %19 = vector.load %arg2[%c3, %c0_19, %c0_20] : memref<16x8x256xf32, #tpu.memory_space<vmem>>, vector<1x8x256xf32>
    %20 = vector.shape_cast %19 : vector<1x8x256xf32> to vector<8x256xf32>
    %cst_21 = arith.constant dense<0.000000e+00> : vector<16x256xf32>
    %21 = tpu.matmul %0, %20, %cst_21 {dimension_numbers = #tpu.dot_dimension_numbers<[1], [0], [0], [1], [0, 0, 1, 1], [], []>} : vector<16x8xf32>, vector<8x256xf32>, vector<16x256xf32> -> vector<16x256xf32>
    %c3_22 = arith.constant 3 : index
    %c0_23 = arith.constant 0 : index
    %c0_24 = arith.constant 0 : index
    %22 = vector.load %arg3[%c3_22, %c0_23, %c0_24] : memref<16x16x256xf32, #tpu.memory_space<vmem>>, vector<1x16x256xf32>
    %23 = vector.shape_cast %22 : vector<1x16x256xf32> to vector<16x256xf32>
    %24 = vector.shape_cast %21 : vector<16x256xf32> to vector<1x16x256xf32>
    tpu.vector_store %arg3[%c3_22, %c0_23, %c0_24], %24 {strides = array<i32>} : memref<16x16x256xf32, #tpu.memory_space<vmem>>, vector<1x16x256xf32>,
    %c4 = arith.constant 4 : index
    %c0_25 = arith.constant 0 : index
    %c0_26 = arith.constant 0 : index
    %25 = vector.load %arg2[%c4, %c0_25, %c0_26] : memref<16x8x256xf32, #tpu.memory_space<vmem>>, vector<1x8x256xf32>
    %26 = vector.shape_cast %25 : vector<1x8x256xf32> to vector<8x256xf32>
    %cst_27 = arith.constant dense<0.000000e+00> : vector<16x256xf32>
    %27 = tpu.matmul %0, %26, %cst_27 {dimension_numbers = #tpu.dot_dimension_numbers<[1], [0], [0], [1], [0, 0, 1, 1], [], []>} : vector<16x8xf32>, vector<8x256xf32>, vector<16x256xf32> -> vector<16x256xf32>
    %c4_28 = arith.constant 4 : index
    %c0_29 = arith.constant 0 : index
    %c0_30 = arith.constant 0 : index
    %28 = vector.load %arg3[%c4_28, %c0_29, %c0_30] : memref<16x16x256xf32, #tpu.memory_space<vmem>>, vector<1x16x256xf32>
    %29 = vector.shape_cast %28 : vector<1x16x256xf32> to vector<16x256xf32>
    %30 = vector.shape_cast %27 : vector<16x256xf32> to vector<1x16x256xf32>
    tpu.vector_store %arg3[%c4_28, %c0_29, %c0_30], %30 {strides = array<i32>} : memref<16x16x256xf32, #tpu.memory_space<vmem>>, vector<1x16x256xf32>,
    %c5 = arith.constant 5 : index
    %c0_31 = arith.constant 0 : index
    %c0_32 = arith.constant 0 : index
    %31 = vector.load %arg2[%c5, %c0_31, %c0_32] : memref<16x8x256xf32, #tpu.memory_space<vmem>>, vector<1x8x256xf32>
    %32 = vector.shape_cast %31 : vector<1x8x256xf32> to vector<8x256xf32>
    %cst_33 = arith.constant dense<0.000000e+00> : vector<16x256xf32>
    %33 = tpu.matmul %0, %32, %cst_33 {dimension_numbers = #tpu.dot_dimension_numbers<[1], [0], [0], [1], [0, 0, 1, 1], [], []>} : vector<16x8xf32>, vector<8x256xf32>, vector<16x256xf32> -> vector<16x256xf32>
    %c5_34 = arith.constant 5 : index
    %c0_35 = arith.constant 0 : index
    %c0_36 = arith.constant 0 : index
    %34 = vector.load %arg3[%c5_34, %c0_35, %c0_36] : memref<16x16x256xf32, #tpu.memory_space<vmem>>, vector<1x16x256xf32>
    %35 = vector.shape_cast %34 : vector<1x16x256xf32> to vector<16x256xf32>
    %36 = vector.shape_cast %33 : vector<16x256xf32> to vector<1x16x256xf32>
    tpu.vector_store %arg3[%c5_34, %c0_35, %c0_36], %36 {strides = array<i32>} : memref<16x16x256xf32, #tpu.memory_space<vmem>>, vector<1x16x256xf32>,
    %c6 = arith.constant 6 : index
    %c0_37 = arith.constant 0 : index
    %c0_38 = arith.constant 0 : index
    %37 = vector.load %arg2[%c6, %c0_37, %c0_38] : memref<16x8x256xf32, #tpu.memory_space<vmem>>, vector<1x8x256xf32>
    %38 = vector.shape_cast %37 : vector<1x8x256xf32> to vector<8x256xf32>
    %cst_39 = arith.constant dense<0.000000e+00> : vector<16x256xf32>
    %39 = tpu.matmul %0, %38, %cst_39 {dimension_numbers = #tpu.dot_dimension_numbers<[1], [0], [0], [1], [0, 0, 1, 1], [], []>} : vector<16x8xf32>, vector<8x256xf32>, vector<16x256xf32> -> vector<16x256xf32>
    %c6_40 = arith.constant 6 : index
    %c0_41 = arith.constant 0 : index
    %c0_42 = arith.constant 0 : index
    %40 = vector.load %arg3[%c6_40, %c0_41, %c0_42] : memref<16x16x256xf32, #tpu.memory_space<vmem>>, vector<1x16x256xf32>
    %41 = vector.shape_cast %40 : vector<1x16x256xf32> to vector<16x256xf32>
    %42 = vector.shape_cast %39 : vector<16x256xf32> to vector<1x16x256xf32>
    tpu.vector_store %arg3[%c6_40, %c0_41, %c0_42], %42 {strides = array<i32>} : memref<16x16x256xf32, #tpu.memory_space<vmem>>, vector<1x16x256xf32>,
    %c7 = arith.constant 7 : index
    %c0_43 = arith.constant 0 : index
    %c0_44 = arith.constant 0 : index
    %43 = vector.load %arg2[%c7, %c0_43, %c0_44] : memref<16x8x256xf32, #tpu.memory_space<vmem>>, vector<1x8x256xf32>
    %44 = vector.shape_cast %43 : vector<1x8x256xf32> to vector<8x256xf32>
    %cst_45 = arith.constant dense<0.000000e+00> : vector<16x256xf32>
    %45 = tpu.matmul %0, %44, %cst_45 {dimension_numbers = #tpu.dot_dimension_numbers<[1], [0], [0], [1], [0, 0, 1, 1], [], []>} : vector<16x8xf32>, vector<8x256xf32>, vector<16x256xf32> -> vector<16x256xf32>
    %c7_46 = arith.constant 7 : index
    %c0_47 = arith.constant 0 : index
    %c0_48 = arith.constant 0 : index
    %46 = vector.load %arg3[%c7_46, %c0_47, %c0_48] : memref<16x16x256xf32, #tpu.memory_space<vmem>>, vector<1x16x256xf32>
    %47 = vector.shape_cast %46 : vector<1x16x256xf32> to vector<16x256xf32>
    %48 = vector.shape_cast %45 : vector<16x256xf32> to vector<1x16x256xf32>
    tpu.vector_store %arg3[%c7_46, %c0_47, %c0_48], %48 {strides = array<i32>} : memref<16x16x256xf32, #tpu.memory_space<vmem>>, vector<1x16x256xf32>,
    %c8 = arith.constant 8 : index
    %c0_49 = arith.constant 0 : index
    %c0_50 = arith.constant 0 : index
    %49 = vector.load %arg2[%c8, %c0_49, %c0_50] : memref<16x8x256xf32, #tpu.memory_space<vmem>>, vector<1x8x256xf32>
    %50 = vector.shape_cast %49 : vector<1x8x256xf32> to vector<8x256xf32>
    %cst_51 = arith.constant dense<0.000000e+00> : vector<16x256xf32>
    %51 = tpu.matmul %0, %50, %cst_51 {dimension_numbers = #tpu.dot_dimension_numbers<[1], [0], [0], [1], [0, 0, 1, 1], [], []>} : vector<16x8xf32>, vector<8x256xf32>, vector<16x256xf32> -> vector<16x256xf32>
    %c8_52 = arith.constant 8 : index
    %c0_53 = arith.constant 0 : index
    %c0_54 = arith.constant 0 : index
    %52 = vector.load %arg3[%c8_52, %c0_53, %c0_54] : memref<16x16x256xf32, #tpu.memory_space<vmem>>, vector<1x16x256xf32>
    %53 = vector.shape_cast %52 : vector<1x16x256xf32> to vector<16x256xf32>
    %54 = vector.shape_cast %51 : vector<16x256xf32> to vector<1x16x256xf32>
    tpu.vector_store %arg3[%c8_52, %c0_53, %c0_54], %54 {strides = array<i32>} : memref<16x16x256xf32, #tpu.memory_space<vmem>>, vector<1x16x256xf32>,
    %c9 = arith.constant 9 : index
    %c0_55 = arith.constant 0 : index
    %c0_56 = arith.constant 0 : index
    %55 = vector.load %arg2[%c9, %c0_55, %c0_56] : memref<16x8x256xf32, #tpu.memory_space<vmem>>, vector<1x8x256xf32>
    %56 = vector.shape_cast %55 : vector<1x8x256xf32> to vector<8x256xf32>
    %cst_57 = arith.constant dense<0.000000e+00> : vector<16x256xf32>
    %57 = tpu.matmul %0, %56, %cst_57 {dimension_numbers = #tpu.dot_dimension_numbers<[1], [0], [0], [1], [0, 0, 1, 1], [], []>} : vector<16x8xf32>, vector<8x256xf32>, vector<16x256xf32> -> vector<16x256xf32>
    %c9_58 = arith.constant 9 : index
    %c0_59 = arith.constant 0 : index
    %c0_60 = arith.constant 0 : index
    %58 = vector.load %arg3[%c9_58, %c0_59, %c0_60] : memref<16x16x256xf32, #tpu.memory_space<vmem>>, vector<1x16x256xf32>
    %59 = vector.shape_cast %58 : vector<1x16x256xf32> to vector<16x256xf32>
    %60 = vector.shape_cast %57 : vector<16x256xf32> to vector<1x16x256xf32>
    tpu.vector_store %arg3[%c9_58, %c0_59, %c0_60], %60 {strides = array<i32>} : memref<16x16x256xf32, #tpu.memory_space<vmem>>, vector<1x16x256xf32>,
    %c10 = arith.constant 10 : index
    %c0_61 = arith.constant 0 : index
    %c0_62 = arith.constant 0 : index
    %61 = vector.load %arg2[%c10, %c0_61, %c0_62] : memref<16x8x256xf32, #tpu.memory_space<vmem>>, vector<1x8x256xf32>
    %62 = vector.shape_cast %61 : vector<1x8x256xf32> to vector<8x256xf32>
    %cst_63 = arith.constant dense<0.000000e+00> : vector<16x256xf32>
    %63 = tpu.matmul %0, %62, %cst_63 {dimension_numbers = #tpu.dot_dimension_numbers<[1], [0], [0], [1], [0, 0, 1, 1], [], []>} : vector<16x8xf32>, vector<8x256xf32>, vector<16x256xf32> -> vector<16x256xf32>
    %c10_64 = arith.constant 10 : index
    %c0_65 = arith.constant 0 : index
    %c0_66 = arith.constant 0 : index
    %64 = vector.load %arg3[%c10_64, %c0_65, %c0_66] : memref<16x16x256xf32, #tpu.memory_space<vmem>>, vector<1x16x256xf32>
    %65 = vector.shape_cast %64 : vector<1x16x256xf32> to vector<16x256xf32>
    %66 = vector.shape_cast %63 : vector<16x256xf32> to vector<1x16x256xf32>
    tpu.vector_store %arg3[%c10_64, %c0_65, %c0_66], %66 {strides = array<i32>} : memref<16x16x256xf32, #tpu.memory_space<vmem>>, vector<1x16x256xf32>,
    %c11 = arith.constant 11 : index
    %c0_67 = arith.constant 0 : index
    %c0_68 = arith.constant 0 : index
    %67 = vector.load %arg2[%c11, %c0_67, %c0_68] : memref<16x8x256xf32, #tpu.memory_space<vmem>>, vector<1x8x256xf32>
    %68 = vector.shape_cast %67 : vector<1x8x256xf32> to vector<8x256xf32>
    %cst_69 = arith.constant dense<0.000000e+00> : vector<16x256xf32>
    %69 = tpu.matmul %0, %68, %cst_69 {dimension_numbers = #tpu.dot_dimension_numbers<[1], [0], [0], [1], [0, 0, 1, 1], [], []>} : vector<16x8xf32>, vector<8x256xf32>, vector<16x256xf32> -> vector<16x256xf32>
    %c11_70 = arith.constant 11 : index
    %c0_71 = arith.constant 0 : index
    %c0_72 = arith.constant 0 : index
    %70 = vector.load %arg3[%c11_70, %c0_71, %c0_72] : memref<16x16x256xf32, #tpu.memory_space<vmem>>, vector<1x16x256xf32>
    %71 = vector.shape_cast %70 : vector<1x16x256xf32> to vector<16x256xf32>
    %72 = vector.shape_cast %69 : vector<16x256xf32> to vector<1x16x256xf32>
    tpu.vector_store %arg3[%c11_70, %c0_71, %c0_72], %72 {strides = array<i32>} : memref<16x16x256xf32, #tpu.memory_space<vmem>>, vector<1x16x256xf32>,
    %c12 = arith.constant 12 : index
    %c0_73 = arith.constant 0 : index
    %c0_74 = arith.constant 0 : index
    %73 = vector.load %arg2[%c12, %c0_73, %c0_74] : memref<16x8x256xf32, #tpu.memory_space<vmem>>, vector<1x8x256xf32>
    %74 = vector.shape_cast %73 : vector<1x8x256xf32> to vector<8x256xf32>
    %cst_75 = arith.constant dense<0.000000e+00> : vector<16x256xf32>
    %75 = tpu.matmul %0, %74, %cst_75 {dimension_numbers = #tpu.dot_dimension_numbers<[1], [0], [0], [1], [0, 0, 1, 1], [], []>} : vector<16x8xf32>, vector<8x256xf32>, vector<16x256xf32> -> vector<16x256xf32>
    %c12_76 = arith.constant 12 : index
    %c0_77 = arith.constant 0 : index
    %c0_78 = arith.constant 0 : index
    %76 = vector.load %arg3[%c12_76, %c0_77, %c0_78] : memref<16x16x256xf32, #tpu.memory_space<vmem>>, vector<1x16x256xf32>
    %77 = vector.shape_cast %76 : vector<1x16x256xf32> to vector<16x256xf32>
    %78 = vector.shape_cast %75 : vector<16x256xf32> to vector<1x16x256xf32>
    tpu.vector_store %arg3[%c12_76, %c0_77, %c0_78], %78 {strides = array<i32>} : memref<16x16x256xf32, #tpu.memory_space<vmem>>, vector<1x16x256xf32>,
    %c13 = arith.constant 13 : index
    %c0_79 = arith.constant 0 : index
    %c0_80 = arith.constant 0 : index
    %79 = vector.load %arg2[%c13, %c0_79, %c0_80] : memref<16x8x256xf32, #tpu.memory_space<vmem>>, vector<1x8x256xf32>
    %80 = vector.shape_cast %79 : vector<1x8x256xf32> to vector<8x256xf32>
    %cst_81 = arith.constant dense<0.000000e+00> : vector<16x256xf32>
    %81 = tpu.matmul %0, %80, %cst_81 {dimension_numbers = #tpu.dot_dimension_numbers<[1], [0], [0], [1], [0, 0, 1, 1], [], []>} : vector<16x8xf32>, vector<8x256xf32>, vector<16x256xf32> -> vector<16x256xf32>
    %c13_82 = arith.constant 13 : index
    %c0_83 = arith.constant 0 : index
    %c0_84 = arith.constant 0 : index
    %82 = vector.load %arg3[%c13_82, %c0_83, %c0_84] : memref<16x16x256xf32, #tpu.memory_space<vmem>>, vector<1x16x256xf32>
    %83 = vector.shape_cast %82 : vector<1x16x256xf32> to vector<16x256xf32>
    %84 = vector.shape_cast %81 : vector<16x256xf32> to vector<1x16x256xf32>
    tpu.vector_store %arg3[%c13_82, %c0_83, %c0_84], %84 {strides = array<i32>} : memref<16x16x256xf32, #tpu.memory_space<vmem>>, vector<1x16x256xf32>,
    %c14 = arith.constant 14 : index
    %c0_85 = arith.constant 0 : index
    %c0_86 = arith.constant 0 : index
    %85 = vector.load %arg2[%c14, %c0_85, %c0_86] : memref<16x8x256xf32, #tpu.memory_space<vmem>>, vector<1x8x256xf32>
    %86 = vector.shape_cast %85 : vector<1x8x256xf32> to vector<8x256xf32>
    %cst_87 = arith.constant dense<0.000000e+00> : vector<16x256xf32>
    %87 = tpu.matmul %0, %86, %cst_87 {dimension_numbers = #tpu.dot_dimension_numbers<[1], [0], [0], [1], [0, 0, 1, 1], [], []>} : vector<16x8xf32>, vector<8x256xf32>, vector<16x256xf32> -> vector<16x256xf32>
    %c14_88 = arith.constant 14 : index
    %c0_89 = arith.constant 0 : index
    %c0_90 = arith.constant 0 : index
    %88 = vector.load %arg3[%c14_88, %c0_89, %c0_90] : memref<16x16x256xf32, #tpu.memory_space<vmem>>, vector<1x16x256xf32>
    %89 = vector.shape_cast %88 : vector<1x16x256xf32> to vector<16x256xf32>
    %90 = vector.shape_cast %87 : vector<16x256xf32> to vector<1x16x256xf32>
    tpu.vector_store %arg3[%c14_88, %c0_89, %c0_90], %90 {strides = array<i32>} : memref<16x16x256xf32, #tpu.memory_space<vmem>>, vector<1x16x256xf32>,
    %c15 = arith.constant 15 : index
    %c0_91 = arith.constant 0 : index
    %c0_92 = arith.constant 0 : index
    %91 = vector.load %arg2[%c15, %c0_91, %c0_92] : memref<16x8x256xf32, #tpu.memory_space<vmem>>, vector<1x8x256xf32>
    %92 = vector.shape_cast %91 : vector<1x8x256xf32> to vector<8x256xf32>
    %cst_93 = arith.constant dense<0.000000e+00> : vector<16x256xf32>
    %93 = tpu.matmul %0, %92, %cst_93 {dimension_numbers = #tpu.dot_dimension_numbers<[1], [0], [0], [1], [0, 0, 1, 1], [], []>} : vector<16x8xf32>, vector<8x256xf32>, vector<16x256xf32> -> vector<16x256xf32>
    %c15_94 = arith.constant 15 : index
    %c0_95 = arith.constant 0 : index
    %c0_96 = arith.constant 0 : index
    %94 = vector.load %arg3[%c15_94, %c0_95, %c0_96] : memref<16x16x256xf32, #tpu.memory_space<vmem>>, vector<1x16x256xf32>
    %95 = vector.shape_cast %94 : vector<1x16x256xf32> to vector<16x256xf32>
    %96 = vector.shape_cast %93 : vector<16x256xf32> to vector<1x16x256xf32>
    tpu.vector_store %arg3[%c15_94, %c0_95, %c0_96], %96 {strides = array<i32>} : memref<16x16x256xf32, #tpu.memory_space<vmem>>, vector<1x16x256xf32>,
    return
  }
  func.func @transform_0(%arg0: i32) -> (i32, i32) {
    %c0_i32 = arith.constant 0 : i32
    %c0_i32_0 = arith.constant 0 : i32
    %c0_i32_1 = arith.constant 0 : i32
    return %c0_i32, %c0_i32_0 : i32, i32
  }
  func.func @transform_1(%arg0: i32) -> (i32, i32, i32) {
    %c0_i32 = arith.constant 0 : i32
    %c0_i32_0 = arith.constant 0 : i32
    %c0_i32_1 = arith.constant 0 : i32
    return %arg0, %c0_i32, %c0_i32_0 : i32, i32, i32
  }
  func.func @transform_2(%arg0: i32) -> (i32, i32, i32) {
    %c0_i32 = arith.constant 0 : i32
    %c0_i32_0 = arith.constant 0 : i32
    %c0_i32_1 = arith.constant 0 : i32
    return %arg0, %c0_i32, %c0_i32_0 : i32, i32, i32
  }
}

module attributes {stable_mosaic.version = 11 : i64} {
  func.func @_fused_tail_kernel(%arg0: i32, %arg1: memref<256x256xf32, #tpu.memory_space<vmem>>, %arg2: memref<256x256xf32, #tpu.memory_space<vmem>>, %arg3: memref<256x48xf32, #tpu.memory_space<vmem>>, %arg4: memref<1x48xf32, #tpu.memory_space<vmem>>, %arg5: memref<256x256xf32, #tpu.memory_space<vmem>>, %arg6: memref<48x256xf32, #tpu.memory_space<vmem>>, %arg7: memref<1x256xf32, #tpu.memory_space<vmem>>, %arg8: memref<256x256xf32, #tpu.memory_space<vmem>>, %arg9: memref<1x256xf32, #tpu.memory_space<vmem>>, %arg10: memref<256x128xf32, #tpu.memory_space<vmem>>, %arg11: memref<1x128xf32, #tpu.memory_space<vmem>>, %arg12: memref<256x256xf32, #tpu.memory_space<vmem>>, %arg13: memref<256x128xf32, #tpu.memory_space<vmem>>) attributes {dimension_semantics = [#tpu.dimension_semantics<parallel>], iteration_bounds = array<i64: 2>, scalar_prefetch = 0 : i64, scratch_operands = 0 : i64, tpu.core_type = #tpu.core_type<tc>, window_params = [{transform_indices = @transform_0, window_bounds = array<i64: 256, 256>}, {transform_indices = @transform_1, window_bounds = array<i64: 256, 256>}, {pipeline_mode = #tpu.pipeline_mode<synchronous>, transform_indices = @transform_2, window_bounds = array<i64: 256, 48>}, {pipeline_mode = #tpu.pipeline_mode<synchronous>, transform_indices = @transform_3, window_bounds = array<i64: 1, 48>}, {pipeline_mode = #tpu.pipeline_mode<synchronous>, transform_indices = @transform_4, window_bounds = array<i64: 256, 256>}, {pipeline_mode = #tpu.pipeline_mode<synchronous>, transform_indices = @transform_5, window_bounds = array<i64: 48, 256>}, {pipeline_mode = #tpu.pipeline_mode<synchronous>, transform_indices = @transform_6, window_bounds = array<i64: 1, 256>}, {pipeline_mode = #tpu.pipeline_mode<synchronous>, transform_indices = @transform_7, window_bounds = array<i64: 256, 256>}, {pipeline_mode = #tpu.pipeline_mode<synchronous>, transform_indices = @transform_8, window_bounds = array<i64: 1, 256>}, {pipeline_mode = #tpu.pipeline_mode<synchronous>, transform_indices = @transform_9, window_bounds = array<i64: 256, 128>}, {pipeline_mode = #tpu.pipeline_mode<synchronous>, transform_indices = @transform_10, window_bounds = array<i64: 1, 128>}, {transform_indices = @transform_11, window_bounds = array<i64: 256, 256>}, {transform_indices = @transform_12, window_bounds = array<i64: 256, 128>}]} {
    %c0 = arith.constant 0 : index
    %c0_0 = arith.constant 0 : index
    %0 = vector.load %arg2[%c0, %c0_0] : memref<256x256xf32, #tpu.memory_space<vmem>>, vector<256x256xf32>
    %c0_1 = arith.constant 0 : index
    %c0_2 = arith.constant 0 : index
    %1 = vector.load %arg3[%c0_1, %c0_2] : memref<256x48xf32, #tpu.memory_space<vmem>>, vector<256x48xf32>
    %cst = arith.constant dense<0.000000e+00> : vector<256x48xf32>
    %2 = tpu.matmul %0, %1, %cst {dimension_numbers = #tpu.dot_dimension_numbers<[1], [0], [0], [1], [0, 0, 1, 1], [], []>} : vector<256x256xf32>, vector<256x48xf32>, vector<256x48xf32> -> vector<256x48xf32>
    %c0_3 = arith.constant 0 : index
    %c0_4 = arith.constant 0 : index
    %3 = vector.load %arg4[%c0_3, %c0_4] : memref<1x48xf32, #tpu.memory_space<vmem>>, vector<1x48xf32>
    %4 = vector.broadcast %3 : vector<1x48xf32> to vector<256x48xf32>
    %5 = arith.addf %2, %4 : vector<256x48xf32>
    %cst_5 = arith.constant 1.000000e-01 : f32
    %6 = vector.broadcast %cst_5 : f32 to vector<256x48xf32>
    %7 = arith.mulf %6, %5 : vector<256x48xf32>
    %8 = arith.maximumf %7, %5 : vector<256x48xf32>
    %c0_6 = arith.constant 0 : index
    %c0_7 = arith.constant 0 : index
    %9 = vector.load %arg1[%c0_6, %c0_7] : memref<256x256xf32, #tpu.memory_space<vmem>>, vector<256x256xf32>
    %c0_8 = arith.constant 0 : index
    %c0_9 = arith.constant 0 : index
    %10 = vector.load %arg5[%c0_8, %c0_9] : memref<256x256xf32, #tpu.memory_space<vmem>>, vector<256x256xf32>
    %cst_10 = arith.constant dense<0.000000e+00> : vector<256x256xf32>
    %11 = tpu.matmul %9, %10, %cst_10 {dimension_numbers = #tpu.dot_dimension_numbers<[1], [0], [0], [1], [0, 0, 1, 1], [], []>} : vector<256x256xf32>, vector<256x256xf32>, vector<256x256xf32> -> vector<256x256xf32>
    %c0_11 = arith.constant 0 : index
    %c0_12 = arith.constant 0 : index
    %12 = vector.load %arg6[%c0_11, %c0_12] : memref<48x256xf32, #tpu.memory_space<vmem>>, vector<48x256xf32>
    %cst_13 = arith.constant dense<0.000000e+00> : vector<256x256xf32>
    %13 = tpu.matmul %8, %12, %cst_13 {dimension_numbers = #tpu.dot_dimension_numbers<[1], [0], [0], [1], [0, 0, 1, 1], [], []>} : vector<256x48xf32>, vector<48x256xf32>, vector<256x256xf32> -> vector<256x256xf32>
    %14 = arith.addf %11, %13 : vector<256x256xf32>
    %c0_14 = arith.constant 0 : index
    %c0_15 = arith.constant 0 : index
    %15 = vector.load %arg7[%c0_14, %c0_15] : memref<1x256xf32, #tpu.memory_space<vmem>>, vector<1x256xf32>
    %16 = vector.broadcast %15 : vector<1x256xf32> to vector<256x256xf32>
    %17 = arith.addf %14, %16 : vector<256x256xf32>
    %cst_16 = arith.constant 1.000000e-01 : f32
    %18 = vector.broadcast %cst_16 : f32 to vector<256x256xf32>
    %19 = arith.mulf %18, %17 : vector<256x256xf32>
    %20 = arith.maximumf %19, %17 : vector<256x256xf32>
    %c0_17 = arith.constant 0 : index
    %c0_18 = arith.constant 0 : index
    %21 = vector.load %arg8[%c0_17, %c0_18] : memref<256x256xf32, #tpu.memory_space<vmem>>, vector<256x256xf32>
    %cst_19 = arith.constant dense<0.000000e+00> : vector<256x256xf32>
    %22 = tpu.matmul %20, %21, %cst_19 {dimension_numbers = #tpu.dot_dimension_numbers<[1], [0], [0], [1], [0, 0, 1, 1], [], []>} : vector<256x256xf32>, vector<256x256xf32>, vector<256x256xf32> -> vector<256x256xf32>
    %c0_20 = arith.constant 0 : index
    %c0_21 = arith.constant 0 : index
    %23 = vector.load %arg9[%c0_20, %c0_21] : memref<1x256xf32, #tpu.memory_space<vmem>>, vector<1x256xf32>
    %24 = vector.broadcast %23 : vector<1x256xf32> to vector<256x256xf32>
    %25 = arith.addf %22, %24 : vector<256x256xf32>
    %cst_22 = arith.constant 1.000000e-01 : f32
    %26 = vector.broadcast %cst_22 : f32 to vector<256x256xf32>
    %27 = arith.mulf %26, %25 : vector<256x256xf32>
    %28 = arith.maximumf %27, %25 : vector<256x256xf32>
    %c0_23 = arith.constant 0 : index
    %c0_24 = arith.constant 0 : index
    %29 = vector.load %arg12[%c0_23, %c0_24] : memref<256x256xf32, #tpu.memory_space<vmem>>, vector<256x256xf32>
    tpu.vector_store %arg12[%c0_23, %c0_24], %28 {strides = array<i32>} : memref<256x256xf32, #tpu.memory_space<vmem>>, vector<256x256xf32>,
    %c0_25 = arith.constant 0 : index
    %c0_26 = arith.constant 0 : index
    %30 = vector.load %arg10[%c0_25, %c0_26] : memref<256x128xf32, #tpu.memory_space<vmem>>, vector<256x128xf32>
    %cst_27 = arith.constant dense<0.000000e+00> : vector<256x128xf32>
    %31 = tpu.matmul %28, %30, %cst_27 {dimension_numbers = #tpu.dot_dimension_numbers<[1], [0], [0], [1], [0, 0, 1, 1], [], []>} : vector<256x256xf32>, vector<256x128xf32>, vector<256x128xf32> -> vector<256x128xf32>
    %c0_28 = arith.constant 0 : index
    %c0_29 = arith.constant 0 : index
    %32 = vector.load %arg11[%c0_28, %c0_29] : memref<1x128xf32, #tpu.memory_space<vmem>>, vector<1x128xf32>
    %33 = vector.broadcast %32 : vector<1x128xf32> to vector<256x128xf32>
    %34 = arith.addf %31, %33 : vector<256x128xf32>
    %c0_30 = arith.constant 0 : index
    %c0_31 = arith.constant 0 : index
    %35 = vector.load %arg13[%c0_30, %c0_31] : memref<256x128xf32, #tpu.memory_space<vmem>>, vector<256x128xf32>
    tpu.vector_store %arg13[%c0_30, %c0_31], %34 {strides = array<i32>} : memref<256x128xf32, #tpu.memory_space<vmem>>, vector<256x128xf32>,
    return
  }
  func.func @transform_0(%arg0: i32) -> (i32, i32) {
    %c0_i32 = arith.constant 0 : i32
    %c0_i32_0 = arith.constant 0 : i32
    return %arg0, %c0_i32 : i32, i32
  }
  func.func @transform_1(%arg0: i32) -> (i32, i32) {
    %c0_i32 = arith.constant 0 : i32
    %c0_i32_0 = arith.constant 0 : i32
    return %arg0, %c0_i32 : i32, i32
  }
  func.func @transform_2(%arg0: i32) -> (i32, i32) {
    %c0_i32 = arith.constant 0 : i32
    %c0_i32_0 = arith.constant 0 : i32
    %c0_i32_1 = arith.constant 0 : i32
    return %c0_i32, %c0_i32_0 : i32, i32
  }
  func.func @transform_3(%arg0: i32) -> (i32, i32) {
    %c0_i32 = arith.constant 0 : i32
    %c0_i32_0 = arith.constant 0 : i32
    %c0_i32_1 = arith.constant 0 : i32
    return %c0_i32, %c0_i32_0 : i32, i32
  }
  func.func @transform_4(%arg0: i32) -> (i32, i32) {
    %c0_i32 = arith.constant 0 : i32
    %c0_i32_0 = arith.constant 0 : i32
    %c0_i32_1 = arith.constant 0 : i32
    return %c0_i32, %c0_i32_0 : i32, i32
  }
  func.func @transform_5(%arg0: i32) -> (i32, i32) {
    %c0_i32 = arith.constant 0 : i32
    %c0_i32_0 = arith.constant 0 : i32
    %c0_i32_1 = arith.constant 0 : i32
    return %c0_i32, %c0_i32_0 : i32, i32
  }
  func.func @transform_6(%arg0: i32) -> (i32, i32) {
    %c0_i32 = arith.constant 0 : i32
    %c0_i32_0 = arith.constant 0 : i32
    %c0_i32_1 = arith.constant 0 : i32
    return %c0_i32, %c0_i32_0 : i32, i32
  }
  func.func @transform_7(%arg0: i32) -> (i32, i32) {
    %c0_i32 = arith.constant 0 : i32
    %c0_i32_0 = arith.constant 0 : i32
    %c0_i32_1 = arith.constant 0 : i32
    return %c0_i32, %c0_i32_0 : i32, i32
  }
  func.func @transform_8(%arg0: i32) -> (i32, i32) {
    %c0_i32 = arith.constant 0 : i32
    %c0_i32_0 = arith.constant 0 : i32
    %c0_i32_1 = arith.constant 0 : i32
    return %c0_i32, %c0_i32_0 : i32, i32
  }
  func.func @transform_9(%arg0: i32) -> (i32, i32) {
    %c0_i32 = arith.constant 0 : i32
    %c0_i32_0 = arith.constant 0 : i32
    %c0_i32_1 = arith.constant 0 : i32
    return %c0_i32, %c0_i32_0 : i32, i32
  }
  func.func @transform_10(%arg0: i32) -> (i32, i32) {
    %c0_i32 = arith.constant 0 : i32
    %c0_i32_0 = arith.constant 0 : i32
    %c0_i32_1 = arith.constant 0 : i32
    return %c0_i32, %c0_i32_0 : i32, i32
  }
  func.func @transform_11(%arg0: i32) -> (i32, i32) {
    %c0_i32 = arith.constant 0 : i32
    %c0_i32_0 = arith.constant 0 : i32
    return %arg0, %c0_i32 : i32, i32
  }
  func.func @transform_12(%arg0: i32) -> (i32, i32) {
    %c0_i32 = arith.constant 0 : i32
    %c0_i32_0 = arith.constant 0 : i32
    return %arg0, %c0_i32 : i32, i32
  }
}

</mosaic_0001>

<bundles_post_ra>
// kernel: decoder_forward.5
= control target key start
LH: loop header
LB: loop body
LE: loop exit
PB: predicated region body
PF: predicated region fallthrough
CT: control target
= control target key end

     0   :  { %s934_s9 = smov 0   ;;  %s1045_s0 = inlined_call_operand.vmem [shape: f32[16,8], index: 0, kind: input, shape index: {}]   ;;  %s1046_s1 = inlined_call_operand.vmem [shape: f32[2,8,2048], index: 1, kind: input, shape index: {}]   ;;  %s1047_s2 = inlined_call_operand.vmem [shape: f32[2,16,2048], index: 2, kind: output, shape index: {}]  }
   0x1 LB: > { %s872_s10 = sadd.s32 4294967295, %s916_s9   ;;  %p876_p0 = scmp.ge.s32.totalorder %s916_s9, 1  ;;  %s916_s9 = sphi %s934_s9, %s12_s9  }
   0x2   : > { %p112_p1 = scmp.lt.s32.totalorder %s916_s9, 3 }
   0x4   : > { %p113_p2 = pnand %p876_p0, %p112_p1 }
   0x5   : > { %p134_p3 = scmp.lt.s32.totalorder (!%p113_p2), %s872_s10, 1 }
   0x6   : > { %116 = sbr.rel (%p113_p2) target bundleno = 241 (0xf1), region = 28 }
   0xb   : > { %v918_v0 = vmov 0.0   ;;  %s1049_s10 = smov (!%p134_p3, %s872_s10), 1  ;;  %v144_v1 = vld [vmem:[%s1045_s0] sm:$0xff]  ;;  %vm162_vm0 = vcmask 64512   ;;  %v145_v10 = vld [vmem:[%s1045_s0 + $0x8] sm:$0xff] }
   0xc   : > { %233 = vmatprep.mubr.f32.mxu0 %v918_v0  ;;  %310 = vmatprep.mubr.f32.mxu1 %v918_v0  ;;  %s899_s11 = sshll.u32 %s1049_s10, 7  ;;  %s900_s19 = sshll.u32 %s1049_s10, 8 }
   0xd   : > { %s950_s14 = scalar_lea.vmem %s1046_s1, %s899_s11  ;;  %s1008_s22 = scalar_lea.vmem %s1047_s2, %s900_s19 }
   0xe   : > { %v147_v2 = vld [vmem:[%s950_s14 + $0x8] sm:$0xff]  ;;  %v149_v3 = vld [vmem:[%s950_s14 + $0x18] sm:$0xff]  ;;  %v146_v4 = vld [vmem:[%s950_s14] sm:$0xff] }
   0xf   : > { %199 = vmatprep.subr.mxu0 %v147_v2  ;;  %276 = vmatprep.subr.mxu1 %v149_v3  ;;  %v148_v5 = vld [vmem:[%s950_s14 + $0x10] sm:$0xff]  ;;  %v151_v6 = vld [vmem:[%s950_s14 + $0x28] sm:$0xff]  ;;  %v153_v7 = vld [vmem:[%s950_s14 + $0x38] sm:$0xff] }
  0x10   : > { %200 = vmatpush1.msra.mxu0 %v146_v4  ;;  %277 = vmatpush1.msra.mxu1 %v148_v5  ;;  %v150_v8 = vld [vmem:[%s950_s14 + $0x20] sm:$0xff]  ;;  %v152_v9 = vld [vmem:[%s950_s14 + $0x30] sm:$0xff]  ;;  %v155_v11 = vld [vmem:[%s950_s14 + $0x48] sm:$0xff] }
  0x11   : > { %881 = vmatmul.mubr.msk.f32.vlgmr.msra.gmra.mxu0 %vm162_vm0, %v144_v1  ;;  %883 = vmatmul.mubr.msk.f32.vlgmr.msra.gmra.mxu1 %vm162_vm0, %v144_v1  ;;  %v157_v12 = vld [vmem:[%s950_s14 + $0x58] sm:$0xff]  ;;  %v154_v13 = vld [vmem:[%s950_s14 + $0x40] sm:$0xff]  ;;  %v156_v14 = vld [vmem:[%s950_s14 + $0x50] sm:$0xff] }
  0x12   : > { %353 = vmatprep.subr.mxu0 %v151_v6  ;;  %430 = vmatprep.subr.mxu1 %v153_v7  ;;  %v159_v15 = vld [vmem:[%s950_s14 + $0x68] sm:$0xff]  ;;  %v161_v16 = vld [vmem:[%s950_s14 + $0x78] sm:$0xff]  ;;  %v158_v17 = vld [vmem:[%s950_s14 + $0x60] sm:$0xff] }
  0x13   : > { %354 = vmatpush1.msra.mxu0 %v150_v8  ;;  %431 = vmatpush1.msra.mxu1 %v152_v9  ;;  %v160_v18 = vld [vmem:[%s950_s14 + $0x70] sm:$0xff] }
  0x14   : > { %239 = vmatprep.mubr.f32.mxu0 %v918_v0  ;;  %316 = vmatprep.mubr.f32.mxu1 %v918_v0 }
  0x15   : > { %882 = vmatmul.mubr.msk.f32.gmra.mxu0 %vm162_vm0, %v145_v10  ;;  %884 = vmatmul.mubr.msk.f32.gmra.mxu1 %vm162_vm0, %v145_v10 }
  0x16   : > { %387 = vmatprep.mubr.f32.mxu0 %v918_v0  ;;  %464 = vmatprep.mubr.f32.mxu1 %v918_v0 }
  0x17   : > { %507 = vmatprep.subr.mxu0 %v155_v11  ;;  %584 = vmatprep.subr.mxu1 %v157_v12 }
  0x19   : > { %885 = vmatmul.mubr.msk.f32.vlgmr.msra.gmra.mxu0 %vm162_vm0, %v144_v1  ;;  %887 = vmatmul.mubr.msk.f32.vlgmr.msra.gmra.mxu1 %vm162_vm0, %v144_v1 }
  0x1a   : > { %508 = vmatpush1.msra.mxu0 %v154_v13  ;;  %585 = vmatpush1.msra.mxu1 %v156_v14 }
  0x1b   : > { %393 = vmatprep.mubr.f32.mxu0 %v918_v0  ;;  %470 = vmatprep.mubr.f32.mxu1 %v918_v0 }
  0x1c   : > { %661 = vmatprep.subr.mxu0 %v159_v15  ;;  %738 = vmatprep.subr.mxu1 %v161_v16 }
  0x1d   : > { %886 = vmatmul.mubr.msk.f32.gmra.mxu0 %vm162_vm0, %v145_v10  ;;  %888 = vmatmul.mubr.msk.f32.gmra.mxu1 %vm162_vm0, %v145_v10 }
  0x1e   : > { %541 = vmatprep.mubr.f32.mxu0 %v918_v0  ;;  %618 = vmatprep.mubr.f32.mxu1 %v918_v0 }
  0x21   : > { %889 = vmatmul.mubr.msk.f32.vlgmr.msra.gmra.mxu0 %vm162_vm0, %v144_v1  ;;  %891 = vmatmul.mubr.msk.f32.vlgmr.msra.gmra.mxu1 %vm162_vm0, %v144_v1 }
  0x22   : > { %662 = vmatpush1.msra.mxu0 %v158_v17  ;;  %739 = vmatpush1.msra.mxu1 %v160_v18 }
  0x23   : > { %547 = vmatprep.mubr.f32.mxu0 %v918_v0  ;;  %624 = vmatprep.mubr.f32.mxu1 %v918_v0 }
  0x25   : > { %890 = vmatmul.mubr.msk.f32.gmra.mxu0 %vm162_vm0, %v145_v10  ;;  %892 = vmatmul.mubr.msk.f32.gmra.mxu1 %vm162_vm0, %v145_v10 }
  0x26   : > { %695 = vmatprep.mubr.f32.mxu0 %v918_v0  ;;  %772 = vmatprep.mubr.f32.mxu1 %v918_v0 }
  0x29   : > { %893 = vmatmul.mubr.msk.f32.vlgmr.msra.gmra.mxu0 %vm162_vm0, %v144_v1  ;;  %895 = vmatmul.mubr.msk.f32.vlgmr.msra.gmra.mxu1 %vm162_vm0, %v144_v1 }
  0x2a   : > { %701 = vmatprep.mubr.f32.mxu0 %v918_v0  ;;  %778 = vmatprep.mubr.f32.mxu1 %v918_v0 }
  0x2d   : > { %894 = vmatmul.mubr.msk.f32.gmra.mxu0 %vm162_vm0, %v145_v10  ;;  %896 = vmatmul.mubr.msk.f32.gmra.mxu1 %vm162_vm0, %v145_v10 }
  0xd1   : > { %v235_v19 = vpop.f32.mrf.mxu0  ;;  %v312_v20 = vpop.f32.mrf.mxu1 }
  0xd2   : > { %785 = vst [vmem:[%s1008_s22] sm:$0xff] %v235_v19  ;;  %787 = vst [vmem:[%s1008_s22 + $0x10] sm:$0xff] %v312_v20 }
  0xd3   : > { %v237_v21 = vpop.f32.mrf.mxu0  ;;  %v314_v22 = vpop.f32.mrf.mxu1 }
  0xd4   : > { %786 = vst [vmem:[%s1008_s22 + $0x8] sm:$0xff] %v237_v21  ;;  %788 = vst [vmem:[%s1008_s22 + $0x18] sm:$0xff] %v314_v22 }
  0xd5   : > { %v241_v23 = vpop.f32.mrf.mxu0  ;;  %v318_v24 = vpop.f32.mrf.mxu1 }
  0xd6   : > { %801 = vst [vmem:[%s1008_s22 + $0x80] sm:$0xff] %v241_v23  ;;  %803 = vst [vmem:[%s1008_s22 + $0x90] sm:$0xff] %v318_v24 }
  0xd7   : > { %v243_v25 = vpop.f32.mrf.mxu0  ;;  %v320_v26 = vpop.f32.mrf.mxu1 }
  0xd8   : > { %802 = vst [vmem:[%s1008_s22 + $0x88] sm:$0xff] %v243_v25  ;;  %804 = vst [vmem:[%s1008_s22 + $0x98] sm:$0xff] %v320_v26 }
  0xd9   : > { %v389_v27 = vpop.f32.mrf.mxu0  ;;  %v466_v28 = vpop.f32.mrf.mxu1 }
  0xda   : > { %789 = vst [vmem:[%s1008_s22 + $0x20] sm:$0xff] %v389_v27  ;;  %791 = vst [vmem:[%s1008_s22 + $0x30] sm:$0xff] %v466_v28 }
  0xdb   : > { %v391_v29 = vpop.f32.mrf.mxu0  ;;  %v468_v30 = vpop.f32.mrf.mxu1 }
  0xdc   : > { %790 = vst [vmem:[%s1008_s22 + $0x28] sm:$0xff] %v391_v29  ;;  %792 = vst [vmem:[%s1008_s22 + $0x38] sm:$0xff] %v468_v30 }
  0xdd   : > { %v395_v31 = vpop.f32.mrf.mxu0  ;;  %v472_v32 = vpop.f32.mrf.mxu1 }
  0xde   : > { %805 = vst [vmem:[%s1008_s22 + $0xa0] sm:$0xff] %v395_v31  ;;  %807 = vst [vmem:[%s1008_s22 + $0xb0] sm:$0xff] %v472_v32 }
  0xdf   : > { %v397_v33 = vpop.f32.mrf.mxu0  ;;  %v474_v34 = vpop.f32.mrf.mxu1 }
  0xe0   : > { %806 = vst [vmem:[%s1008_s22 + $0xa8] sm:$0xff] %v397_v33  ;;  %808 = vst [vmem:[%s1008_s22 + $0xb8] sm:$0xff] %v474_v34 }
  0xe1   : > { %v543_v35 = vpop.f32.mrf.mxu0  ;;  %v620_v36 = vpop.f32.mrf.mxu1 }
  0xe2   : > { %793 = vst [vmem:[%s1008_s22 + $0x40] sm:$0xff] %v543_v35  ;;  %795 = vst [vmem:[%s1008_s22 + $0x50] sm:$0xff] %v620_v36 }
  0xe3   : > { %v545_v37 = vpop.f32.mrf.mxu0  ;;  %v622_v38 = vpop.f32.mrf.mxu1 }
  0xe4   : > { %794 = vst [vmem:[%s1008_s22 + $0x48] sm:$0xff] %v545_v37  ;;  %796 = vst [vmem:[%s1008_s22 + $0x58] sm:$0xff] %v622_v38 }
  0xe5   : > { %v549_v39 = vpop.f32.mrf.mxu0  ;;  %v626_v40 = vpop.f32.mrf.mxu1 }
  0xe6   : > { %809 = vst [vmem:[%s1008_s22 + $0xc0] sm:$0xff] %v549_v39  ;;  %811 = vst [vmem:[%s1008_s22 + $0xd0] sm:$0xff] %v626_v40 }
  0xe7   : > { %v551_v41 = vpop.f32.mrf.mxu0  ;;  %v628_v42 = vpop.f32.mrf.mxu1 }
  0xe8   : > { %810 = vst [vmem:[%s1008_s22 + $0xc8] sm:$0xff] %v551_v41  ;;  %812 = vst [vmem:[%s1008_s22 + $0xd8] sm:$0xff] %v628_v42 }
  0xe9   : > { %v697_v43 = vpop.f32.mrf.mxu0  ;;  %v774_v44 = vpop.f32.mrf.mxu1 }
  0xea   : > { %797 = vst [vmem:[%s1008_s22 + $0x60] sm:$0xff] %v697_v43  ;;  %799 = vst [vmem:[%s1008_s22 + $0x70] sm:$0xff] %v774_v44 }
  0xeb   : > { %v699_v45 = vpop.f32.mrf.mxu0  ;;  %v776_v46 = vpop.f32.mrf.mxu1 }
  0xec   : > { %798 = vst [vmem:[%s1008_s22 + $0x68] sm:$0xff] %v699_v45  ;;  %800 = vst [vmem:[%s1008_s22 + $0x78] sm:$0xff] %v776_v46 }
  0xed   : > { %v703_v47 = vpop.f32.mrf.mxu0  ;;  %v780_v48 = vpop.f32.mrf.mxu1 }
  0xee   : > { %813 = vst [vmem:[%s1008_s22 + $0xe0] sm:$0xff] %v703_v47  ;;  %815 = vst [vmem:[%s1008_s22 + $0xf0] sm:$0xff] %v780_v48 }
  0xef   : > { %v705_v49 = vpop.f32.mrf.mxu0  ;;  %v782_v50 = vpop.f32.mrf.mxu1 }
  0xf0   : > { %814 = vst [vmem:[%s1008_s22 + $0xe8] sm:$0xff] %v705_v49  ;;  %816 = vst [vmem:[%s1008_s22 + $0xf8] sm:$0xff] %v782_v50 }
  0xf1 PF: > { %s12_s9 = sadd.s32 1, %s916_s9  }
  0xf2   : > { %p9_p4 = scmp.ge.s32.totalorder %s12_s9, 4  }
  0xf4   :  { %11 = sbr.rel (!%p9_p4) target bundleno = 1 (0x1), region = 58 }

// kernel: decoder_forward.4
= control target key start
LH: loop header
LB: loop body
LE: loop exit
PB: predicated region body
PF: predicated region fallthrough
CT: control target
= control target key end

     0   :  { %s734_s12 = smov 0   ;;  %s1222_s0 = inlined_call_operand.vmem [shape: f32[128,512], index: 0, kind: input, shape index: {}]   ;;  %s1223_s1 = inlined_call_operand.vmem [shape: f32[512,256], index: 1, kind: input, shape index: {}]   ;;  %s1224_s2 = inlined_call_operand.vmem [shape: f32[1,256], index: 2, kind: input, shape index: {}]   ;;  %s1225_s3 = inlined_call_operand.vmem [shape: f32[128,256], index: 3, kind: output, shape index: {}]  }
   0x1 LB: > { %s683_s13 = sadd.s32 4294967295, %s712_s12   ;;  %p687_p0 = scmp.ge.s32.totalorder %s712_s12, 1  ;;  %s712_s12 = sphi %s734_s12, %s13_s12  }
   0x2   : > { %p139_p1 = scmp.lt.s32.totalorder %s712_s12, 3 }
   0x4   : > { %p140_p2 = pnand %p687_p0, %p139_p1 }
   0x5   : > { %s1026_s27 = sshll.u32 (!%p140_p2), %s683_s13, 3 }
   0x6   : > { %143 = sbr.rel (%p140_p2) target bundleno = 309 (0x135), region = 32  ;;  %p166_p3 = scmp.lt.s32.totalorder (!%p140_p2), %s1026_s27, 15 }
   0xb   : > { %v242_v0 = vld [vmem:[%s1223_s1 + $0xf8] sm:$0xff]  ;;  %v241_v2 = vld [vmem:[%s1223_s1 + $0xf0] sm:$0xff]  ;;  %v240_v4 = vld [vmem:[%s1223_s1 + $0xe8] sm:$0xff]  ;;  %s1227_s27 = smov (!%p166_p3, %s1026_s27), 15 }
   0xc   : > { %v306_v1 = vld [vmem:[%s1223_s1 + $0x2f8] sm:$0xff]  ;;  %351 = vmatprep.subr.mxu0 %v242_v0  ;;  %v305_v3 = vld [vmem:[%s1223_s1 + $0x2f0] sm:$0xff]  ;;  %v304_v5 = vld [vmem:[%s1223_s1 + $0x2e8] sm:$0xff]  ;;  %s696_s21 = sshll.u32 %s1227_s27, 5  ;;  %s697_s26 = sshll.u32 %s1227_s27, 4 }
   0xd   : > { %464 = vmatprep.subr.mxu1 %v306_v1  ;;  %352 = vmatpush1.msra.mxu0 %v241_v2  ;;  %v239_v6 = vld [vmem:[%s1223_s1 + $0xe0] sm:$0xff]  ;;  %v238_v8 = vld [vmem:[%s1223_s1 + $0xd8] sm:$0xff]  ;;  %v237_v10 = vld [vmem:[%s1223_s1 + $0xd0] sm:$0xff]  ;;  %s1122_s9 = scalar_lea.vmem %s1222_s0, %s696_s21  ;;  %s1188_s30 = scalar_lea.vmem %s1225_s3, %s697_s26 }
   0xe   : > { %465 = vmatpush1.msra.mxu1 %v305_v3  ;;  %v303_v7 = vld [vmem:[%s1223_s1 + $0x2e0] sm:$0xff]  ;;  %353 = vmatprep.subr.mxu0 %v240_v4  ;;  %v302_v9 = vld [vmem:[%s1223_s1 + $0x2d8] sm:$0xff]  ;;  %v301_v11 = vld [vmem:[%s1223_s1 + $0x2d0] sm:$0xff] }
   0xf   : > { %466 = vmatprep.subr.mxu1 %v304_v5  ;;  %354 = vmatpush1.msra.mxu0 %v239_v6  ;;  %v236_v12 = vld [vmem:[%s1223_s1 + $0xc8] sm:$0xff]  ;;  %v235_v14 = vld [vmem:[%s1223_s1 + $0xc0] sm:$0xff]  ;;  %v234_v16 = vld [vmem:[%s1223_s1 + $0xb8] sm:$0xff] }
  0x10   : > { %467 = vmatpush1.msra.mxu1 %v303_v7  ;;  %v300_v13 = vld [vmem:[%s1223_s1 + $0x2c8] sm:$0xff]  ;;  %355 = vmatprep.subr.mxu0 %v238_v8  ;;  %v299_v15 = vld [vmem:[%s1223_s1 + $0x2c0] sm:$0xff]  ;;  %v298_v17 = vld [vmem:[%s1223_s1 + $0x2b8] sm:$0xff] }
  0x11   : > { %468 = vmatprep.subr.mxu1 %v302_v9  ;;  %356 = vmatpush1.msra.mxu0 %v237_v10  ;;  %v233_v18 = vld [vmem:[%s1223_s1 + $0xb0] sm:$0xff]  ;;  %v232_v20 = vld [vmem:[%s1223_s1 + $0xa8] sm:$0xff]  ;;  %v231_v22 = vld [vmem:[%s1223_s1 + $0xa0] sm:$0xff] }
  0x12   : > { %469 = vmatpush1.msra.mxu1 %v301_v11  ;;  %357 = vmatprep.subr.mxu0 %v236_v12  ;;  %v297_v19 = vld [vmem:[%s1223_s1 + $0x2b0] sm:$0xff]  ;;  %v296_v21 = vld [vmem:[%s1223_s1 + $0x2a8] sm:$0xff]  ;;  %v295_v23 = vld [vmem:[%s1223_s1 + $0x2a0] sm:$0xff] }
  0x13   : > { %470 = vmatprep.subr.mxu1 %v300_v13  ;;  %358 = vmatpush1.msra.mxu0 %v235_v14  ;;  %v230_v24 = vld [vmem:[%s1223_s1 + $0x98] sm:$0xff]  ;;  %v229_v26 = vld [vmem:[%s1223_s1 + $0x90] sm:$0xff]  ;;  %v228_v28 = vld [vmem:[%s1223_s1 + $0x88] sm:$0xff] }
  0x14   : > { %471 = vmatpush1.msra.mxu1 %v299_v15  ;;  %359 = vmatprep.subr.mxu0 %v234_v16  ;;  %v294_v25 = vld [vmem:[%s1223_s1 + $0x298] sm:$0xff]  ;;  %v293_v27 = vld [vmem:[%s1223_s1 + $0x290] sm:$0xff]  ;;  %v292_v29 = vld [vmem:[%s1223_s1 + $0x288] sm:$0xff] }
  0x15   : > { %472 = vmatprep.subr.mxu1 %v298_v17  ;;  %360 = vmatpush1.msra.mxu0 %v233_v18  ;;  %v227_v30 = vld [vmem:[%s1223_s1 + $0x80] sm:$0xff]  ;;  %v226_v32 = vld [vmem:[%s1223_s1 + $0x78] sm:$0xff]  ;;  %v225_v34 = vld [vmem:[%s1223_s1 + $0x70] sm:$0xff] }
  0x16   : > { %473 = vmatpush1.msra.mxu1 %v297_v19  ;;  %361 = vmatprep.subr.mxu0 %v232_v20  ;;  %v291_v31 = vld [vmem:[%s1223_s1 + $0x280] sm:$0xff]  ;;  %v290_v33 = vld [vmem:[%s1223_s1 + $0x278] sm:$0xff]  ;;  %v289_v35 = vld [vmem:[%s1223_s1 + $0x270] sm:$0xff] }
  0x17   : > { %474 = vmatprep.subr.mxu1 %v296_v21  ;;  %362 = vmatpush1.msra.mxu0 %v231_v22  ;;  %v224_v36 = vld [vmem:[%s1223_s1 + $0x68] sm:$0xff]  ;;  %v223_v38 = vld [vmem:[%s1223_s1 + $0x60] sm:$0xff]  ;;  %v222_v40 = vld [vmem:[%s1223_s1 + $0x58] sm:$0xff] }
  0x18   : > { %475 = vmatpush1.msra.mxu1 %v295_v23  ;;  %363 = vmatprep.subr.mxu0 %v230_v24  ;;  %v288_v37 = vld [vmem:[%s1223_s1 + $0x268] sm:$0xff]  ;;  %v287_v39 = vld [vmem:[%s1223_s1 + $0x260] sm:$0xff]  ;;  %v286_v41 = vld [vmem:[%s1223_s1 + $0x258] sm:$0xff] }
  0x19   : > { %476 = vmatprep.subr.mxu1 %v294_v25  ;;  %364 = vmatpush1.msra.mxu0 %v229_v26  ;;  %v221_v42 = vld [vmem:[%s1223_s1 + $0x50] sm:$0xff]  ;;  %v220_v44 = vld [vmem:[%s1223_s1 + $0x48] sm:$0xff]  ;;  %v219_v46 = vld [vmem:[%s1223_s1 + $0x40] sm:$0xff] }
  0x1a   : > { %477 = vmatpush1.msra.mxu1 %v293_v27  ;;  %365 = vmatprep.subr.mxu0 %v228_v28  ;;  %v285_v43 = vld [vmem:[%s1223_s1 + $0x250] sm:$0xff]  ;;  %v284_v45 = vld [vmem:[%s1223_s1 + $0x248] sm:$0xff]  ;;  %v283_v47 = vld [vmem:[%s1223_s1 + $0x240] sm:$0xff] }
  0x1b   : > { %478 = vmatprep.subr.mxu1 %v292_v29  ;;  %366 = vmatpush1.msra.mxu0 %v227_v30  ;;  %v218_v48 = vld [vmem:[%s1223_s1 + $0x38] sm:$0xff]  ;;  %v217_v50 = vld [vmem:[%s1223_s1 + $0x30] sm:$0xff]  ;;  %v216_v52 = vld [vmem:[%s1223_s1 + $0x28] sm:$0xff] }
  0x1c   : > { %479 = vmatpush1.msra.mxu1 %v291_v31  ;;  %367 = vmatprep.subr.mxu0 %v226_v32  ;;  %v282_v49 = vld [vmem:[%s1223_s1 + $0x238] sm:$0xff]  ;;  %v281_v51 = vld [vmem:[%s1223_s1 + $0x230] sm:$0xff]  ;;  %v280_v53 = vld [vmem:[%s1223_s1 + $0x228] sm:$0xff] }
  0x1d   : > { %480 = vmatprep.subr.mxu1 %v290_v33  ;;  %368 = vmatpush1.msra.mxu0 %v225_v34  ;;  %v215_v54 = vld [vmem:[%s1223_s1 + $0x20] sm:$0xff]  ;;  %v214_v56 = vld [vmem:[%s1223_s1 + $0x18] sm:$0xff]  ;;  %v213_v58 = vld [vmem:[%s1223_s1 + $0x10] sm:$0xff] }
  0x1e   : > { %481 = vmatpush1.msra.mxu1 %v289_v35  ;;  %369 = vmatprep.subr.mxu0 %v224_v36  ;;  %v279_v55 = vld [vmem:[%s1223_s1 + $0x220] sm:$0xff]  ;;  %v278_v57 = vld [vmem:[%s1223_s1 + $0x218] sm:$0xff]  ;;  %v277_v59 = vld [vmem:[%s1223_s1 + $0x210] sm:$0xff] }
  0x1f   : > { %482 = vmatprep.subr.mxu1 %v288_v37  ;;  %370 = vmatpush1.msra.mxu0 %v223_v38  ;;  %v212_v60 = vld [vmem:[%s1223_s1 + $0x8] sm:$0xff]  ;;  %v211_v62 = vld [vmem:[%s1223_s1] sm:$0xff]  ;;  %v274_v0 = vld [vmem:[%s1223_s1 + $0x1f8] sm:$0xff] }
  0x20   : > { %483 = vmatpush1.msra.mxu1 %v287_v39  ;;  %371 = vmatprep.subr.mxu0 %v222_v40  ;;  %v276_v61 = vld [vmem:[%s1223_s1 + $0x208] sm:$0xff]  ;;  %v275_v63 = vld [vmem:[%s1223_s1 + $0x200] sm:$0xff]  ;;  %v338_v1 = vld [vmem:[%s1223_s1 + $0x3f8] sm:$0xff] }
  0x21   : > { %484 = vmatprep.subr.mxu1 %v286_v41  ;;  %372 = vmatpush1.msra.mxu0 %v221_v42  ;;  %v273_v2 = vld [vmem:[%s1223_s1 + $0x1f0] sm:$0xff]  ;;  %v272_v4 = vld [vmem:[%s1223_s1 + $0x1e8] sm:$0xff]  ;;  %v271_v6 = vld [vmem:[%s1223_s1 + $0x1e0] sm:$0xff] }
  0x22   : > { %485 = vmatpush1.msra.mxu1 %v285_v43  ;;  %373 = vmatprep.subr.mxu0 %v220_v44  ;;  %v337_v3 = vld [vmem:[%s1223_s1 + $0x3f0] sm:$0xff]  ;;  %v336_v5 = vld [vmem:[%s1223_s1 + $0x3e8] sm:$0xff]  ;;  %v335_v7 = vld [vmem:[%s1223_s1 + $0x3e0] sm:$0xff] }
  0x23   : > { %486 = vmatprep.subr.mxu1 %v284_v45  ;;  %374 = vmatpush1.msra.mxu0 %v219_v46  ;;  %v270_v8 = vld [vmem:[%s1223_s1 + $0x1d8] sm:$0xff]  ;;  %v269_v10 = vld [vmem:[%s1223_s1 + $0x1d0] sm:$0xff]  ;;  %v268_v12 = vld [vmem:[%s1223_s1 + $0x1c8] sm:$0xff] }
  0x24   : > { %487 = vmatpush1.msra.mxu1 %v283_v47  ;;  %375 = vmatprep.subr.mxu0 %v218_v48  ;;  %v334_v9 = vld [vmem:[%s1223_s1 + $0x3d8] sm:$0xff]  ;;  %v333_v11 = vld [vmem:[%s1223_s1 + $0x3d0] sm:$0xff]  ;;  %v332_v13 = vld [vmem:[%s1223_s1 + $0x3c8] sm:$0xff] }
  0x25   : > { %488 = vmatprep.subr.mxu1 %v282_v49  ;;  %376 = vmatpush1.msra.mxu0 %v217_v50  ;;  %v267_v14 = vld [vmem:[%s1223_s1 + $0x1c0] sm:$0xff]  ;;  %v266_v16 = vld [vmem:[%s1223_s1 + $0x1b8] sm:$0xff]  ;;  %v265_v18 = vld [vmem:[%s1223_s1 + $0x1b0] sm:$0xff] }
  0x26   : > { %489 = vmatpush1.msra.mxu1 %v281_v51  ;;  %377 = vmatprep.subr.mxu0 %v216_v52  ;;  %v331_v15 = vld [vmem:[%s1223_s1 + $0x3c0] sm:$0xff]  ;;  %v330_v17 = vld [vmem:[%s1223_s1 + $0x3b8] sm:$0xff]  ;;  %v329_v19 = vld [vmem:[%s1223_s1 + $0x3b0] sm:$0xff] }
  0x27   : > { %490 = vmatprep.subr.mxu1 %v280_v53  ;;  %378 = vmatpush1.msra.mxu0 %v215_v54  ;;  %v264_v20 = vld [vmem:[%s1223_s1 + $0x1a8] sm:$0xff]  ;;  %v263_v22 = vld [vmem:[%s1223_s1 + $0x1a0] sm:$0xff]  ;;  %v262_v24 = vld [vmem:[%s1223_s1 + $0x198] sm:$0xff] }
  0x28   : > { %491 = vmatpush1.msra.mxu1 %v279_v55  ;;  %379 = vmatprep.subr.mxu0 %v214_v56  ;;  %v328_v21 = vld [vmem:[%s1223_s1 + $0x3a8] sm:$0xff]  ;;  %v327_v23 = vld [vmem:[%s1223_s1 + $0x3a0] sm:$0xff]  ;;  %v326_v25 = vld [vmem:[%s1223_s1 + $0x398] sm:$0xff] }
  0x29   : > { %492 = vmatprep.subr.mxu1 %v278_v57  ;;  %380 = vmatpush1.msra.mxu0 %v213_v58  ;;  %v261_v26 = vld [vmem:[%s1223_s1 + $0x190] sm:$0xff]  ;;  %v260_v28 = vld [vmem:[%s1223_s1 + $0x188] sm:$0xff]  ;;  %v259_v30 = vld [vmem:[%s1223_s1 + $0x180] sm:$0xff] }
  0x2a   : > { %493 = vmatpush1.msra.mxu1 %v277_v59  ;;  %381 = vmatprep.subr.mxu0 %v212_v60  ;;  %v325_v27 = vld [vmem:[%s1223_s1 + $0x390] sm:$0xff]  ;;  %v324_v29 = vld [vmem:[%s1223_s1 + $0x388] sm:$0xff]  ;;  %v323_v31 = vld [vmem:[%s1223_s1 + $0x380] sm:$0xff] }
  0x2b   : > { %494 = vmatprep.subr.mxu1 %v276_v61  ;;  %382 = vmatpush1.msra.mxu0 %v211_v62  ;;  %v258_v32 = vld [vmem:[%s1223_s1 + $0x178] sm:$0xff]  ;;  %v257_v34 = vld [vmem:[%s1223_s1 + $0x170] sm:$0xff]  ;;  %v256_v36 = vld [vmem:[%s1223_s1 + $0x168] sm:$0xff] }
  0x2c   : > { %495 = vmatpush1.msra.mxu1 %v275_v63  ;;  %383 = vmatprep.subr.mxu0 %v274_v0  ;;  %v322_v33 = vld [vmem:[%s1223_s1 + $0x378] sm:$0xff]  ;;  %v321_v35 = vld [vmem:[%s1223_s1 + $0x370] sm:$0xff]  ;;  %v320_v37 = vld [vmem:[%s1223_s1 + $0x368] sm:$0xff] }
  0x2d   : > { %496 = vmatprep.subr.mxu1 %v338_v1  ;;  %384 = vmatpush2.msra.mxu0 %v273_v2  ;;  %v255_v38 = vld [vmem:[%s1223_s1 + $0x160] sm:$0xff]  ;;  %v254_v40 = vld [vmem:[%s1223_s1 + $0x158] sm:$0xff]  ;;  %v253_v42 = vld [vmem:[%s1223_s1 + $0x150] sm:$0xff] }
  0x2e   : > { %497 = vmatpush2.msra.mxu1 %v337_v3  ;;  %385 = vmatprep.subr.mxu0 %v272_v4  ;;  %v319_v39 = vld [vmem:[%s1223_s1 + $0x360] sm:$0xff]  ;;  %v318_v41 = vld [vmem:[%s1223_s1 + $0x358] sm:$0xff]  ;;  %v317_v43 = vld [vmem:[%s1223_s1 + $0x350] sm:$0xff] }
  0x2f   : > { %498 = vmatprep.subr.mxu1 %v336_v5  ;;  %386 = vmatpush2.msra.mxu0 %v271_v6  ;;  %v252_v44 = vld [vmem:[%s1223_s1 + $0x148] sm:$0xff]  ;;  %v251_v46 = vld [vmem:[%s1223_s1 + $0x140] sm:$0xff]  ;;  %v250_v48 = vld [vmem:[%s1223_s1 + $0x138] sm:$0xff] }
  0x30   : > { %499 = vmatpush2.msra.mxu1 %v335_v7  ;;  %387 = vmatprep.subr.mxu0 %v270_v8  ;;  %v316_v45 = vld [vmem:[%s1223_s1 + $0x348] sm:$0xff]  ;;  %v315_v47 = vld [vmem:[%s1223_s1 + $0x340] sm:$0xff]  ;;  %v314_v49 = vld [vmem:[%s1223_s1 + $0x338] sm:$0xff] }
  0x31   : > { %500 = vmatprep.subr.mxu1 %v334_v9  ;;  %388 = vmatpush2.msra.mxu0 %v269_v10  ;;  %v249_v50 = vld [vmem:[%s1223_s1 + $0x130] sm:$0xff]  ;;  %v248_v52 = vld [vmem:[%s1223_s1 + $0x128] sm:$0xff]  ;;  %v247_v54 = vld [vmem:[%s1223_s1 + $0x120] sm:$0xff] }
  0x32   : > { %501 = vmatpush2.msra.mxu1 %v333_v11  ;;  %389 = vmatprep.subr.mxu0 %v268_v12  ;;  %v313_v51 = vld [vmem:[%s1223_s1 + $0x330] sm:$0xff]  ;;  %v312_v53 = vld [vmem:[%s1223_s1 + $0x328] sm:$0xff]  ;;  %v311_v55 = vld [vmem:[%s1223_s1 + $0x320] sm:$0xff] }
  0x33   : > { %502 = vmatprep.subr.mxu1 %v332_v13  ;;  %390 = vmatpush2.msra.mxu0 %v267_v14  ;;  %v246_v56 = vld [vmem:[%s1223_s1 + $0x118] sm:$0xff]  ;;  %v245_v58 = vld [vmem:[%s1223_s1 + $0x110] sm:$0xff]  ;;  %v244_v60 = vld [vmem:[%s1223_s1 + $0x108] sm:$0xff] }
  0x34   : > { %503 = vmatpush2.msra.mxu1 %v331_v15  ;;  %391 = vmatprep.subr.mxu0 %v266_v16  ;;  %v310_v57 = vld [vmem:[%s1223_s1 + $0x318] sm:$0xff]  ;;  %v309_v59 = vld [vmem:[%s1223_s1 + $0x310] sm:$0xff]  ;;  %v308_v61 = vld [vmem:[%s1223_s1 + $0x308] sm:$0xff] }
  0x35   : > { %504 = vmatprep.subr.mxu1 %v330_v17  ;;  %392 = vmatpush2.msra.mxu0 %v265_v18  ;;  %v243_v62 = vld [vmem:[%s1223_s1 + $0x100] sm:$0xff]  ;;  %v180_v63 = vld [vmem:[%s1122_s9 + $0x8] sm:$0xff]  ;;  %v182_v1 = vld [vmem:[%s1122_s9 + $0x18] sm:$0xff] }
  0x36   : > { %505 = vmatpush2.msra.mxu1 %v329_v19  ;;  %393 = vmatprep.subr.mxu0 %v264_v20  ;;  %v307_v0 = vld [vmem:[%s1223_s1 + $0x300] sm:$0xff]  ;;  %v181_v3 = vld [vmem:[%s1122_s9 + $0x10] sm:$0xff]  ;;  %v184_v4 = vld [vmem:[%s1122_s9 + $0x28] sm:$0xff] }
  0x37   : > { %506 = vmatprep.subr.mxu1 %v328_v21  ;;  %394 = vmatpush2.msra.mxu0 %v263_v22  ;;  %v179_v2 = vld [vmem:[%s1122_s9] sm:$0xff]  ;;  %v186_v5 = vld [vmem:[%s1122_s9 + $0x38] sm:$0xff]  ;;  %v185_v7 = vld [vmem:[%s1122_s9 + $0x30] sm:$0xff] }
  0x38   : > { %507 = vmatpush2.msra.mxu1 %v327_v23  ;;  %395 = vmatprep.subr.mxu0 %v262_v24  ;;  %v183_v6 = vld [vmem:[%s1122_s9 + $0x20] sm:$0xff]  ;;  %v188_v8 = vld [vmem:[%s1122_s9 + $0x48] sm:$0xff]  ;;  %v190_v9 = vld [vmem:[%s1122_s9 + $0x58] sm:$0xff] }
  0x39   : > { %508 = vmatprep.subr.mxu1 %v326_v25  ;;  %396 = vmatpush2.msra.mxu0 %v261_v26  ;;  %v187_v10 = vld [vmem:[%s1122_s9 + $0x40] sm:$0xff]  ;;  %v189_v11 = vld [vmem:[%s1122_s9 + $0x50] sm:$0xff]  ;;  %v192_v12 = vld [vmem:[%s1122_s9 + $0x68] sm:$0xff] }
  0x3a   : > { %509 = vmatpush2.msra.mxu1 %v325_v27  ;;  %397 = vmatprep.subr.mxu0 %v260_v28  ;;  %v194_v13 = vld [vmem:[%s1122_s9 + $0x78] sm:$0xff]  ;;  %v191_v14 = vld [vmem:[%s1122_s9 + $0x60] sm:$0xff]  ;;  %v193_v15 = vld [vmem:[%s1122_s9 + $0x70] sm:$0xff] }
  0x3b   : > { %510 = vmatprep.subr.mxu1 %v324_v29  ;;  %398 = vmatpush2.msra.mxu0 %v259_v30  ;;  %v196_v16 = vld [vmem:[%s1122_s9 + $0x88] sm:$0xff]  ;;  %v198_v17 = vld [vmem:[%s1122_s9 + $0x98] sm:$0xff]  ;;  %v195_v18 = vld [vmem:[%s1122_s9 + $0x80] sm:$0xff] }
  0x3c   : > { %511 = vmatpush2.msra.mxu1 %v323_v31  ;;  %399 = vmatprep.subr.mxu0 %v258_v32  ;;  %v197_v19 = vld [vmem:[%s1122_s9 + $0x90] sm:$0xff]  ;;  %v200_v20 = vld [vmem:[%s1122_s9 + $0xa8] sm:$0xff]  ;;  %v202_v21 = vld [vmem:[%s1122_s9 + $0xb8] sm:$0xff]  ;;  %v341_v32 = vlaneseq }
  0x3d   : > { %512 = vmatprep.subr.mxu1 %v322_v33  ;;  %400 = vmatpush2.msra.mxu0 %v257_v34  ;;  %v199_v22 = vld [vmem:[%s1122_s9 + $0xa0] sm:$0xff]  ;;  %v201_v23 = vld [vmem:[%s1122_s9 + $0xb0] sm:$0xff]  ;;  %v204_v24 = vld [vmem:[%s1122_s9 + $0xc8] sm:$0xff] }
  0x3e   : > { %513 = vmatpush2.msra.mxu1 %v321_v35  ;;  %401 = vmatprep.subr.mxu0 %v256_v36  ;;  %v206_v25 = vld [vmem:[%s1122_s9 + $0xd8] sm:$0xff]  ;;  %v203_v26 = vld [vmem:[%s1122_s9 + $0xc0] sm:$0xff]  ;;  %v205_v27 = vld [vmem:[%s1122_s9 + $0xd0] sm:$0xff]  ;;  %v342_v33 = vshrl.u32 %v341_v32, 7 }
  0x3f   : > { %514 = vmatprep.subr.mxu1 %v320_v37  ;;  %402 = vmatpush2.msra.mxu0 %v255_v38  ;;  %v208_v28 = vld [vmem:[%s1122_s9 + $0xe8] sm:$0xff]  ;;  %v210_v29 = vld [vmem:[%s1122_s9 + $0xf8] sm:$0xff]  ;;  %v207_v30 = vld [vmem:[%s1122_s9 + $0xe0] sm:$0xff] }
  0x40   : > { %515 = vmatpush2.msra.mxu1 %v319_v39  ;;  %403 = vmatprep.subr.mxu0 %v254_v40  ;;  %v209_v31 = vld [vmem:[%s1122_s9 + $0xf0] sm:$0xff]  ;;  %v343_v34 = vsub.s32 0, %v342_v33  ;;  %v339_v35 = vld [vmem:[%s1224_s2] sm:$0x3]  ;;  %v347_v36 = vsub.s32 1, %v342_v33 }
  0x41   : > { %516 = vmatprep.subr.mxu1 %v318_v41  ;;  %404 = vmatpush2.msra.mxu0 %v253_v42 }
  0x42   : > { %517 = vmatpush2.msra.mxu1 %v317_v43  ;;  %405 = vmatprep.subr.mxu0 %v252_v44  ;;  %v1177_v37 = vrot.slane %v339_v35, %v343_v34  ;;  %v1179_v38 = vrot.slane %v339_v35, %v347_v36 }
  0x43   : > { %518 = vmatprep.subr.mxu1 %v316_v45  ;;  %406 = vmatpush2.msra.mxu0 %v251_v46 }
  0x44   : > { %519 = vmatpush2.msra.mxu1 %v315_v47  ;;  %407 = vmatprep.subr.mxu0 %v250_v48 }
  0x45   : > { %520 = vmatprep.subr.mxu1 %v314_v49  ;;  %408 = vmatpush2.msra.mxu0 %v249_v50 }
  0x46   : > { %521 = vmatpush2.msra.mxu1 %v313_v51  ;;  %409 = vmatprep.subr.mxu0 %v248_v52 }
  0x47   : > { %522 = vmatprep.subr.mxu1 %v312_v53  ;;  %410 = vmatpush2.msra.mxu0 %v247_v54 }
  0x48   : > { %523 = vmatpush2.msra.mxu1 %v311_v55  ;;  %411 = vmatprep.subr.mxu0 %v246_v56 }
  0x49   : > { %524 = vmatprep.subr.mxu1 %v310_v57  ;;  %412 = vmatpush2.msra.mxu0 %v245_v58 }
  0x4a   : > { %525 = vmatpush2.msra.mxu1 %v309_v59  ;;  %413 = vmatprep.subr.mxu0 %v244_v60 }
  0x4b   : > { %526 = vmatprep.subr.mxu1 %v308_v61  ;;  %414 = vmatpush2.msra.mxu0 %v243_v62 }
  0x4c   : > { %415 = vmatprep.mubr.f32.mxu0 %v180_v63  ;;  %527 = vmatpush2.msra.mxu1 %v307_v0 }
  0x4d   : > { %528 = vmatprep.mubr.f32.mxu1 %v182_v1  ;;  %416 = vmatmul.mubr.f32.vlgmr.msra.gmra.mxu0 %v179_v2 }
  0x4e   : > { %529 = vmatmul.mubr.f32.vlgmr.msra.gmra.mxu1 %v181_v3  ;;  %421 = vmatprep.mubr.f32.mxu0 %v184_v4 }
  0x4f   : > { %534 = vmatprep.mubr.f32.mxu1 %v186_v5 }
  0x51   : > { %422 = vmatmul.mubr.f32.gmra.mxu0 %v183_v6 }
  0x52   : > { %535 = vmatmul.mubr.f32.gmra.mxu1 %v185_v7  ;;  %427 = vmatprep.mubr.f32.mxu0 %v188_v8 }
  0x53   : > { %540 = vmatprep.mubr.f32.mxu1 %v190_v9 }
  0x55   : > { %428 = vmatmul.mubr.f32.gmra.mxu0 %v187_v10 }
  0x56   : > { %541 = vmatmul.mubr.f32.gmra.mxu1 %v189_v11  ;;  %433 = vmatprep.mubr.f32.mxu0 %v192_v12 }
  0x57   : > { %546 = vmatprep.mubr.f32.mxu1 %v194_v13 }
  0x59   : > { %434 = vmatmul.mubr.f32.gmra.mxu0 %v191_v14 }
  0x5a   : > { %547 = vmatmul.mubr.f32.gmra.mxu1 %v193_v15  ;;  %439 = vmatprep.mubr.f32.mxu0 %v196_v16 }
  0x5b   : > { %552 = vmatprep.mubr.f32.mxu1 %v198_v17 }
  0x5d   : > { %440 = vmatmul.mubr.f32.gmra.mxu0 %v195_v18 }
  0x5e   : > { %553 = vmatmul.mubr.f32.gmra.mxu1 %v197_v19  ;;  %445 = vmatprep.mubr.f32.mxu0 %v200_v20 }
  0x5f   : > { %558 = vmatprep.mubr.f32.mxu1 %v202_v21 }
  0x61   : > { %446 = vmatmul.mubr.f32.gmra.mxu0 %v199_v22 }
  0x62   : > { %559 = vmatmul.mubr.f32.gmra.mxu1 %v201_v23  ;;  %451 = vmatprep.mubr.f32.mxu0 %v204_v24 }
  0x63   : > { %564 = vmatprep.mubr.f32.mxu1 %v206_v25 }
  0x65   : > { %452 = vmatmul.mubr.f32.gmra.mxu0 %v203_v26 }
  0x66   : > { %565 = vmatmul.mubr.f32.gmra.mxu1 %v205_v27  ;;  %457 = vmatprep.mubr.f32.mxu0 %v208_v28 }
  0x67   : > { %570 = vmatprep.mubr.f32.mxu1 %v210_v29 }
  0x69   : > { %458 = vmatmul.mubr.f32.gmra.mxu0 %v207_v30 }
  0x6a   : > { %571 = vmatmul.mubr.f32.gmra.mxu1 %v209_v31 }
 0x10d   : > { %v417_v39 = vpop.f32.mrf.mxu0 }
 0x10e   : > { %v530_v40 = vpop.f32.mrf.mxu1  ;;  %v418_v41 = vadd.f32 %v417_v39, %v1177_v37 }
 0x10f   : > { %v419_v42 = vpop.f32.mrf.mxu0 }
 0x110   : > { %v532_v43 = vpop.f32.mrf.mxu1  ;;  %v531_v44 = vadd.f32 %v530_v40, %v418_v41  ;;  %v420_v45 = vadd.f32 %v419_v42, %v1179_v38 }
 0x111   : > { %v423_v46 = vpop.f32.mrf.mxu0 }
 0x112   : > { %v536_v47 = vpop.f32.mrf.mxu1  ;;  %v577_v48 = vmul.f32 0.1, %v531_v44  ;;  %v533_v49 = vadd.f32 %v532_v43, %v420_v45  ;;  %v424_v50 = vadd.f32 %v423_v46, %v1177_v37 }
 0x113   : > { %v425_v51 = vpop.f32.mrf.mxu0 }
 0x114   : > { %v538_v52 = vpop.f32.mrf.mxu1  ;;  %v593_v53 = vmax.f32 %v577_v48, %v531_v44  ;;  %v578_v54 = vmul.f32 0.1, %v533_v49  ;;  %v537_v55 = vadd.f32 %v536_v47, %v424_v50  ;;  %v426_v56 = vadd.f32 %v425_v51, %v1179_v38 }
 0x115   : > { %v429_v57 = vpop.f32.mrf.mxu0 }
 0x116   : > { %v542_v58 = vpop.f32.mrf.mxu1  ;;  %609 = vst [vmem:[%s1188_s30] sm:$0xff] %v593_v53  ;;  %v594_v59 = vmax.f32 %v578_v54, %v533_v49  ;;  %v579_v60 = vmul.f32 0.1, %v537_v55  ;;  %v539_v61 = vadd.f32 %v538_v52, %v426_v56  ;;  %v430_v62 = vadd.f32 %v429_v57, %v1177_v37 }
 0x117   : > { %v431_v63 = vpop.f32.mrf.mxu0 }
 0x118   : > { %v544_v0 = vpop.f32.mrf.mxu1  ;;  %610 = vst [vmem:[%s1188_s30 + $0x8] sm:$0xff] %v594_v59  ;;  %v595_v1 = vmax.f32 %v579_v60, %v537_v55  ;;  %v580_v2 = vmul.f32 0.1, %v539_v61  ;;  %v543_v3 = vadd.f32 %v542_v58, %v430_v62  ;;  %v432_v4 = vadd.f32 %v431_v63, %v1179_v38 }
 0x119   : > { %v435_v5 = vpop.f32.mrf.mxu0 }
 0x11a   : > { %v548_v6 = vpop.f32.mrf.mxu1  ;;  %611 = vst [vmem:[%s1188_s30 + $0x10] sm:$0xff] %v595_v1  ;;  %v596_v7 = vmax.f32 %v580_v2, %v539_v61  ;;  %v581_v8 = vmul.f32 0.1, %v543_v3  ;;  %v545_v9 = vadd.f32 %v544_v0, %v432_v4  ;;  %v436_v10 = vadd.f32 %v435_v5, %v1177_v37 }
 0x11b   : > { %v437_v11 = vpop.f32.mrf.mxu0 }
 0x11c   : > { %v550_v12 = vpop.f32.mrf.mxu1  ;;  %612 = vst [vmem:[%s1188_s30 + $0x18] sm:$0xff] %v596_v7  ;;  %v597_v13 = vmax.f32 %v581_v8, %v543_v3  ;;  %v582_v14 = vmul.f32 0.1, %v545_v9  ;;  %v549_v15 = vadd.f32 %v548_v6, %v436_v10  ;;  %v438_v16 = vadd.f32 %v437_v11, %v1179_v38 }
 0x11d   : > { %v441_v17 = vpop.f32.mrf.mxu0 }
 0x11e   : > { %v554_v18 = vpop.f32.mrf.mxu1  ;;  %613 = vst [vmem:[%s1188_s30 + $0x20] sm:$0xff] %v597_v13  ;;  %v598_v19 = vmax.f32 %v582_v14, %v545_v9  ;;  %v583_v20 = vmul.f32 0.1, %v549_v15  ;;  %v551_v21 = vadd.f32 %v550_v12, %v438_v16  ;;  %v442_v22 = vadd.f32 %v441_v17, %v1177_v37 }
 0x11f   : > { %v443_v23 = vpop.f32.mrf.mxu0 }
 0x120   : > { %v556_v24 = vpop.f32.mrf.mxu1  ;;  %614 = vst [vmem:[%s1188_s30 + $0x28] sm:$0xff] %v598_v19  ;;  %v599_v25 = vmax.f32 %v583_v20, %v549_v15  ;;  %v584_v26 = vmul.f32 0.1, %v551_v21  ;;  %v555_v27 = vadd.f32 %v554_v18, %v442_v22  ;;  %v444_v28 = vadd.f32 %v443_v23, %v1179_v38 }
 0x121   : > { %v447_v29 = vpop.f32.mrf.mxu0 }
 0x122   : > { %v560_v30 = vpop.f32.mrf.mxu1  ;;  %615 = vst [vmem:[%s1188_s30 + $0x30] sm:$0xff] %v599_v25  ;;  %v600_v31 = vmax.f32 %v584_v26, %v551_v21  ;;  %v585_v32 = vmul.f32 0.1, %v555_v27  ;;  %v557_v33 = vadd.f32 %v556_v24, %v444_v28  ;;  %v448_v34 = vadd.f32 %v447_v29, %v1177_v37 }
 0x123   : > { %v449_v35 = vpop.f32.mrf.mxu0 }
 0x124   : > { %v562_v36 = vpop.f32.mrf.mxu1  ;;  %616 = vst [vmem:[%s1188_s30 + $0x38] sm:$0xff] %v600_v31  ;;  %v601_v39 = vmax.f32 %v585_v32, %v555_v27  ;;  %v586_v40 = vmul.f32 0.1, %v557_v33  ;;  %v561_v41 = vadd.f32 %v560_v30, %v448_v34  ;;  %v450_v42 = vadd.f32 %v449_v35, %v1179_v38 }
 0x125   : > { %v453_v43 = vpop.f32.mrf.mxu0 }
 0x126   : > { %v566_v44 = vpop.f32.mrf.mxu1  ;;  %617 = vst [vmem:[%s1188_s30 + $0x40] sm:$0xff] %v601_v39  ;;  %v602_v45 = vmax.f32 %v586_v40, %v557_v33  ;;  %v587_v46 = vmul.f32 0.1, %v561_v41  ;;  %v563_v47 = vadd.f32 %v562_v36, %v450_v42  ;;  %v454_v48 = vadd.f32 %v453_v43, %v1177_v37 }
 0x127   : > { %v455_v49 = vpop.f32.mrf.mxu0 }
 0x128   : > { %v568_v50 = vpop.f32.mrf.mxu1  ;;  %618 = vst [vmem:[%s1188_s30 + $0x48] sm:$0xff] %v602_v45  ;;  %v603_v51 = vmax.f32 %v587_v46, %v561_v41  ;;  %v588_v52 = vmul.f32 0.1, %v563_v47  ;;  %v567_v53 = vadd.f32 %v566_v44, %v454_v48  ;;  %v456_v54 = vadd.f32 %v455_v49, %v1179_v38 }
 0x129   : > { %v459_v55 = vpop.f32.mrf.mxu0 }
 0x12a   : > { %v572_v56 = vpop.f32.mrf.mxu1  ;;  %619 = vst [vmem:[%s1188_s30 + $0x50] sm:$0xff] %v603_v51  ;;  %v604_v57 = vmax.f32 %v588_v52, %v563_v47  ;;  %v589_v58 = vmul.f32 0.1, %v567_v53  ;;  %v569_v59 = vadd.f32 %v568_v50, %v456_v54  ;;  %v460_v60 = vadd.f32 %v459_v55, %v1177_v37 }
 0x12b   : > { %v461_v61 = vpop.f32.mrf.mxu0 }
 0x12c   : > { %620 = vst [vmem:[%s1188_s30 + $0x58] sm:$0xff] %v604_v57  ;;  %v605_v62 = vmax.f32 %v589_v58, %v567_v53  ;;  %v590_v63 = vmul.f32 0.1, %v569_v59  ;;  %v573_v0 = vadd.f32 %v572_v56, %v460_v60  ;;  %v462_v1 = vadd.f32 %v461_v61, %v1179_v38  ;;  %v574_v2 = vpop.f32.mrf.mxu1 }
 0x12e   : > { %621 = vst [vmem:[%s1188_s30 + $0x60] sm:$0xff] %v605_v62  ;;  %v606_v3 = vmax.f32 %v590_v63, %v569_v59  ;;  %v591_v4 = vmul.f32 0.1, %v573_v0  ;;  %v575_v5 = vadd.f32 %v574_v2, %v462_v1 }
 0x130   : > { %622 = vst [vmem:[%s1188_s30 + $0x68] sm:$0xff] %v606_v3  ;;  %v607_v6 = vmax.f32 %v591_v4, %v573_v0  ;;  %v592_v7 = vmul.f32 0.1, %v575_v5 }
 0x132   : > { %623 = vst [vmem:[%s1188_s30 + $0x70] sm:$0xff] %v607_v6  ;;  %v608_v8 = vmax.f32 %v592_v7, %v575_v5 }
 0x134   : > { %624 = vst [vmem:[%s1188_s30 + $0x78] sm:$0xff] %v608_v8 }
 0x135 PF: > { %s13_s12 = sadd.s32 1, %s712_s12  }
 0x136   : > { %p10_p4 = scmp.ge.s32.totalorder %s13_s12, 4  }
 0x138   :  { %12 = sbr.rel (!%p10_p4) target bundleno = 1 (0x1), region = 62 }

// kernel: decoder_forward.6
= control target key start
LH: loop header
LB: loop body
LE: loop exit
PB: predicated region body
PF: predicated region fallthrough
CT: control target
= control target key end

     0   :  { %s1747_s9 = smov 0   ;;  %s1974_s0 = inlined_call_operand.vmem [shape: f32[16,8], index: 0, kind: input, shape index: {}]   ;;  %s1975_s1 = inlined_call_operand.vmem [shape: f32[32,8,256], index: 1, kind: input, shape index: {}]   ;;  %s1976_s2 = inlined_call_operand.vmem [shape: f32[32,16,256], index: 2, kind: output, shape index: {}]  }
   0x1 LB: > { %s1577_s10 = sadd.s32 4294967295, %s1729_s9   ;;  %p1581_p0 = scmp.ge.s32.totalorder %s1729_s9, 1  ;;  %s1729_s9 = sphi %s1747_s9, %s12_s9  }
   0x2   : > { %p114_p1 = scmp.lt.s32.totalorder %s1729_s9, 3 }
   0x4   : > { %p115_p2 = pnand %p1581_p0, %p114_p1 }
   0x5   : > { %s1582_s11 = sshll.u32 (!%p115_p2), %s1577_s10, 4 }
   0x6   : > { %118 = sbr.rel (%p115_p2) target bundleno = 273 (0x111), region = 28  ;;  %p139_p3 = scmp.lt.s32.totalorder (!%p115_p2), %s1582_s11, 31 }
   0xb   : > { %v1731_v0 = vmov 0.0   ;;  %s1978_s11 = smov (!%p139_p3, %s1582_s11), 31  ;;  %v1768_v1 = vld [vmem:[%s1974_s0] sm:$0xff]  ;;  %vm156_vm0 = vcmask 64512   ;;  %v1785_v10 = vld [vmem:[%s1974_s0 + $0x8] sm:$0xff] }
   0xc   : > { %227 = vmatprep.mubr.f32.mxu0 %v1731_v0  ;;  %311 = vmatprep.mubr.f32.mxu1 %v1731_v0  ;;  %s1712_s12 = sshll.u32 %s1978_s11, 4  ;;  %s1713_s20 = sshll.u32 %s1978_s11, 5 }
   0xd   : > { %s1763_s15 = scalar_lea.vmem %s1975_s1, %s1712_s12  ;;  %s1905_s23 = scalar_lea.vmem %s1976_s2, %s1713_s20 }
   0xe   : > { %v155_v2 = vld [vmem:[%s1763_s15 + $0x8] sm:$0xff]  ;;  %v1591_v3 = vld [vmem:[%s1763_s15 + $0x18] sm:$0xff]  ;;  %v154_v4 = vld [vmem:[%s1763_s15] sm:$0xff] }
   0xf   : > { %193 = vmatprep.subr.mxu0 %v155_v2  ;;  %277 = vmatprep.subr.mxu1 %v1591_v3  ;;  %v1590_v5 = vld [vmem:[%s1763_s15 + $0x10] sm:$0xff]  ;;  %v1599_v6 = vld [vmem:[%s1763_s15 + $0x28] sm:$0xff]  ;;  %v1607_v7 = vld [vmem:[%s1763_s15 + $0x38] sm:$0xff] }
  0x10   : > { %194 = vmatpush1.msra.mxu0 %v154_v4  ;;  %278 = vmatpush1.msra.mxu1 %v1590_v5  ;;  %v1598_v8 = vld [vmem:[%s1763_s15 + $0x20] sm:$0xff]  ;;  %v1606_v9 = vld [vmem:[%s1763_s15 + $0x30] sm:$0xff]  ;;  %v1615_v11 = vld [vmem:[%s1763_s15 + $0x48] sm:$0xff] }
  0x11   : > { %1588 = vmatmul.mubr.msk.f32.vlgmr.msra.gmra.mxu0 %vm156_vm0, %v1768_v1  ;;  %1592 = vmatmul.mubr.msk.f32.vlgmr.msra.gmra.mxu1 %vm156_vm0, %v1768_v1  ;;  %v1623_v12 = vld [vmem:[%s1763_s15 + $0x58] sm:$0xff]  ;;  %v1614_v13 = vld [vmem:[%s1763_s15 + $0x40] sm:$0xff]  ;;  %v1622_v14 = vld [vmem:[%s1763_s15 + $0x50] sm:$0xff] }
  0x12   : > { %362 = vmatprep.subr.mxu0 %v1599_v6  ;;  %447 = vmatprep.subr.mxu1 %v1607_v7  ;;  %v1631_v15 = vld [vmem:[%s1763_s15 + $0x68] sm:$0xff]  ;;  %v1639_v16 = vld [vmem:[%s1763_s15 + $0x78] sm:$0xff]  ;;  %v1630_v17 = vld [vmem:[%s1763_s15 + $0x60] sm:$0xff] }
  0x13   : > { %363 = vmatpush1.msra.mxu0 %v1598_v8  ;;  %448 = vmatpush1.msra.mxu1 %v1606_v9  ;;  %v1638_v18 = vld [vmem:[%s1763_s15 + $0x70] sm:$0xff]  ;;  %v1647_v19 = vld [vmem:[%s1763_s15 + $0x88] sm:$0xff]  ;;  %v1655_v20 = vld [vmem:[%s1763_s15 + $0x98] sm:$0xff] }
  0x14   : > { %233 = vmatprep.mubr.f32.mxu0 %v1731_v0  ;;  %317 = vmatprep.mubr.f32.mxu1 %v1731_v0  ;;  %v1646_v21 = vld [vmem:[%s1763_s15 + $0x80] sm:$0xff]  ;;  %v1654_v22 = vld [vmem:[%s1763_s15 + $0x90] sm:$0xff]  ;;  %v1663_v23 = vld [vmem:[%s1763_s15 + $0xa8] sm:$0xff] }
  0x15   : > { %1589 = vmatmul.mubr.msk.f32.gmra.mxu0 %vm156_vm0, %v1785_v10  ;;  %1593 = vmatmul.mubr.msk.f32.gmra.mxu1 %vm156_vm0, %v1785_v10  ;;  %v1671_v24 = vld [vmem:[%s1763_s15 + $0xb8] sm:$0xff]  ;;  %v1662_v25 = vld [vmem:[%s1763_s15 + $0xa0] sm:$0xff]  ;;  %v1670_v26 = vld [vmem:[%s1763_s15 + $0xb0] sm:$0xff] }
  0x16   : > { %396 = vmatprep.mubr.f32.mxu0 %v1731_v0  ;;  %481 = vmatprep.mubr.f32.mxu1 %v1731_v0  ;;  %v1679_v27 = vld [vmem:[%s1763_s15 + $0xc8] sm:$0xff]  ;;  %v1687_v28 = vld [vmem:[%s1763_s15 + $0xd8] sm:$0xff]  ;;  %v1678_v29 = vld [vmem:[%s1763_s15 + $0xc0] sm:$0xff] }
  0x17   : > { %532 = vmatprep.subr.mxu0 %v1615_v11  ;;  %617 = vmatprep.subr.mxu1 %v1623_v12  ;;  %v1686_v30 = vld [vmem:[%s1763_s15 + $0xd0] sm:$0xff]  ;;  %v1695_v31 = vld [vmem:[%s1763_s15 + $0xe8] sm:$0xff]  ;;  %v1703_v32 = vld [vmem:[%s1763_s15 + $0xf8] sm:$0xff] }
  0x18   : > { %v1694_v33 = vld [vmem:[%s1763_s15 + $0xe0] sm:$0xff]  ;;  %v1702_v34 = vld [vmem:[%s1763_s15 + $0xf0] sm:$0xff] }
  0x19   : > { %1600 = vmatmul.mubr.msk.f32.vlgmr.msra.gmra.mxu0 %vm156_vm0, %v1768_v1  ;;  %1608 = vmatmul.mubr.msk.f32.vlgmr.msra.gmra.mxu1 %vm156_vm0, %v1768_v1 }
  0x1a   : > { %533 = vmatpush1.msra.mxu0 %v1614_v13  ;;  %618 = vmatpush1.msra.mxu1 %v1622_v14 }
  0x1b   : > { %402 = vmatprep.mubr.f32.mxu0 %v1731_v0  ;;  %487 = vmatprep.mubr.f32.mxu1 %v1731_v0 }
  0x1c   : > { %702 = vmatprep.subr.mxu0 %v1631_v15  ;;  %787 = vmatprep.subr.mxu1 %v1639_v16 }
  0x1d   : > { %1601 = vmatmul.mubr.msk.f32.gmra.mxu0 %vm156_vm0, %v1785_v10  ;;  %1609 = vmatmul.mubr.msk.f32.gmra.mxu1 %vm156_vm0, %v1785_v10 }
  0x1e   : > { %566 = vmatprep.mubr.f32.mxu0 %v1731_v0  ;;  %651 = vmatprep.mubr.f32.mxu1 %v1731_v0 }
  0x21   : > { %1616 = vmatmul.mubr.msk.f32.vlgmr.msra.gmra.mxu0 %vm156_vm0, %v1768_v1  ;;  %1624 = vmatmul.mubr.msk.f32.vlgmr.msra.gmra.mxu1 %vm156_vm0, %v1768_v1 }
  0x22   : > { %703 = vmatpush1.msra.mxu0 %v1630_v17  ;;  %788 = vmatpush1.msra.mxu1 %v1638_v18 }
  0x23   : > { %572 = vmatprep.mubr.f32.mxu0 %v1731_v0  ;;  %657 = vmatprep.mubr.f32.mxu1 %v1731_v0 }
  0x24   : > { %872 = vmatprep.subr.mxu0 %v1647_v19  ;;  %957 = vmatprep.subr.mxu1 %v1655_v20 }
  0x25   : > { %1617 = vmatmul.mubr.msk.f32.gmra.mxu0 %vm156_vm0, %v1785_v10  ;;  %1625 = vmatmul.mubr.msk.f32.gmra.mxu1 %vm156_vm0, %v1785_v10 }
  0x26   : > { %736 = vmatprep.mubr.f32.mxu0 %v1731_v0  ;;  %821 = vmatprep.mubr.f32.mxu1 %v1731_v0 }
  0x29   : > { %1632 = vmatmul.mubr.msk.f32.vlgmr.msra.gmra.mxu0 %vm156_vm0, %v1768_v1  ;;  %1640 = vmatmul.mubr.msk.f32.vlgmr.msra.gmra.mxu1 %vm156_vm0, %v1768_v1 }
  0x2a   : > { %873 = vmatpush1.msra.mxu0 %v1646_v21  ;;  %958 = vmatpush1.msra.mxu1 %v1654_v22 }
  0x2b   : > { %742 = vmatprep.mubr.f32.mxu0 %v1731_v0  ;;  %827 = vmatprep.mubr.f32.mxu1 %v1731_v0 }
  0x2c   : > { %1042 = vmatprep.subr.mxu0 %v1663_v23  ;;  %1127 = vmatprep.subr.mxu1 %v1671_v24 }
  0x2d   : > { %1633 = vmatmul.mubr.msk.f32.gmra.mxu0 %vm156_vm0, %v1785_v10  ;;  %1641 = vmatmul.mubr.msk.f32.gmra.mxu1 %vm156_vm0, %v1785_v10 }
  0x2e   : > { %906 = vmatprep.mubr.f32.mxu0 %v1731_v0  ;;  %991 = vmatprep.mubr.f32.mxu1 %v1731_v0 }
  0x31   : > { %1648 = vmatmul.mubr.msk.f32.vlgmr.msra.gmra.mxu0 %vm156_vm0, %v1768_v1  ;;  %1656 = vmatmul.mubr.msk.f32.vlgmr.msra.gmra.mxu1 %vm156_vm0, %v1768_v1 }
  0x32   : > { %1043 = vmatpush1.msra.mxu0 %v1662_v25  ;;  %1128 = vmatpush1.msra.mxu1 %v1670_v26 }
  0x33   : > { %912 = vmatprep.mubr.f32.mxu0 %v1731_v0  ;;  %997 = vmatprep.mubr.f32.mxu1 %v1731_v0 }
  0x34   : > { %1212 = vmatprep.subr.mxu0 %v1679_v27  ;;  %1297 = vmatprep.subr.mxu1 %v1687_v28 }
  0x35   : > { %1649 = vmatmul.mubr.msk.f32.gmra.mxu0 %vm156_vm0, %v1785_v10  ;;  %1657 = vmatmul.mubr.msk.f32.gmra.mxu1 %vm156_vm0, %v1785_v10 }
  0x36   : > { %1076 = vmatprep.mubr.f32.mxu0 %v1731_v0  ;;  %1161 = vmatprep.mubr.f32.mxu1 %v1731_v0 }
  0x39   : > { %1664 = vmatmul.mubr.msk.f32.vlgmr.msra.gmra.mxu0 %vm156_vm0, %v1768_v1  ;;  %1672 = vmatmul.mubr.msk.f32.vlgmr.msra.gmra.mxu1 %vm156_vm0, %v1768_v1 }
  0x3a   : > { %1213 = vmatpush1.msra.mxu0 %v1678_v29  ;;  %1298 = vmatpush1.msra.mxu1 %v1686_v30 }
  0x3b   : > { %1082 = vmatprep.mubr.f32.mxu0 %v1731_v0  ;;  %1167 = vmatprep.mubr.f32.mxu1 %v1731_v0 }
  0x3c   : > { %1382 = vmatprep.subr.mxu0 %v1695_v31  ;;  %1467 = vmatprep.subr.mxu1 %v1703_v32 }
  0x3d   : > { %1665 = vmatmul.mubr.msk.f32.gmra.mxu0 %vm156_vm0, %v1785_v10  ;;  %1673 = vmatmul.mubr.msk.f32.gmra.mxu1 %vm156_vm0, %v1785_v10 }
  0x3e   : > { %1246 = vmatprep.mubr.f32.mxu0 %v1731_v0  ;;  %1331 = vmatprep.mubr.f32.mxu1 %v1731_v0 }
  0x41   : > { %1680 = vmatmul.mubr.msk.f32.vlgmr.msra.gmra.mxu0 %vm156_vm0, %v1768_v1  ;;  %1688 = vmatmul.mubr.msk.f32.vlgmr.msra.gmra.mxu1 %vm156_vm0, %v1768_v1 }
  0x42   : > { %1383 = vmatpush1.msra.mxu0 %v1694_v33  ;;  %1468 = vmatpush1.msra.mxu1 %v1702_v34 }
  0x43   : > { %1252 = vmatprep.mubr.f32.mxu0 %v1731_v0  ;;  %1337 = vmatprep.mubr.f32.mxu1 %v1731_v0 }
  0x45   : > { %1681 = vmatmul.mubr.msk.f32.gmra.mxu0 %vm156_vm0, %v1785_v10  ;;  %1689 = vmatmul.mubr.msk.f32.gmra.mxu1 %vm156_vm0, %v1785_v10 }
  0x46   : > { %1416 = vmatprep.mubr.f32.mxu0 %v1731_v0  ;;  %1501 = vmatprep.mubr.f32.mxu1 %v1731_v0 }
  0x49   : > { %1696 = vmatmul.mubr.msk.f32.vlgmr.msra.gmra.mxu0 %vm156_vm0, %v1768_v1  ;;  %1704 = vmatmul.mubr.msk.f32.vlgmr.msra.gmra.mxu1 %vm156_vm0, %v1768_v1 }
  0x4a   : > { %1422 = vmatprep.mubr.f32.mxu0 %v1731_v0  ;;  %1507 = vmatprep.mubr.f32.mxu1 %v1731_v0 }
  0x4d   : > { %1697 = vmatmul.mubr.msk.f32.gmra.mxu0 %vm156_vm0, %v1785_v10  ;;  %1705 = vmatmul.mubr.msk.f32.gmra.mxu1 %vm156_vm0, %v1785_v10 }
  0xd1   : > { %v229_v35 = vpop.f32.mrf.mxu0  ;;  %v313_v36 = vpop.f32.mrf.mxu1 }
  0xd2   : > { %240 = vst [vmem:[%s1905_s23] sm:$0xff] %v229_v35  ;;  %1594 = vst [vmem:[%s1905_s23 + $0x20] sm:$0xff] %v313_v36 }
  0xd3   : > { %v231_v37 = vpop.f32.mrf.mxu0  ;;  %v315_v38 = vpop.f32.mrf.mxu1 }
  0xd4   : > { %241 = vst [vmem:[%s1905_s23 + $0x8] sm:$0xff] %v231_v37  ;;  %1595 = vst [vmem:[%s1905_s23 + $0x28] sm:$0xff] %v315_v38 }
  0xd5   : > { %v235_v39 = vpop.f32.mrf.mxu0  ;;  %v319_v40 = vpop.f32.mrf.mxu1 }
  0xd6   : > { %242 = vst [vmem:[%s1905_s23 + $0x10] sm:$0xff] %v235_v39  ;;  %1596 = vst [vmem:[%s1905_s23 + $0x30] sm:$0xff] %v319_v40 }
  0xd7   : > { %v237_v41 = vpop.f32.mrf.mxu0  ;;  %v321_v42 = vpop.f32.mrf.mxu1 }
  0xd8   : > { %243 = vst [vmem:[%s1905_s23 + $0x18] sm:$0xff] %v237_v41  ;;  %1597 = vst [vmem:[%s1905_s23 + $0x38] sm:$0xff] %v321_v42 }
  0xd9   : > { %v398_v43 = vpop.f32.mrf.mxu0  ;;  %v483_v44 = vpop.f32.mrf.mxu1 }
  0xda   : > { %1602 = vst [vmem:[%s1905_s23 + $0x40] sm:$0xff] %v398_v43  ;;  %1610 = vst [vmem:[%s1905_s23 + $0x60] sm:$0xff] %v483_v44 }
  0xdb   : > { %v400_v45 = vpop.f32.mrf.mxu0  ;;  %v485_v46 = vpop.f32.mrf.mxu1 }
  0xdc   : > { %1603 = vst [vmem:[%s1905_s23 + $0x48] sm:$0xff] %v400_v45  ;;  %1611 = vst [vmem:[%s1905_s23 + $0x68] sm:$0xff] %v485_v46 }
  0xdd   : > { %v404_v47 = vpop.f32.mrf.mxu0  ;;  %v489_v48 = vpop.f32.mrf.mxu1 }
  0xde   : > { %1604 = vst [vmem:[%s1905_s23 + $0x50] sm:$0xff] %v404_v47  ;;  %1612 = vst [vmem:[%s1905_s23 + $0x70] sm:$0xff] %v489_v48 }
  0xdf   : > { %v406_v49 = vpop.f32.mrf.mxu0  ;;  %v491_v50 = vpop.f32.mrf.mxu1 }
  0xe0   : > { %1605 = vst [vmem:[%s1905_s23 + $0x58] sm:$0xff] %v406_v49  ;;  %1613 = vst [vmem:[%s1905_s23 + $0x78] sm:$0xff] %v491_v50 }
  0xe1   : > { %v568_v51 = vpop.f32.mrf.mxu0  ;;  %v653_v52 = vpop.f32.mrf.mxu1 }
  0xe2   : > { %1618 = vst [vmem:[%s1905_s23 + $0x80] sm:$0xff] %v568_v51  ;;  %1626 = vst [vmem:[%s1905_s23 + $0xa0] sm:$0xff] %v653_v52 }
  0xe3   : > { %v570_v53 = vpop.f32.mrf.mxu0  ;;  %v655_v54 = vpop.f32.mrf.mxu1 }
  0xe4   : > { %1619 = vst [vmem:[%s1905_s23 + $0x88] sm:$0xff] %v570_v53  ;;  %1627 = vst [vmem:[%s1905_s23 + $0xa8] sm:$0xff] %v655_v54 }
  0xe5   : > { %v574_v55 = vpop.f32.mrf.mxu0  ;;  %v659_v56 = vpop.f32.mrf.mxu1 }
  0xe6   : > { %1620 = vst [vmem:[%s1905_s23 + $0x90] sm:$0xff] %v574_v55  ;;  %1628 = vst [vmem:[%s1905_s23 + $0xb0] sm:$0xff] %v659_v56 }
  0xe7   : > { %v576_v57 = vpop.f32.mrf.mxu0  ;;  %v661_v58 = vpop.f32.mrf.mxu1 }
  0xe8   : > { %1621 = vst [vmem:[%s1905_s23 + $0x98] sm:$0xff] %v576_v57  ;;  %1629 = vst [vmem:[%s1905_s23 + $0xb8] sm:$0xff] %v661_v58 }
  0xe9   : > { %v738_v59 = vpop.f32.mrf.mxu0  ;;  %v823_v60 = vpop.f32.mrf.mxu1 }
  0xea   : > { %1634 = vst [vmem:[%s1905_s23 + $0xc0] sm:$0xff] %v738_v59  ;;  %1642 = vst [vmem:[%s1905_s23 + $0xe0] sm:$0xff] %v823_v60 }
  0xeb   : > { %v740_v61 = vpop.f32.mrf.mxu0  ;;  %v825_v62 = vpop.f32.mrf.mxu1 }
  0xec   : > { %1635 = vst [vmem:[%s1905_s23 + $0xc8] sm:$0xff] %v740_v61  ;;  %1643 = vst [vmem:[%s1905_s23 + $0xe8] sm:$0xff] %v825_v62 }
  0xed   : > { %v744_v63 = vpop.f32.mrf.mxu0  ;;  %v829_v0 = vpop.f32.mrf.mxu1 }
  0xee   : > { %1636 = vst [vmem:[%s1905_s23 + $0xd0] sm:$0xff] %v744_v63  ;;  %1644 = vst [vmem:[%s1905_s23 + $0xf0] sm:$0xff] %v829_v0 }
  0xef   : > { %v746_v1 = vpop.f32.mrf.mxu0  ;;  %v831_v2 = vpop.f32.mrf.mxu1 }
  0xf0   : > { %1637 = vst [vmem:[%s1905_s23 + $0xd8] sm:$0xff] %v746_v1  ;;  %1645 = vst [vmem:[%s1905_s23 + $0xf8] sm:$0xff] %v831_v2 }
  0xf1   : > { %v908_v3 = vpop.f32.mrf.mxu0  ;;  %v993_v4 = vpop.f32.mrf.mxu1 }
  0xf2   : > { %1650 = vst [vmem:[%s1905_s23 + $0x100] sm:$0xff] %v908_v3  ;;  %1658 = vst [vmem:[%s1905_s23 + $0x120] sm:$0xff] %v993_v4 }
  0xf3   : > { %v910_v5 = vpop.f32.mrf.mxu0  ;;  %v995_v6 = vpop.f32.mrf.mxu1 }
  0xf4   : > { %1651 = vst [vmem:[%s1905_s23 + $0x108] sm:$0xff] %v910_v5  ;;  %1659 = vst [vmem:[%s1905_s23 + $0x128] sm:$0xff] %v995_v6 }
  0xf5   : > { %v914_v7 = vpop.f32.mrf.mxu0  ;;  %v999_v8 = vpop.f32.mrf.mxu1 }
  0xf6   : > { %1652 = vst [vmem:[%s1905_s23 + $0x110] sm:$0xff] %v914_v7  ;;  %1660 = vst [vmem:[%s1905_s23 + $0x130] sm:$0xff] %v999_v8 }
  0xf7   : > { %v916_v9 = vpop.f32.mrf.mxu0  ;;  %v1001_v10 = vpop.f32.mrf.mxu1 }
  0xf8   : > { %1653 = vst [vmem:[%s1905_s23 + $0x118] sm:$0xff] %v916_v9  ;;  %1661 = vst [vmem:[%s1905_s23 + $0x138] sm:$0xff] %v1001_v10 }
  0xf9   : > { %v1078_v11 = vpop.f32.mrf.mxu0  ;;  %v1163_v12 = vpop.f32.mrf.mxu1 }
  0xfa   : > { %1666 = vst [vmem:[%s1905_s23 + $0x140] sm:$0xff] %v1078_v11  ;;  %1674 = vst [vmem:[%s1905_s23 + $0x160] sm:$0xff] %v1163_v12 }
  0xfb   : > { %v1080_v13 = vpop.f32.mrf.mxu0  ;;  %v1165_v14 = vpop.f32.mrf.mxu1 }
  0xfc   : > { %1667 = vst [vmem:[%s1905_s23 + $0x148] sm:$0xff] %v1080_v13  ;;  %1675 = vst [vmem:[%s1905_s23 + $0x168] sm:$0xff] %v1165_v14 }
  0xfd   : > { %v1084_v15 = vpop.f32.mrf.mxu0  ;;  %v1169_v16 = vpop.f32.mrf.mxu1 }
  0xfe   : > { %1668 = vst [vmem:[%s1905_s23 + $0x150] sm:$0xff] %v1084_v15  ;;  %1676 = vst [vmem:[%s1905_s23 + $0x170] sm:$0xff] %v1169_v16 }
  0xff   : > { %v1086_v17 = vpop.f32.mrf.mxu0  ;;  %v1171_v18 = vpop.f32.mrf.mxu1 }
 0x100   : > { %1669 = vst [vmem:[%s1905_s23 + $0x158] sm:$0xff] %v1086_v17  ;;  %1677 = vst [vmem:[%s1905_s23 + $0x178] sm:$0xff] %v1171_v18 }
 0x101   : > { %v1248_v19 = vpop.f32.mrf.mxu0  ;;  %v1333_v20 = vpop.f32.mrf.mxu1 }
 0x102   : > { %1682 = vst [vmem:[%s1905_s23 + $0x180] sm:$0xff] %v1248_v19  ;;  %1690 = vst [vmem:[%s1905_s23 + $0x1a0] sm:$0xff] %v1333_v20 }
 0x103   : > { %v1250_v21 = vpop.f32.mrf.mxu0  ;;  %v1335_v22 = vpop.f32.mrf.mxu1 }
 0x104   : > { %1683 = vst [vmem:[%s1905_s23 + $0x188] sm:$0xff] %v1250_v21  ;;  %1691 = vst [vmem:[%s1905_s23 + $0x1a8] sm:$0xff] %v1335_v22 }
 0x105   : > { %v1254_v23 = vpop.f32.mrf.mxu0  ;;  %v1339_v24 = vpop.f32.mrf.mxu1 }
 0x106   : > { %1684 = vst [vmem:[%s1905_s23 + $0x190] sm:$0xff] %v1254_v23  ;;  %1692 = vst [vmem:[%s1905_s23 + $0x1b0] sm:$0xff] %v1339_v24 }
 0x107   : > { %v1256_v25 = vpop.f32.mrf.mxu0  ;;  %v1341_v26 = vpop.f32.mrf.mxu1 }
 0x108   : > { %1685 = vst [vmem:[%s1905_s23 + $0x198] sm:$0xff] %v1256_v25  ;;  %1693 = vst [vmem:[%s1905_s23 + $0x1b8] sm:$0xff] %v1341_v26 }
 0x109   : > { %v1418_v27 = vpop.f32.mrf.mxu0  ;;  %v1503_v28 = vpop.f32.mrf.mxu1 }
 0x10a   : > { %1698 = vst [vmem:[%s1905_s23 + $0x1c0] sm:$0xff] %v1418_v27  ;;  %1706 = vst [vmem:[%s1905_s23 + $0x1e0] sm:$0xff] %v1503_v28 }
 0x10b   : > { %v1420_v29 = vpop.f32.mrf.mxu0  ;;  %v1505_v30 = vpop.f32.mrf.mxu1 }
 0x10c   : > { %1699 = vst [vmem:[%s1905_s23 + $0x1c8] sm:$0xff] %v1420_v29  ;;  %1707 = vst [vmem:[%s1905_s23 + $0x1e8] sm:$0xff] %v1505_v30 }
 0x10d   : > { %v1424_v31 = vpop.f32.mrf.mxu0  ;;  %v1509_v32 = vpop.f32.mrf.mxu1 }
 0x10e   : > { %1700 = vst [vmem:[%s1905_s23 + $0x1d0] sm:$0xff] %v1424_v31  ;;  %1708 = vst [vmem:[%s1905_s23 + $0x1f0] sm:$0xff] %v1509_v32 }
 0x10f   : > { %v1426_v33 = vpop.f32.mrf.mxu0  ;;  %v1511_v34 = vpop.f32.mrf.mxu1 }
 0x110   : > { %1701 = vst [vmem:[%s1905_s23 + $0x1d8] sm:$0xff] %v1426_v33  ;;  %1709 = vst [vmem:[%s1905_s23 + $0x1f8] sm:$0xff] %v1511_v34 }
 0x111 PF: > { %s12_s9 = sadd.s32 1, %s1729_s9  }
 0x112   : > { %p9_p4 = scmp.ge.s32.totalorder %s12_s9, 4  }
 0x114   :  { %11 = sbr.rel (!%p9_p4) target bundleno = 1 (0x1), region = 88 }

// kernel: decoder_forward.7
= control target key start
LH: loop header
LB: loop body
LE: loop exit
PB: predicated region body
PF: predicated region fallthrough
CT: control target
= control target key end

     0   :  { %s4732_s0 = inlined_call_operand.vmem [shape: f32[512,256], index: 0, kind: input, shape index: {}]   ;;  %s4733_s1 = inlined_call_operand.vmem [shape: f32[512,256], index: 1, kind: input, shape index: {}]   ;;  %s4734_s2 = inlined_call_operand.vmem [shape: f32[256,48], index: 2, kind: input, shape index: {}]   ;;  %s4735_s3 = inlined_call_operand.vmem [shape: f32[1,48], index: 3, kind: input, shape index: {}]   ;;  %s4736_s4 = inlined_call_operand.vmem [shape: f32[256,256], index: 4, kind: input, shape index: {}]   ;;  %s4737_s5 = inlined_call_operand.vmem [shape: f32[48,256], index: 5, kind: input, shape index: {}]   ;;  %s4738_s6 = inlined_call_operand.vmem [shape: f32[1,256], index: 6, kind: input, shape index: {}]   ;;  %s4739_s7 = inlined_call_operand.vmem [shape: f32[256,256], index: 7, kind: input, shape index: {}]   ;;  %s4740_s8 = inlined_call_operand.vmem [shape: f32[1,256], index: 8, kind: input, shape index: {}]   ;;  %s4741_s9 = inlined_call_operand.vmem [shape: f32[256,128], index: 9, kind: input, shape index: {}]   ;;  %s4742_s10 = inlined_call_operand.vmem [shape: f32[1,128], index: 10, kind: input, shape index: {}]   ;;  %s4743_s11 = inlined_call_operand.hbm [shape: f32[512,256], index: 11, kind: output, shape index: {0}]   ;;  %s4744_s12 = inlined_call_operand.hbm [shape: f32[512,128], index: 12, kind: output, shape index: {1}]  }
   0x1   :  { %4753 = sst [smem:[#allocation30_spill]] %s4733_s1 }
   0x2   :  { %18 = vsyncpa [#allocation3], 0 }
   0x3   :  { %20 = vsyncpa [#allocation3 + $0x1], 0 }
   0x4   :  { %21 = vsyncpa [#allocation5], 0 }
   0x5   :  { %23 = vsyncpa [#allocation5 + $0x1], 0  ;;  %s3102_s21 = smov 0   ;;  %s3104_s22 = smov 0  }
   0x6   :  { %s3106_s23 = smov 0   ;;  %s3108_s24 = smov 0  }
   0x7 LB: > { %4754 = sst [smem:[#allocation8_spill]] %s3024_s23  ;;  %s3123_s25 = sadd.s32 4294967295, %s3028_s24   ;;  %s3028_s24 = sphi %s3108_s24, %s4809_s24   ;;  %s3024_s23 = sphi %s3106_s23, %s4806_s23   ;;  %s3020_s22 = sphi %s3104_s22, %s4808_s22   ;;  %s3016_s21 = sphi %s3102_s21, %s4807_s21  }
   0x8   : > { %s2765_s26 = sadd.s32 4294967294, %s3028_s24   ;;  %s3127_s27 = sadd.s32 1, %s3028_s24  }
   0x9   : > { %s277_s28 = sadd.s32 1, %s3024_s23  ;;  %s274_s29 = ssub.s32 %s3028_s24, %s3127_s27 }
   0xa   : > { %p287_p0 = scmp.ne.s32.totalorder %s3024_s23, %s3020_s22  ;;  %p275_p1 = scmp.eq.s32.totalorder %s274_s29, 0 }
   0xb   : > { %p288_p2 = scmp.eq.s32.totalorder %s3123_s25, 1  ;;  %p293_p3 = scmp.ne.s32.totalorder %s3020_s22, %s3016_s21 }
   0xc   : > { %p294_p4 = scmp.eq.s32.totalorder %s2765_s26, 1  ;;  %p2768_p7 = scmp.ge.s32.totalorder %s3028_s24, 1 }
   0xd   : > { %s3138_s30 = scalar_select %p275_p1, %s3024_s23, %s277_s28  }
   0xe   : > { %p3140_p5 = por %p288_p2, %p287_p0  ;;  %p3144_p6 = por %p294_p4, %p293_p3 }
   0xf   : > { %4755 = sst [smem:[#allocation9_spill]] %s3138_s30  ;;  %p385_p8 = scmp.lt.s32.totalorder %s3028_s24, 3 }
  0x11   : > { %p386_p9 = pnand %p2768_p7, %p385_p8 }
  0x13   : > { %389 = sbr.rel (%p386_p9) target bundleno = 1155 (0x483), region = 64 }
  0x18   : > { %v534_v0 = vld [vmem:[%s4734_s2 + $0x78] sm:$0xff]  ;;  %s2771_s17 = sshll.u32 %s3123_s25, 5  ;;  %v4747_v1 = vmov 0.0   ;;  %v533_v2 = vld [vmem:[%s4734_s2 + $0x70] sm:$0xff]  ;;  %v532_v3 = vld [vmem:[%s4734_s2 + $0x68] sm:$0xff]  ;;  %s4758_s1 = sld [smem:[#allocation30_spill]] }
  0x19   : > { %558 = vmatprep.subr.mxu0 %v4747_v1  ;;  %p440_p10 = scmp.lt.s32.totalorder %s2771_s17, 63  ;;  %1148 = vmatprep.mubr.f32.mxu1 %v4747_v1  ;;  %v531_v4 = vld [vmem:[%s4734_s2 + $0x60] sm:$0xff]  ;;  %v530_v5 = vld [vmem:[%s4734_s2 + $0x58] sm:$0xff]  ;;  %v529_v6 = vld [vmem:[%s4734_s2 + $0x50] sm:$0xff]  ;;  %vm987_vm0 = vcmask 392192   ;;  %s2823_s19 = sshll.u32 %s3123_s25, 13 }
  0x1a   : > { %559 = vmatpush1.msra.mxu0 %v534_v0  ;;  %v528_v8 = vld [vmem:[%s4734_s2 + $0x48] sm:$0xff]  ;;  %v527_v9 = vld [vmem:[%s4734_s2 + $0x40] sm:$0xff]  ;;  %v526_v10 = vld [vmem:[%s4734_s2 + $0x38] sm:$0xff] }
  0x1b   : > { %560 = vmatprep.subr.mxu0 %v4747_v1  ;;  %s4811_s17 = smov (!%p440_p10, %s2771_s17), 63  ;;  %v525_v11 = vld [vmem:[%s4734_s2 + $0x30] sm:$0xff]  ;;  %v524_v12 = vld [vmem:[%s4734_s2 + $0x28] sm:$0xff]  ;;  %v523_v13 = vld [vmem:[%s4734_s2 + $0x20] sm:$0xff] }
  0x1c   : > { %561 = vmatpush1.msra.mxu0 %v533_v2  ;;  %s4745_s15 = sshll.u32 %s4811_s17, 4  ;;  %v522_v14 = vld [vmem:[%s4734_s2 + $0x18] sm:$0xff]  ;;  %v521_v15 = vld [vmem:[%s4734_s2 + $0x10] sm:$0xff]  ;;  %v520_v16 = vld [vmem:[%s4734_s2 + $0x8] sm:$0xff]  ;;  %s4759_s28 = sshll.u32 %s4811_s17, 4 }
  0x1d   : > { %562 = vmatprep.subr.mxu0 %v4747_v1  ;;  %v519_v17 = vld [vmem:[%s4734_s2] sm:$0xff]  ;;  %v550_v18 = vld [vmem:[%s4734_s2 + $0xf8] sm:$0xff]  ;;  %v549_v19 = vld [vmem:[%s4734_s2 + $0xf0] sm:$0xff]  ;;  %s3754_s16 = scalar_lea.vmem %s4732_s0, %s4759_s28 }
  0x1e   : > { %563 = vmatpush1.msra.mxu0 %v532_v3  ;;  %s3179_s26 = scalar_lea.vmem %s4758_s1, %s4745_s15  ;;  %v548_v20 = vld [vmem:[%s4734_s2 + $0xe8] sm:$0xff]  ;;  %v547_v21 = vld [vmem:[%s4734_s2 + $0xe0] sm:$0xff]  ;;  %v546_v22 = vld [vmem:[%s4734_s2 + $0xd8] sm:$0xff]  ;;  %s4440_s15 = sand.u32 1, %s3020_s22  }
  0x1f   : > { %564 = vmatprep.subr.mxu0 %v4747_v1  ;;  %v456_v7 = vld [vmem:[%s3179_s26 + $0x8] sm:$0xff]  ;;  %v545_v23 = vld [vmem:[%s4734_s2 + $0xd0] sm:$0xff]  ;;  %v543_v25 = vld [vmem:[%s4734_s2 + $0xc0] sm:$0xff]  ;;  %s2769_s17 = sshll.u32 %s4440_s15, 9  ;;  %s4588_s1 = scalar_lea.hbm %s4743_s11, %s2823_s19 }
  0x20   : > { %565 = vmatpush1.msra.mxu0 %v531_v4  ;;  %622 = vmatprep.mubr.f32.mxu0 %v456_v7  ;;  %v544_v24 = vld [vmem:[%s4734_s2 + $0xc8] sm:$0xff]  ;;  %v542_v26 = vld [vmem:[%s4734_s2 + $0xb8] sm:$0xff]  ;;  %v541_v27 = vld [vmem:[%s4734_s2 + $0xb0] sm:$0xff] }
  0x21   : > { %566 = vmatprep.subr.mxu0 %v4747_v1  ;;  %v540_v28 = vld [vmem:[%s4734_s2 + $0xa8] sm:$0xff]  ;;  %v539_v29 = vld [vmem:[%s4734_s2 + $0xa0] sm:$0xff]  ;;  %v538_v30 = vld [vmem:[%s4734_s2 + $0x98] sm:$0xff] }
  0x22   : > { %567 = vmatpush1.msra.mxu0 %v530_v5  ;;  %v537_v31 = vld [vmem:[%s4734_s2 + $0x90] sm:$0xff]  ;;  %v536_v32 = vld [vmem:[%s4734_s2 + $0x88] sm:$0xff]  ;;  %v535_v33 = vld [vmem:[%s4734_s2 + $0x80] sm:$0xff] }
  0x23   : > { %568 = vmatprep.subr.mxu0 %v4747_v1  ;;  %v986_v34 = vld [vmem:[%s4737_s5 + $0x58] sm:$0xff]  ;;  %v985_v35 = vld [vmem:[%s4737_s5 + $0x50] sm:$0xff]  ;;  %v984_v36 = vld [vmem:[%s4737_s5 + $0x48] sm:$0xff] }
  0x24   : > { %569 = vmatpush1.msra.mxu0 %v529_v6  ;;  %v455_v37 = vld [vmem:[%s3179_s26] sm:$0xff]  ;;  %1104 = vmatprep.subr.mxu1 %v986_v34  ;;  %v458_v39 = vld [vmem:[%s3179_s26 + $0x18] sm:$0xff]  ;;  %v981_v41 = vld [vmem:[%s4737_s5 + $0x30] sm:$0xff] }
  0x25   : > { %570 = vmatprep.subr.mxu0 %v4747_v1  ;;  %v983_v38 = vld [vmem:[%s4737_s5 + $0x40] sm:$0xff]  ;;  %1105 = vmatpush1.msra.mxu1 %v985_v35  ;;  %v982_v40 = vld [vmem:[%s4737_s5 + $0x38] sm:$0xff]  ;;  %v457_v42 = vld [vmem:[%s3179_s26 + $0x10] sm:$0xff] }
  0x26   : > { %571 = vmatpush1.msra.mxu0 %v528_v8  ;;  %1106 = vmatprep.subr.mxu1 %v984_v36  ;;  %v460_v43 = vld [vmem:[%s3179_s26 + $0x28] sm:$0xff]  ;;  %v459_v44 = vld [vmem:[%s3179_s26 + $0x20] sm:$0xff]  ;;  %v462_v45 = vld [vmem:[%s3179_s26 + $0x38] sm:$0xff] }
  0x27   : > { %572 = vmatprep.subr.mxu0 %v4747_v1  ;;  %1107 = vmatpush1.msra.mxu1 %v983_v38  ;;  %v461_v46 = vld [vmem:[%s3179_s26 + $0x30] sm:$0xff]  ;;  %v464_v47 = vld [vmem:[%s3179_s26 + $0x48] sm:$0xff]  ;;  %v463_v48 = vld [vmem:[%s3179_s26 + $0x40] sm:$0xff] }
  0x28   : > { %573 = vmatpush1.msra.mxu0 %v527_v9  ;;  %1108 = vmatprep.subr.mxu1 %v982_v40  ;;  %v466_v49 = vld [vmem:[%s3179_s26 + $0x58] sm:$0xff]  ;;  %v465_v50 = vld [vmem:[%s3179_s26 + $0x50] sm:$0xff]  ;;  %v468_v51 = vld [vmem:[%s3179_s26 + $0x68] sm:$0xff] }
  0x29   : > { %574 = vmatprep.subr.mxu0 %v4747_v1  ;;  %1109 = vmatpush1.msra.mxu1 %v981_v41  ;;  %v467_v52 = vld [vmem:[%s3179_s26 + $0x60] sm:$0xff]  ;;  %v470_v53 = vld [vmem:[%s3179_s26 + $0x78] sm:$0xff]  ;;  %v469_v54 = vld [vmem:[%s3179_s26 + $0x70] sm:$0xff] }
  0x2a   : > { %575 = vmatpush1.msra.mxu0 %v526_v10  ;;  %v472_v55 = vld [vmem:[%s3179_s26 + $0x88] sm:$0xff]  ;;  %v471_v56 = vld [vmem:[%s3179_s26 + $0x80] sm:$0xff]  ;;  %v474_v57 = vld [vmem:[%s3179_s26 + $0x98] sm:$0xff] }
  0x2b   : > { %576 = vmatprep.subr.mxu0 %v4747_v1  ;;  %v473_v58 = vld [vmem:[%s3179_s26 + $0x90] sm:$0xff]  ;;  %v476_v59 = vld [vmem:[%s3179_s26 + $0xa8] sm:$0xff]  ;;  %v475_v60 = vld [vmem:[%s3179_s26 + $0xa0] sm:$0xff] }
  0x2c   : > { %577 = vmatpush1.msra.mxu0 %v525_v11  ;;  %v478_v61 = vld [vmem:[%s3179_s26 + $0xb8] sm:$0xff]  ;;  %v477_v62 = vld [vmem:[%s3179_s26 + $0xb0] sm:$0xff]  ;;  %v480_v63 = vld [vmem:[%s3179_s26 + $0xc8] sm:$0xff] }
  0x2d   : > { %578 = vmatprep.subr.mxu0 %v4747_v1  ;;  %v479_v0 = vld [vmem:[%s3179_s26 + $0xc0] sm:$0xff]  ;;  %v482_v2 = vld [vmem:[%s3179_s26 + $0xd8] sm:$0xff]  ;;  %v481_v3 = vld [vmem:[%s3179_s26 + $0xd0] sm:$0xff] }
  0x2e   : > { %579 = vmatpush1.msra.mxu0 %v524_v12  ;;  %v484_v4 = vld [vmem:[%s3179_s26 + $0xe8] sm:$0xff]  ;;  %v483_v5 = vld [vmem:[%s3179_s26 + $0xe0] sm:$0xff]  ;;  %v486_v6 = vld [vmem:[%s3179_s26 + $0xf8] sm:$0xff] }
  0x2f   : > { %580 = vmatprep.subr.mxu0 %v4747_v1  ;;  %v485_v7 = vld [vmem:[%s3179_s26 + $0xf0] sm:$0xff]  ;;  %v488_v8 = vld [vmem:[%s3179_s26 + $0x108] sm:$0xff]  ;;  %v487_v9 = vld [vmem:[%s3179_s26 + $0x100] sm:$0xff] }
  0x30   : > { %581 = vmatpush1.msra.mxu0 %v523_v13  ;;  %v490_v10 = vld [vmem:[%s3179_s26 + $0x118] sm:$0xff]  ;;  %v980_v11 = vld [vmem:[%s4737_s5 + $0x28] sm:$0xff]  ;;  %v489_v12 = vld [vmem:[%s3179_s26 + $0x110] sm:$0xff] }
  0x31   : > { %582 = vmatprep.subr.mxu0 %v4747_v1  ;;  %1110 = vmatprep.subr.mxu1 %v980_v11  ;;  %v979_v13 = vld [vmem:[%s4737_s5 + $0x20] sm:$0xff]  ;;  %v505_v34 = vld [vmem:[%s3179_s26 + $0x190] sm:$0xff]  ;;  %v508_v35 = vld [vmem:[%s3179_s26 + $0x1a8] sm:$0xff] }
  0x32   : > { %583 = vmatpush1.msra.mxu0 %v522_v14  ;;  %v492_v14 = vld [vmem:[%s3179_s26 + $0x128] sm:$0xff]  ;;  %1111 = vmatpush1.msra.mxu1 %v979_v13  ;;  %v507_v36 = vld [vmem:[%s3179_s26 + $0x1a0] sm:$0xff]  ;;  %v509_v38 = vld [vmem:[%s3179_s26 + $0x1b0] sm:$0xff] }
  0x33   : > { %584 = vmatprep.subr.mxu0 %v4747_v1  ;;  %v511_v40 = vld [vmem:[%s3179_s26 + $0x1c0] sm:$0xff]  ;;  %v514_v41 = vld [vmem:[%s3179_s26 + $0x1d8] sm:$0xff] }
  0x34   : > { %585 = vmatpush1.msra.mxu0 %v521_v15  ;;  %v978_v15 = vld [vmem:[%s4737_s5 + $0x18] sm:$0xff] }
  0x35   : > { %586 = vmatprep.subr.mxu0 %v4747_v1  ;;  %1112 = vmatprep.subr.mxu1 %v978_v15 }
  0x36   : > { %587 = vmatpush1.msra.mxu0 %v520_v16  ;;  %v977_v16 = vld [vmem:[%s4737_s5 + $0x10] sm:$0xff] }
  0x37   : > { %588 = vmatprep.subr.mxu0 %v4747_v1  ;;  %1113 = vmatpush1.msra.mxu1 %v977_v16  ;;  %v930_v16 = vld [vmem:[%s4736_s4 + $0x98] sm:$0xff] }
  0x38   : > { %589 = vmatpush1.msra.mxu0 %v519_v17  ;;  %v976_v17 = vld [vmem:[%s4737_s5 + $0x8] sm:$0xff] }
  0x39   : > { %590 = vmatprep.subr.mxu0 %v4747_v1  ;;  %1114 = vmatprep.subr.mxu1 %v976_v17 }
  0x3a   : > { %591 = vmatpush2.msra.mxu0 %v550_v18  ;;  %v491_v18 = vld [vmem:[%s3179_s26 + $0x120] sm:$0xff] }
  0x3b   : > { %592 = vmatprep.subr.mxu0 %v4747_v1 }
  0x3c   : > { %593 = vmatpush2.msra.mxu0 %v549_v19  ;;  %v975_v19 = vld [vmem:[%s4737_s5] sm:$0xff] }
  0x3d   : > { %594 = vmatprep.subr.mxu0 %v4747_v1  ;;  %1115 = vmatpush1.msra.mxu1 %v975_v19  ;;  %v929_v19 = vld [vmem:[%s4736_s4 + $0x90] sm:$0xff] }
  0x3e   : > { %595 = vmatpush2.msra.mxu0 %v548_v20  ;;  %v494_v20 = vld [vmem:[%s3179_s26 + $0x138] sm:$0xff] }
  0x3f   : > { %596 = vmatprep.subr.mxu0 %v4747_v1 }
  0x40   : > { %597 = vmatpush2.msra.mxu0 %v547_v21  ;;  %v493_v21 = vld [vmem:[%s3179_s26 + $0x130] sm:$0xff] }
  0x41   : > { %598 = vmatprep.subr.mxu0 %v4747_v1 }
  0x42   : > { %599 = vmatpush2.msra.mxu0 %v546_v22  ;;  %v942_v22 = vld [vmem:[%s4736_s4 + $0xf8] sm:$0xff] }
  0x43   : > { %600 = vmatprep.subr.mxu0 %v4747_v1  ;;  %1341 = vmatprep.subr.mxu1 %v942_v22 }
  0x44   : > { %601 = vmatpush2.msra.mxu0 %v545_v23  ;;  %v496_v23 = vld [vmem:[%s3179_s26 + $0x148] sm:$0xff] }
  0x45   : > { %602 = vmatprep.subr.mxu0 %v4747_v1 }
  0x46   : > { %603 = vmatpush2.msra.mxu0 %v544_v24  ;;  %v495_v24 = vld [vmem:[%s3179_s26 + $0x140] sm:$0xff] }
  0x47   : > { %604 = vmatprep.subr.mxu0 %v4747_v1 }
  0x48   : > { %605 = vmatpush2.msra.mxu0 %v543_v25  ;;  %v498_v25 = vld [vmem:[%s3179_s26 + $0x158] sm:$0xff] }
  0x49   : > { %606 = vmatprep.subr.mxu0 %v4747_v1 }
  0x4a   : > { %607 = vmatpush2.msra.mxu0 %v542_v26  ;;  %v497_v26 = vld [vmem:[%s3179_s26 + $0x150] sm:$0xff] }
  0x4b   : > { %608 = vmatprep.subr.mxu0 %v4747_v1 }
  0x4c   : > { %609 = vmatpush2.msra.mxu0 %v541_v27  ;;  %v500_v27 = vld [vmem:[%s3179_s26 + $0x168] sm:$0xff] }
  0x4d   : > { %610 = vmatprep.subr.mxu0 %v4747_v1 }
  0x4e   : > { %611 = vmatpush2.msra.mxu0 %v540_v28  ;;  %v499_v28 = vld [vmem:[%s3179_s26 + $0x160] sm:$0xff] }
  0x4f   : > { %612 = vmatprep.subr.mxu0 %v4747_v1 }
  0x50   : > { %613 = vmatpush2.msra.mxu0 %v539_v29  ;;  %v502_v29 = vld [vmem:[%s3179_s26 + $0x178] sm:$0xff] }
  0x51   : > { %614 = vmatprep.subr.mxu0 %v4747_v1 }
  0x52   : > { %615 = vmatpush2.msra.mxu0 %v538_v30  ;;  %v501_v30 = vld [vmem:[%s3179_s26 + $0x170] sm:$0xff] }
  0x53   : > { %616 = vmatprep.subr.mxu0 %v4747_v1 }
  0x54   : > { %617 = vmatpush2.msra.mxu0 %v537_v31  ;;  %v504_v31 = vld [vmem:[%s3179_s26 + $0x188] sm:$0xff] }
  0x55   : > { %618 = vmatprep.subr.mxu0 %v4747_v1 }
  0x56   : > { %619 = vmatpush2.msra.mxu0 %v536_v32  ;;  %v503_v32 = vld [vmem:[%s3179_s26 + $0x180] sm:$0xff] }
  0x57   : > { %620 = vmatprep.subr.mxu0 %v4747_v1 }
  0x58   : > { %621 = vmatpush2.msra.mxu0 %v535_v33  ;;  %v506_v33 = vld [vmem:[%s3179_s26 + $0x198] sm:$0xff] }
  0x59   : > { %623 = vmatmul.mubr.f32.vlgmr.msra.gmra.mxu0 %v455_v37  ;;  %v510_v37 = vld [vmem:[%s3179_s26 + $0x1b8] sm:$0xff] }
  0x5a   : > { %627 = vmatprep.mubr.f32.mxu0 %v458_v39  ;;  %v512_v39 = vld [vmem:[%s3179_s26 + $0x1c8] sm:$0xff] }
  0x5d   : > { %628 = vmatmul.mubr.f32.gmra.mxu0 %v457_v42  ;;  %v513_v42 = vld [vmem:[%s3179_s26 + $0x1d0] sm:$0xff] }
  0x5e   : > { %632 = vmatprep.mubr.f32.mxu0 %v460_v43  ;;  %v516_v43 = vld [vmem:[%s3179_s26 + $0x1e8] sm:$0xff] }
  0x61   : > { %633 = vmatmul.mubr.f32.gmra.mxu0 %v459_v44  ;;  %v515_v44 = vld [vmem:[%s3179_s26 + $0x1e0] sm:$0xff] }
  0x62   : > { %637 = vmatprep.mubr.f32.mxu0 %v462_v45  ;;  %v518_v45 = vld [vmem:[%s3179_s26 + $0x1f8] sm:$0xff] }
  0x65   : > { %638 = vmatmul.mubr.f32.gmra.mxu0 %v461_v46  ;;  %v517_v46 = vld [vmem:[%s3179_s26 + $0x1f0] sm:$0xff]  ;;  %s4450_s26 = scalar_lea.vmem [#allocation2], %s2769_s17 }
  0x66   : > { %642 = vmatprep.mubr.f32.mxu0 %v464_v47  ;;  %v3396_v47 = vld [vmem:[%s4735_s3] ss:$0 sm:$0xff]  ;;  %s2643_s20 = sshll.u32 %s4450_s26, 4  ;;  %s4590_s20 = int_to_ptr.vmem [resolvable:$true] %s2643_s20 }
  0x67   : > { %s2938_s17 = scalar_lea.vmem %s4590_s20, 8192 }
  0x68   : > { %p2939_p11 = scmp.ne.s32.totalorder %s4590_s20, %s2938_s17 }
  0x69   : > { %643 = vmatmul.mubr.f32.gmra.mxu0 %v463_v48 }
  0x6a   : > { %647 = vmatprep.mubr.f32.mxu0 %v466_v49  ;;  %p2940_p12 = pnand %p2939_p11, %p3140_p5 }
  0x6c   : > { %p2941_p13 = pneg %p2940_p12 }
  0x6d   : > { %648 = vmatmul.mubr.f32.gmra.mxu0 %v465_v50 }
  0x6e   : > { %652 = vmatprep.mubr.f32.mxu0 %v468_v51 }
  0x71   : > { %653 = vmatmul.mubr.f32.gmra.mxu0 %v467_v52 }
  0x72   : > { %657 = vmatprep.mubr.f32.mxu0 %v470_v53 }
  0x75   : > { %658 = vmatmul.mubr.f32.gmra.mxu0 %v469_v54 }
  0x76   : > { %662 = vmatprep.mubr.f32.mxu0 %v472_v55  ;;  %v941_v55 = vld [vmem:[%s4736_s4 + $0xf0] sm:$0xff] }
  0x79   : > { %663 = vmatmul.mubr.f32.gmra.mxu0 %v471_v56 }
  0x7a   : > { %667 = vmatprep.mubr.f32.mxu0 %v474_v57  ;;  %v940_v57 = vld [vmem:[%s4736_s4 + $0xe8] sm:$0xff] }
  0x7d   : > { %668 = vmatmul.mubr.f32.gmra.mxu0 %v473_v58 }
  0x7e   : > { %672 = vmatprep.mubr.f32.mxu0 %v476_v59  ;;  %v939_v59 = vld [vmem:[%s4736_s4 + $0xe0] sm:$0xff] }
  0x81   : > { %673 = vmatmul.mubr.f32.gmra.mxu0 %v475_v60 }
  0x82   : > { %677 = vmatprep.mubr.f32.mxu0 %v478_v61  ;;  %v938_v61 = vld [vmem:[%s4736_s4 + $0xd8] sm:$0xff] }
  0x85   : > { %678 = vmatmul.mubr.f32.gmra.mxu0 %v477_v62 }
  0x86   : > { %682 = vmatprep.mubr.f32.mxu0 %v480_v63 }
  0x89   : > { %683 = vmatmul.mubr.f32.gmra.mxu0 %v479_v0  ;;  %v937_v0 = vld [vmem:[%s4736_s4 + $0xd0] sm:$0xff] }
  0x8a   : > { %687 = vmatprep.mubr.f32.mxu0 %v482_v2 }
  0x8d   : > { %688 = vmatmul.mubr.f32.gmra.mxu0 %v481_v3  ;;  %v936_v3 = vld [vmem:[%s4736_s4 + $0xc8] sm:$0xff] }
  0x8e   : > { %692 = vmatprep.mubr.f32.mxu0 %v484_v4 }
  0x91   : > { %693 = vmatmul.mubr.f32.gmra.mxu0 %v483_v5  ;;  %v935_v5 = vld [vmem:[%s4736_s4 + $0xc0] sm:$0xff] }
  0x92   : > { %697 = vmatprep.mubr.f32.mxu0 %v486_v6 }
  0x95   : > { %698 = vmatmul.mubr.f32.gmra.mxu0 %v485_v7  ;;  %v934_v7 = vld [vmem:[%s4736_s4 + $0xb8] sm:$0xff] }
  0x96   : > { %702 = vmatprep.mubr.f32.mxu0 %v488_v8 }
  0x99   : > { %703 = vmatmul.mubr.f32.gmra.mxu0 %v487_v9 }
  0x9a   : > { %707 = vmatprep.mubr.f32.mxu0 %v490_v10  ;;  %v933_v10 = vld [vmem:[%s4736_s4 + $0xb0] sm:$0xff] }
  0x9d   : > { %708 = vmatmul.mubr.f32.gmra.mxu0 %v489_v12  ;;  %v932_v12 = vld [vmem:[%s4736_s4 + $0xa8] sm:$0xff] }
  0x9e   : > { %712 = vmatprep.mubr.f32.mxu0 %v492_v14  ;;  %v931_v14 = vld [vmem:[%s4736_s4 + $0xa0] sm:$0xff] }
  0xa1   : > { %713 = vmatmul.mubr.f32.gmra.mxu0 %v491_v18 }
  0xa2   : > { %717 = vmatprep.mubr.f32.mxu0 %v494_v20 }
  0xa5   : > { %718 = vmatmul.mubr.f32.gmra.mxu0 %v493_v21  ;;  %v928_v21 = vld [vmem:[%s4736_s4 + $0x88] sm:$0xff] }
  0xa6   : > { %722 = vmatprep.mubr.f32.mxu0 %v496_v23  ;;  %v927_v23 = vld [vmem:[%s4736_s4 + $0x80] sm:$0xff] }
  0xa9   : > { %723 = vmatmul.mubr.f32.gmra.mxu0 %v495_v24 }
  0xaa   : > { %727 = vmatprep.mubr.f32.mxu0 %v498_v25  ;;  %v926_v25 = vld [vmem:[%s4736_s4 + $0x78] sm:$0xff] }
  0xad   : > { %728 = vmatmul.mubr.f32.gmra.mxu0 %v497_v26 }
  0xae   : > { %732 = vmatprep.mubr.f32.mxu0 %v500_v27 }
  0xb1   : > { %733 = vmatmul.mubr.f32.gmra.mxu0 %v499_v28  ;;  %v925_v28 = vld [vmem:[%s4736_s4 + $0x70] sm:$0xff] }
  0xb2   : > { %737 = vmatprep.mubr.f32.mxu0 %v502_v29 }
  0xb5   : > { %738 = vmatmul.mubr.f32.gmra.mxu0 %v501_v30  ;;  %v924_v30 = vld [vmem:[%s4736_s4 + $0x68] sm:$0xff] }
  0xb6   : > { %742 = vmatprep.mubr.f32.mxu0 %v504_v31 }
  0xb9   : > { %743 = vmatmul.mubr.f32.gmra.mxu0 %v503_v32  ;;  %v923_v32 = vld [vmem:[%s4736_s4 + $0x60] sm:$0xff] }
  0xba   : > { %747 = vmatprep.mubr.f32.mxu0 %v506_v33 }
  0xbd   : > { %748 = vmatmul.mubr.f32.gmra.mxu0 %v505_v34  ;;  %v922_v34 = vld [vmem:[%s4736_s4 + $0x58] sm:$0xff] }
  0xbe   : > { %752 = vmatprep.mubr.f32.mxu0 %v508_v35 }
  0xc1   : > { %753 = vmatmul.mubr.f32.gmra.mxu0 %v507_v36 }
  0xc2   : > { %757 = vmatprep.mubr.f32.mxu0 %v510_v37  ;;  %v921_v37 = vld [vmem:[%s4736_s4 + $0x50] sm:$0xff] }
  0xc5   : > { %758 = vmatmul.mubr.f32.gmra.mxu0 %v509_v38 }
  0xc6   : > { %762 = vmatprep.mubr.f32.mxu0 %v512_v39  ;;  %v920_v39 = vld [vmem:[%s4736_s4 + $0x48] sm:$0xff] }
  0xc9   : > { %763 = vmatmul.mubr.f32.gmra.mxu0 %v511_v40 }
  0xca   : > { %767 = vmatprep.mubr.f32.mxu0 %v514_v41  ;;  %v919_v41 = vld [vmem:[%s4736_s4 + $0x40] sm:$0xff] }
  0xcd   : > { %768 = vmatmul.mubr.f32.gmra.mxu0 %v513_v42 }
  0xce   : > { %772 = vmatprep.mubr.f32.mxu0 %v516_v43  ;;  %v918_v43 = vld [vmem:[%s4736_s4 + $0x38] sm:$0xff] }
  0xd1   : > { %773 = vmatmul.mubr.f32.gmra.mxu0 %v515_v44 }
  0xd2   : > { %777 = vmatprep.mubr.f32.mxu0 %v518_v45 }
  0xd5   : > { %778 = vmatmul.mubr.f32.gmra.mxu0 %v517_v46  ;;  %v917_v46 = vld [vmem:[%s4736_s4 + $0x30] sm:$0xff] }
 0x119   : > { %v624_v48 = vpop.f32.mrf.mxu0 }
 0x11a   : > { %v625_v49 = vadd.f32 %v3396_v47, %v624_v48 }
 0x11b   : > { %v626_v50 = vpop.f32.mrf.mxu0 }
 0x11c   : > { %v783_v51 = vmul.f32 0.1, %v625_v49 }
 0x11d   : > { %v629_v52 = vpop.f32.mrf.mxu0 }
 0x11e   : > { %v815_v53 = vmax.f32 %v783_v51, %v625_v49  ;;  %v630_v54 = vadd.f32 %v3396_v47, %v629_v52  ;;  %v916_v49 = vld [vmem:[%s4736_s4 + $0x28] sm:$0xff]  ;;  %v915_v51 = vld [vmem:[%s4736_s4 + $0x20] sm:$0xff] }
 0x11f   : > { %v631_v56 = vpop.f32.mrf.mxu0 }
 0x120   : > { %v784_v58 = vmul.f32 0.1, %v630_v54  ;;  %2778 = vmatmul.mubr.msk.f32.vlgmr.msra.gmra.mxu1 %vm987_vm0, %v815_v53  ;;  %v914_v53 = vld [vmem:[%s4736_s4 + $0x18] sm:$0xff]  ;;  %v913_v56 = vld [vmem:[%s4736_s4 + $0x10] sm:$0xff] }
 0x121   : > { %1342 = vmatpush1.msra.mxu1 %v941_v55  ;;  %v634_v60 = vpop.f32.mrf.mxu0  ;;  %1154 = vmatprep.mubr.f32.mxu1 %v4747_v1 }
 0x122   : > { %v816_v62 = vmax.f32 %v784_v58, %v630_v54  ;;  %v635_v63 = vadd.f32 %v3396_v47, %v634_v60  ;;  %1343 = vmatprep.subr.mxu1 %v940_v57  ;;  %v912_v58 = vld [vmem:[%s4736_s4 + $0x8] sm:$0xff]  ;;  %v911_v60 = vld [vmem:[%s4736_s4] sm:$0xff] }
 0x123   : > { %v636_v2 = vpop.f32.mrf.mxu0  ;;  %1344 = vmatpush1.msra.mxu1 %v939_v59 }
 0x124   : > { %v785_v4 = vmul.f32 0.1, %v635_v63  ;;  %2779 = vmatmul.mubr.msk.f32.gmra.mxu1 %vm987_vm0, %v816_v62  ;;  %1345 = vmatprep.subr.mxu1 %v938_v61  ;;  %v974_v62 = vld [vmem:[%s4736_s4 + $0x1f8] sm:$0xff]  ;;  %v973_v2 = vld [vmem:[%s4736_s4 + $0x1f0] sm:$0xff] }
 0x125   : > { %v639_v6 = vpop.f32.mrf.mxu0  ;;  %1160 = vmatprep.mubr.f32.mxu1 %v4747_v1  ;;  %1346 = vmatpush1.msra.mxu1 %v937_v0 }
 0x126   : > { %v817_v8 = vmax.f32 %v785_v4, %v635_v63  ;;  %v640_v9 = vadd.f32 %v3396_v47, %v639_v6  ;;  %1347 = vmatprep.subr.mxu1 %v936_v3  ;;  %v972_v4 = vld [vmem:[%s4736_s4 + $0x1e8] sm:$0xff]  ;;  %v971_v6 = vld [vmem:[%s4736_s4 + $0x1e0] sm:$0xff] }
 0x127   : > { %v641_v11 = vpop.f32.mrf.mxu0  ;;  %1348 = vmatpush1.msra.mxu1 %v935_v5 }
 0x128   : > { %v786_v13 = vmul.f32 0.1, %v640_v9  ;;  %2780 = vmatmul.mubr.msk.f32.gmra.mxu1 %vm987_vm0, %v817_v8  ;;  %1349 = vmatprep.subr.mxu1 %v934_v7  ;;  %v970_v8 = vld [vmem:[%s4736_s4 + $0x1d8] sm:$0xff]  ;;  %v969_v11 = vld [vmem:[%s4736_s4 + $0x1d0] sm:$0xff] }
 0x129   : > { %v644_v15 = vpop.f32.mrf.mxu0  ;;  %1166 = vmatprep.mubr.f32.mxu1 %v4747_v1  ;;  %1350 = vmatpush1.msra.mxu1 %v933_v10 }
 0x12a   : > { %v818_v17 = vmax.f32 %v786_v13, %v640_v9  ;;  %v645_v18 = vadd.f32 %v3396_v47, %v644_v15  ;;  %1351 = vmatprep.subr.mxu1 %v932_v12  ;;  %v968_v13 = vld [vmem:[%s4736_s4 + $0x1c8] sm:$0xff]  ;;  %v967_v15 = vld [vmem:[%s4736_s4 + $0x1c0] sm:$0xff] }
 0x12b   : > { %v646_v20 = vpop.f32.mrf.mxu0  ;;  %1352 = vmatpush1.msra.mxu1 %v931_v14 }
 0x12c   : > { %v787_v22 = vmul.f32 0.1, %v645_v18  ;;  %2781 = vmatmul.mubr.msk.f32.gmra.mxu1 %vm987_vm0, %v818_v17  ;;  %1353 = vmatprep.subr.mxu1 %v930_v16  ;;  %v966_v17 = vld [vmem:[%s4736_s4 + $0x1b8] sm:$0xff]  ;;  %v965_v20 = vld [vmem:[%s4736_s4 + $0x1b0] sm:$0xff] }
 0x12d   : > { %v649_v24 = vpop.f32.mrf.mxu0  ;;  %1172 = vmatprep.mubr.f32.mxu1 %v4747_v1  ;;  %1354 = vmatpush1.msra.mxu1 %v929_v19 }
 0x12e   : > { %v819_v26 = vmax.f32 %v787_v22, %v645_v18  ;;  %v650_v27 = vadd.f32 %v3396_v47, %v649_v24  ;;  %1355 = vmatprep.subr.mxu1 %v928_v21  ;;  %v964_v22 = vld [vmem:[%s4736_s4 + $0x1a8] sm:$0xff]  ;;  %v963_v24 = vld [vmem:[%s4736_s4 + $0x1a0] sm:$0xff] }
 0x12f   : > { %v651_v29 = vpop.f32.mrf.mxu0  ;;  %1356 = vmatpush1.msra.mxu1 %v927_v23 }
 0x130   : > { %v788_v31 = vmul.f32 0.1, %v650_v27  ;;  %2782 = vmatmul.mubr.msk.f32.gmra.mxu1 %vm987_vm0, %v819_v26  ;;  %1357 = vmatprep.subr.mxu1 %v926_v25  ;;  %v962_v26 = vld [vmem:[%s4736_s4 + $0x198] sm:$0xff]  ;;  %v961_v29 = vld [vmem:[%s4736_s4 + $0x190] sm:$0xff] }
 0x131   : > { %v654_v33 = vpop.f32.mrf.mxu0  ;;  %1178 = vmatprep.mubr.f32.mxu1 %v4747_v1  ;;  %1358 = vmatpush1.msra.mxu1 %v925_v28 }
 0x132   : > { %v820_v35 = vmax.f32 %v788_v31, %v650_v27  ;;  %v655_v36 = vadd.f32 %v3396_v47, %v654_v33  ;;  %1359 = vmatprep.subr.mxu1 %v924_v30  ;;  %v960_v31 = vld [vmem:[%s4736_s4 + $0x188] sm:$0xff]  ;;  %v959_v33 = vld [vmem:[%s4736_s4 + $0x180] sm:$0xff] }
 0x133   : > { %v656_v38 = vpop.f32.mrf.mxu0  ;;  %1360 = vmatpush1.msra.mxu1 %v923_v32 }
 0x134   : > { %v789_v40 = vmul.f32 0.1, %v655_v36  ;;  %2783 = vmatmul.mubr.msk.f32.gmra.mxu1 %vm987_vm0, %v820_v35  ;;  %1361 = vmatprep.subr.mxu1 %v922_v34  ;;  %v958_v35 = vld [vmem:[%s4736_s4 + $0x178] sm:$0xff]  ;;  %v957_v38 = vld [vmem:[%s4736_s4 + $0x170] sm:$0xff] }
 0x135   : > { %v659_v42 = vpop.f32.mrf.mxu0  ;;  %1184 = vmatprep.mubr.f32.mxu1 %v4747_v1  ;;  %1362 = vmatpush1.msra.mxu1 %v921_v37 }
 0x136   : > { %v821_v44 = vmax.f32 %v789_v40, %v655_v36  ;;  %v660_v45 = vadd.f32 %v3396_v47, %v659_v42  ;;  %1363 = vmatprep.subr.mxu1 %v920_v39  ;;  %v956_v40 = vld [vmem:[%s4736_s4 + $0x168] sm:$0xff]  ;;  %v955_v42 = vld [vmem:[%s4736_s4 + $0x160] sm:$0xff] }
 0x137   : > { %v661_v48 = vpop.f32.mrf.mxu0  ;;  %1364 = vmatpush1.msra.mxu1 %v919_v41 }
 0x138   : > { %v790_v50 = vmul.f32 0.1, %v660_v45  ;;  %2784 = vmatmul.mubr.msk.f32.gmra.mxu1 %vm987_vm0, %v821_v44  ;;  %1365 = vmatprep.subr.mxu1 %v918_v43  ;;  %v954_v44 = vld [vmem:[%s4736_s4 + $0x158] sm:$0xff]  ;;  %v953_v48 = vld [vmem:[%s4736_s4 + $0x150] sm:$0xff] }
 0x139   : > { %v664_v52 = vpop.f32.mrf.mxu0  ;;  %1190 = vmatprep.mubr.f32.mxu1 %v4747_v1  ;;  %1366 = vmatpush1.msra.mxu1 %v917_v46 }
 0x13a   : > { %v822_v54 = vmax.f32 %v790_v50, %v660_v45  ;;  %v665_v55 = vadd.f32 %v3396_v47, %v664_v52  ;;  %1367 = vmatprep.subr.mxu1 %v916_v49  ;;  %v952_v50 = vld [vmem:[%s4736_s4 + $0x148] sm:$0xff]  ;;  %v951_v52 = vld [vmem:[%s4736_s4 + $0x140] sm:$0xff] }
 0x13b   : > { %v666_v57 = vpop.f32.mrf.mxu0  ;;  %1368 = vmatpush1.msra.mxu1 %v915_v51 }
 0x13c   : > { %v791_v59 = vmul.f32 0.1, %v665_v55  ;;  %2785 = vmatmul.mubr.msk.f32.gmra.mxu1 %vm987_vm0, %v822_v54  ;;  %1369 = vmatprep.subr.mxu1 %v914_v53  ;;  %v950_v54 = vld [vmem:[%s4736_s4 + $0x138] sm:$0xff]  ;;  %v949_v57 = vld [vmem:[%s4736_s4 + $0x130] sm:$0xff] }
 0x13d   : > { %v669_v61 = vpop.f32.mrf.mxu0  ;;  %1196 = vmatprep.mubr.f32.mxu1 %v4747_v1  ;;  %1370 = vmatpush1.msra.mxu1 %v913_v56 }
 0x13e   : > { %v823_v63 = vmax.f32 %v791_v59, %v665_v55  ;;  %v670_v0 = vadd.f32 %v3396_v47, %v669_v61  ;;  %1371 = vmatprep.subr.mxu1 %v912_v58  ;;  %v948_v59 = vld [vmem:[%s4736_s4 + $0x128] sm:$0xff]  ;;  %v947_v61 = vld [vmem:[%s4736_s4 + $0x120] sm:$0xff] }
 0x13f   : > { %v671_v3 = vpop.f32.mrf.mxu0  ;;  %1372 = vmatpush1.msra.mxu1 %v911_v60 }
 0x140   : > { %v792_v5 = vmul.f32 0.1, %v670_v0  ;;  %2786 = vmatmul.mubr.msk.f32.gmra.mxu1 %vm987_vm0, %v823_v63  ;;  %1373 = vmatprep.subr.mxu1 %v974_v62  ;;  %v946_v63 = vld [vmem:[%s4736_s4 + $0x118] sm:$0xff]  ;;  %v945_v3 = vld [vmem:[%s4736_s4 + $0x110] sm:$0xff] }
 0x141   : > { %v674_v7 = vpop.f32.mrf.mxu0  ;;  %1202 = vmatprep.mubr.f32.mxu1 %v4747_v1  ;;  %1374 = vmatpush2.msra.mxu1 %v973_v2 }
 0x142   : > { %v824_v9 = vmax.f32 %v792_v5, %v670_v0  ;;  %v675_v10 = vadd.f32 %v3396_v47, %v674_v7  ;;  %1375 = vmatprep.subr.mxu1 %v972_v4  ;;  %v944_v5 = vld [vmem:[%s4736_s4 + $0x108] sm:$0xff]  ;;  %v943_v7 = vld [vmem:[%s4736_s4 + $0x100] sm:$0xff] }
 0x143   : > { %v676_v12 = vpop.f32.mrf.mxu0  ;;  %1376 = vmatpush2.msra.mxu1 %v971_v6 }
 0x144   : > { %v793_v14 = vmul.f32 0.1, %v675_v10  ;;  %2787 = vmatmul.mubr.msk.f32.gmra.mxu1 %vm987_vm0, %v824_v9  ;;  %1377 = vmatprep.subr.mxu1 %v970_v8 }
 0x145   : > { %v679_v16 = vpop.f32.mrf.mxu0  ;;  %1208 = vmatprep.mubr.f32.mxu1 %v4747_v1  ;;  %1378 = vmatpush2.msra.mxu1 %v969_v11 }
 0x146   : > { %v825_v18 = vmax.f32 %v793_v14, %v675_v10  ;;  %v680_v19 = vadd.f32 %v3396_v47, %v679_v16  ;;  %1379 = vmatprep.subr.mxu1 %v968_v13 }
 0x147   : > { %v681_v21 = vpop.f32.mrf.mxu0  ;;  %1380 = vmatpush2.msra.mxu1 %v967_v15 }
 0x148   : > { %v794_v23 = vmul.f32 0.1, %v680_v19  ;;  %2788 = vmatmul.mubr.msk.f32.gmra.mxu1 %vm987_vm0, %v825_v18  ;;  %1381 = vmatprep.subr.mxu1 %v966_v17 }
 0x149   : > { %v684_v25 = vpop.f32.mrf.mxu0  ;;  %1214 = vmatprep.mubr.f32.mxu1 %v4747_v1  ;;  %1382 = vmatpush2.msra.mxu1 %v965_v20 }
 0x14a   : > { %v826_v27 = vmax.f32 %v794_v23, %v680_v19  ;;  %v685_v28 = vadd.f32 %v3396_v47, %v684_v25  ;;  %1383 = vmatprep.subr.mxu1 %v964_v22 }
 0x14b   : > { %v686_v30 = vpop.f32.mrf.mxu0  ;;  %1384 = vmatpush2.msra.mxu1 %v963_v24 }
 0x14c   : > { %v795_v32 = vmul.f32 0.1, %v685_v28  ;;  %2789 = vmatmul.mubr.msk.f32.gmra.mxu1 %vm987_vm0, %v826_v27  ;;  %1385 = vmatprep.subr.mxu1 %v962_v26  ;;  %v1833_v26 = vld [vmem:[%s4739_s7 + $0xf8] sm:$0xff] }
 0x14d   : > { %v689_v34 = vpop.f32.mrf.mxu0  ;;  %1220 = vmatprep.mubr.f32.mxu1 %v4747_v1  ;;  %1386 = vmatpush2.msra.mxu1 %v961_v29  ;;  %v1832_v29 = vld [vmem:[%s4739_s7 + $0xf0] sm:$0xff] }
 0x14e   : > { %v827_v36 = vmax.f32 %v795_v32, %v685_v28  ;;  %v690_v37 = vadd.f32 %v3396_v47, %v689_v34  ;;  %1387 = vmatprep.subr.mxu1 %v960_v31  ;;  %1878 = vmatprep.subr.mxu0 %v1833_v26 }
 0x14f   : > { %v691_v39 = vpop.f32.mrf.mxu0  ;;  %1388 = vmatpush2.msra.mxu1 %v959_v33  ;;  %1879 = vmatpush1.msra.mxu0 %v1832_v29  ;;  %v1831_v33 = vld [vmem:[%s4739_s7 + $0xe8] sm:$0xff] }
 0x150   : > { %v796_v41 = vmul.f32 0.1, %v690_v37  ;;  %2790 = vmatmul.mubr.msk.f32.gmra.mxu1 %vm987_vm0, %v827_v36  ;;  %1389 = vmatprep.subr.mxu1 %v958_v35  ;;  %v1830_v36 = vld [vmem:[%s4739_s7 + $0xe0] sm:$0xff] }
 0x151   : > { %v694_v43 = vpop.f32.mrf.mxu0  ;;  %1226 = vmatprep.mubr.f32.mxu1 %v4747_v1  ;;  %1390 = vmatpush2.msra.mxu1 %v957_v38 }
 0x152   : > { %v828_v45 = vmax.f32 %v796_v41, %v690_v37  ;;  %v695_v46 = vadd.f32 %v3396_v47, %v694_v43  ;;  %1391 = vmatprep.subr.mxu1 %v956_v40  ;;  %1880 = vmatprep.subr.mxu0 %v1831_v33  ;;  %v1829_v40 = vld [vmem:[%s4739_s7 + $0xd8] sm:$0xff]  ;;  %v1828_v43 = vld [vmem:[%s4739_s7 + $0xd0] sm:$0xff] }
 0x153   : > { %v696_v49 = vpop.f32.mrf.mxu0  ;;  %1392 = vmatpush2.msra.mxu1 %v955_v42  ;;  %1881 = vmatpush1.msra.mxu0 %v1830_v36 }
 0x154   : > { %v797_v51 = vmul.f32 0.1, %v695_v46  ;;  %2791 = vmatmul.mubr.msk.f32.gmra.mxu1 %vm987_vm0, %v828_v45  ;;  %1393 = vmatprep.subr.mxu1 %v954_v44 }
 0x155   : > { %v699_v53 = vpop.f32.mrf.mxu0  ;;  %1232 = vmatprep.mubr.f32.mxu1 %v4747_v1  ;;  %1394 = vmatpush2.msra.mxu1 %v953_v48  ;;  %v1827_v48 = vld [vmem:[%s4739_s7 + $0xc8] sm:$0xff] }
 0x156   : > { %v829_v55 = vmax.f32 %v797_v51, %v695_v46  ;;  %v700_v56 = vadd.f32 %v3396_v47, %v699_v53  ;;  %1395 = vmatprep.subr.mxu1 %v952_v50  ;;  %1882 = vmatprep.subr.mxu0 %v1829_v40  ;;  %v1826_v51 = vld [vmem:[%s4739_s7 + $0xc0] sm:$0xff] }
 0x157   : > { %v701_v58 = vpop.f32.mrf.mxu0  ;;  %1396 = vmatpush2.msra.mxu1 %v951_v52  ;;  %1883 = vmatpush1.msra.mxu0 %v1828_v43 }
 0x158   : > { %v798_v60 = vmul.f32 0.1, %v700_v56  ;;  %2792 = vmatmul.mubr.msk.f32.gmra.mxu1 %vm987_vm0, %v829_v55  ;;  %1397 = vmatprep.subr.mxu1 %v950_v54  ;;  %v1825_v55 = vld [vmem:[%s4739_s7 + $0xb8] sm:$0xff]  ;;  %v1824_v58 = vld [vmem:[%s4739_s7 + $0xb0] sm:$0xff] }
 0x159   : > { %v704_v62 = vpop.f32.mrf.mxu0  ;;  %1238 = vmatprep.mubr.f32.mxu1 %v4747_v1  ;;  %1398 = vmatpush2.msra.mxu1 %v949_v57 }
 0x15a   : > { %v830_v0 = vmax.f32 %v798_v60, %v700_v56  ;;  %v705_v2 = vadd.f32 %v3396_v47, %v704_v62  ;;  %1399 = vmatprep.subr.mxu1 %v948_v59  ;;  %1884 = vmatprep.subr.mxu0 %v1827_v48  ;;  %v1823_v62 = vld [vmem:[%s4739_s7 + $0xa8] sm:$0xff]  ;;  %v1808_v48 = vld [vmem:[%s4739_s7 + $0x30] sm:$0xff] }
 0x15b   : > { %v706_v4 = vpop.f32.mrf.mxu0  ;;  %1400 = vmatpush2.msra.mxu1 %v947_v61  ;;  %1885 = vmatpush1.msra.mxu0 %v1826_v51  ;;  %v1807_v51 = vld [vmem:[%s4739_s7 + $0x28] sm:$0xff] }
 0x15c   : > { %v799_v6 = vmul.f32 0.1, %v705_v2  ;;  %2793 = vmatmul.mubr.msk.f32.gmra.mxu1 %vm987_vm0, %v830_v0  ;;  %1401 = vmatprep.subr.mxu1 %v946_v63 }
 0x15d   : > { %v709_v8 = vpop.f32.mrf.mxu0  ;;  %1244 = vmatprep.mubr.f32.mxu1 %v4747_v1  ;;  %1402 = vmatpush2.msra.mxu1 %v945_v3 }
 0x15e   : > { %v831_v9 = vmax.f32 %v799_v6, %v705_v2  ;;  %v710_v10 = vadd.f32 %v3396_v47, %v709_v8  ;;  %1403 = vmatprep.subr.mxu1 %v944_v5  ;;  %1886 = vmatprep.subr.mxu0 %v1825_v55  ;;  %v1822_v2 = vld [vmem:[%s4739_s7 + $0xa0] sm:$0xff]  ;;  %v1821_v6 = vld [vmem:[%s4739_s7 + $0x98] sm:$0xff] }
 0x15f   : > { %v711_v11 = vpop.f32.mrf.mxu0  ;;  %1404 = vmatpush2.msra.mxu1 %v943_v7  ;;  %1887 = vmatpush1.msra.mxu0 %v1824_v58  ;;  %v1805_v55 = vld [vmem:[%s4739_s7 + $0x18] sm:$0xff] }
 0x160   : > { %v800_v12 = vmul.f32 0.1, %v710_v10  ;;  %2794 = vmatmul.mubr.msk.f32.gmra.mxu1 %vm987_vm0, %v831_v9  ;;  %2825 = vmatprep.subr.mxu1 %v4747_v1  ;;  %v1820_v9 = vld [vmem:[%s4739_s7 + $0x90] sm:$0xff]  ;;  %v854_v58 = vld [vmem:[%s3754_s16 + $0x38] sm:$0xff] }
 0x161   : > { %v714_v13 = vpop.f32.mrf.mxu0  ;;  %1250 = vmatprep.mubr.f32.mxu1 %v4747_v1  ;;  %1888 = vmatprep.subr.mxu0 %v1823_v62  ;;  %v856_v62 = vld [vmem:[%s3754_s16 + $0x48] sm:$0xff] }
 0x162   : > { %v832_v14 = vmax.f32 %v800_v12, %v710_v10  ;;  %v715_v15 = vadd.f32 %v3396_v47, %v714_v13  ;;  %1889 = vmatpush1.msra.mxu0 %v1822_v2  ;;  %v1819_v13 = vld [vmem:[%s4739_s7 + $0x88] sm:$0xff]  ;;  %v855_v2 = vld [vmem:[%s3754_s16 + $0x40] sm:$0xff] }
 0x163   : > { %v716_v16 = vpop.f32.mrf.mxu0  ;;  %1890 = vmatprep.subr.mxu0 %v1821_v6  ;;  %v857_v6 = vld [vmem:[%s3754_s16 + $0x50] sm:$0xff] }
 0x164   : > { %v801_v17 = vmul.f32 0.1, %v715_v15  ;;  %2795 = vmatmul.mubr.msk.f32.gmra.mxu1 %vm987_vm0, %v832_v14  ;;  %1891 = vmatpush1.msra.mxu0 %v1820_v9  ;;  %v1818_v16 = vld [vmem:[%s4739_s7 + $0x80] sm:$0xff]  ;;  %v1860_v9 = vld [vmem:[%s4739_s7 + $0x1d0] sm:$0xff] }
 0x165   : > { %v719_v18 = vpop.f32.mrf.mxu0  ;;  %1256 = vmatprep.mubr.f32.mxu1 %v4747_v1  ;;  %1892 = vmatprep.subr.mxu0 %v1819_v13  ;;  %v1858_v13 = vld [vmem:[%s4739_s7 + $0x1c0] sm:$0xff] }
 0x166   : > { %v833_v19 = vmax.f32 %v801_v17, %v715_v15  ;;  %v720_v20 = vadd.f32 %v3396_v47, %v719_v18  ;;  %1893 = vmatpush1.msra.mxu0 %v1818_v16  ;;  %v1857_v16 = vld [vmem:[%s4739_s7 + $0x1b8] sm:$0xff] }
 0x167   : > { %v721_v21 = vpop.f32.mrf.mxu0 }
 0x168   : > { %v802_v22 = vmul.f32 0.1, %v720_v20  ;;  %2796 = vmatmul.mubr.msk.f32.gmra.mxu1 %vm987_vm0, %v833_v19 }
 0x169   : > { %v724_v23 = vpop.f32.mrf.mxu0  ;;  %1262 = vmatprep.mubr.f32.mxu1 %v4747_v1 }
 0x16a   : > { %v834_v24 = vmax.f32 %v802_v22, %v720_v20  ;;  %v725_v25 = vadd.f32 %v3396_v47, %v724_v23  ;;  %v1817_v20 = vld [vmem:[%s4739_s7 + $0x78] sm:$0xff]  ;;  %v1816_v23 = vld [vmem:[%s4739_s7 + $0x70] sm:$0xff] }
 0x16b   : > { %v726_v27 = vpop.f32.mrf.mxu0  ;;  %1894 = vmatprep.subr.mxu0 %v1817_v20  ;;  %v1855_v20 = vld [vmem:[%s4739_s7 + $0x1a8] sm:$0xff] }
 0x16c   : > { %v803_v28 = vmul.f32 0.1, %v725_v25  ;;  %2797 = vmatmul.mubr.msk.f32.gmra.mxu1 %vm987_vm0, %v834_v24  ;;  %1895 = vmatpush1.msra.mxu0 %v1816_v23  ;;  %v1815_v27 = vld [vmem:[%s4739_s7 + $0x68] sm:$0xff] }
 0x16d   : > { %v729_v30 = vpop.f32.mrf.mxu0  ;;  %1268 = vmatprep.mubr.f32.mxu1 %v4747_v1  ;;  %1896 = vmatprep.subr.mxu0 %v1815_v27  ;;  %v868_v23 = vld [vmem:[%s3754_s16 + $0xa8] sm:$0xff]  ;;  %v870_v27 = vld [vmem:[%s3754_s16 + $0xb8] sm:$0xff] }
 0x16e   : > { %v835_v31 = vmax.f32 %v803_v28, %v725_v25  ;;  %v730_v32 = vadd.f32 %v3396_v47, %v729_v30  ;;  %v1814_v30 = vld [vmem:[%s4739_s7 + $0x60] sm:$0xff] }
 0x16f   : > { %v731_v34 = vpop.f32.mrf.mxu0  ;;  %1897 = vmatpush1.msra.mxu0 %v1814_v30  ;;  %v869_v30 = vld [vmem:[%s3754_s16 + $0xb0] sm:$0xff] }
 0x170   : > { %v804_v35 = vmul.f32 0.1, %v730_v32  ;;  %2798 = vmatmul.mubr.msk.f32.gmra.mxu1 %vm987_vm0, %v835_v31  ;;  %v1813_v34 = vld [vmem:[%s4739_s7 + $0x58] sm:$0xff] }
 0x171   : > { %v734_v37 = vpop.f32.mrf.mxu0  ;;  %1274 = vmatprep.mubr.f32.mxu1 %v4747_v1  ;;  %1898 = vmatprep.subr.mxu0 %v1813_v34  ;;  %v871_v34 = vld [vmem:[%s3754_s16 + $0xc0] sm:$0xff] }
 0x172   : > { %v836_v38 = vmax.f32 %v804_v35, %v730_v32  ;;  %v735_v39 = vadd.f32 %v3396_v47, %v734_v37  ;;  %v1812_v37 = vld [vmem:[%s4739_s7 + $0x50] sm:$0xff] }
 0x173   : > { %v736_v41 = vpop.f32.mrf.mxu0  ;;  %1899 = vmatpush1.msra.mxu0 %v1812_v37  ;;  %v1846_v37 = vld [vmem:[%s4739_s7 + $0x160] sm:$0xff] }
 0x174   : > { %v805_v42 = vmul.f32 0.1, %v735_v39  ;;  %2799 = vmatmul.mubr.msk.f32.gmra.mxu1 %vm987_vm0, %v836_v38  ;;  %v1811_v41 = vld [vmem:[%s4739_s7 + $0x48] sm:$0xff] }
 0x175   : > { %v739_v44 = vpop.f32.mrf.mxu0  ;;  %1280 = vmatprep.mubr.f32.mxu1 %v4747_v1  ;;  %1900 = vmatprep.subr.mxu0 %v1811_v41  ;;  %v1844_v41 = vld [vmem:[%s4739_s7 + $0x150] sm:$0xff] }
 0x176   : > { %v837_v45 = vmax.f32 %v805_v42, %v735_v39  ;;  %v740_v46 = vadd.f32 %v3396_v47, %v739_v44 }
 0x177   : > { %v741_v49 = vpop.f32.mrf.mxu0 }
 0x178   : > { %v806_v50 = vmul.f32 0.1, %v740_v46  ;;  %2800 = vmatmul.mubr.msk.f32.gmra.mxu1 %vm987_vm0, %v837_v45  ;;  %v848_v45 = vld [vmem:[%s3754_s16 + $0x8] sm:$0xff]  ;;  %v847_v49 = vld [vmem:[%s3754_s16] sm:$0xff] }
 0x179   : > { %v744_v52 = vpop.f32.mrf.mxu0  ;;  %1286 = vmatprep.mubr.f32.mxu1 %v4747_v1 }
 0x17a   : > { %v838_v53 = vmax.f32 %v806_v50, %v740_v46  ;;  %v745_v54 = vadd.f32 %v3396_v47, %v744_v52  ;;  %v1809_v46 = vld [vmem:[%s4739_s7 + $0x38] sm:$0xff]  ;;  %v1806_v52 = vld [vmem:[%s4739_s7 + $0x20] sm:$0xff] }
 0x17b   : > { %v746_v56 = vpop.f32.mrf.mxu0  ;;  %v850_v50 = vld [vmem:[%s3754_s16 + $0x18] sm:$0xff] }
 0x17c   : > { %v807_v57 = vmul.f32 0.1, %v745_v54  ;;  %2801 = vmatmul.mubr.msk.f32.gmra.mxu1 %vm987_vm0, %v838_v53  ;;  %v849_v53 = vld [vmem:[%s3754_s16 + $0x10] sm:$0xff] }
 0x17d   : > { %v749_v59 = vpop.f32.mrf.mxu0  ;;  %1292 = vmatprep.mubr.f32.mxu1 %v4747_v1  ;;  %v1804_v56 = vld [vmem:[%s4739_s7 + $0x10] sm:$0xff] }
 0x17e   : > { %v839_v60 = vmax.f32 %v807_v57, %v745_v54  ;;  %v750_v61 = vadd.f32 %v3396_v47, %v749_v59  ;;  %v852_v54 = vld [vmem:[%s3754_s16 + $0x28] sm:$0xff]  ;;  %v851_v57 = vld [vmem:[%s3754_s16 + $0x20] sm:$0xff] }
 0x17f   : > { %v751_v63 = vpop.f32.mrf.mxu0  ;;  %v1803_v59 = vld [vmem:[%s4739_s7 + $0x8] sm:$0xff] }
 0x180   : > { %v808_v0 = vmul.f32 0.1, %v750_v61  ;;  %2802 = vmatmul.mubr.msk.f32.gmra.mxu1 %vm987_vm0, %v839_v60  ;;  %v1802_v60 = vld [vmem:[%s4739_s7] sm:$0xff]  ;;  %v1865_v63 = vld [vmem:[%s4739_s7 + $0x1f8] sm:$0xff] }
 0x181   : > { %v754_v3 = vpop.f32.mrf.mxu0  ;;  %1298 = vmatprep.mubr.f32.mxu1 %v4747_v1 }
 0x182   : > { %v840_v4 = vmax.f32 %v808_v0, %v750_v61  ;;  %v755_v5 = vadd.f32 %v3396_v47, %v754_v3  ;;  %v853_v61 = vld [vmem:[%s3754_s16 + $0x30] sm:$0xff]  ;;  %v858_v3 = vld [vmem:[%s3754_s16 + $0x58] sm:$0xff] }
 0x183   : > { %v756_v7 = vpop.f32.mrf.mxu0  ;;  %v1864_v0 = vld [vmem:[%s4739_s7 + $0x1f0] sm:$0xff] }
 0x184   : > { %v809_v8 = vmul.f32 0.1, %v755_v5  ;;  %2803 = vmatmul.mubr.msk.f32.gmra.mxu1 %vm987_vm0, %v840_v4  ;;  %v1863_v4 = vld [vmem:[%s4739_s7 + $0x1e8] sm:$0xff] }
 0x185   : > { %v759_v10 = vpop.f32.mrf.mxu0  ;;  %1304 = vmatprep.mubr.f32.mxu1 %v4747_v1  ;;  %v860_v7 = vld [vmem:[%s3754_s16 + $0x68] sm:$0xff] }
 0x186   : > { %v841_v11 = vmax.f32 %v809_v8, %v755_v5  ;;  %v760_v12 = vadd.f32 %v3396_v47, %v759_v10  ;;  %v1862_v5 = vld [vmem:[%s4739_s7 + $0x1e0] sm:$0xff]  ;;  %v1861_v8 = vld [vmem:[%s4739_s7 + $0x1d8] sm:$0xff] }
 0x187   : > { %v761_v14 = vpop.f32.mrf.mxu0  ;;  %v859_v10 = vld [vmem:[%s3754_s16 + $0x60] sm:$0xff] }
 0x188   : > { %v810_v15 = vmul.f32 0.1, %v760_v12  ;;  %2804 = vmatmul.mubr.msk.f32.gmra.mxu1 %vm987_vm0, %v841_v11  ;;  %v862_v11 = vld [vmem:[%s3754_s16 + $0x78] sm:$0xff]  ;;  %v861_v14 = vld [vmem:[%s3754_s16 + $0x70] sm:$0xff] }
 0x189   : > { %v764_v17 = vpop.f32.mrf.mxu0  ;;  %1310 = vmatprep.mubr.f32.mxu1 %v4747_v1 }
 0x18a   : > { %v842_v18 = vmax.f32 %v810_v15, %v760_v12  ;;  %v765_v19 = vadd.f32 %v3396_v47, %v764_v17  ;;  %v1859_v12 = vld [vmem:[%s4739_s7 + $0x1c8] sm:$0xff]  ;;  %v1856_v17 = vld [vmem:[%s4739_s7 + $0x1b0] sm:$0xff] }
 0x18b   : > { %v766_v21 = vpop.f32.mrf.mxu0  ;;  %v864_v15 = vld [vmem:[%s3754_s16 + $0x88] sm:$0xff] }
 0x18c   : > { %v811_v22 = vmul.f32 0.1, %v765_v19  ;;  %2805 = vmatmul.mubr.msk.f32.gmra.mxu1 %vm987_vm0, %v842_v18  ;;  %v863_v18 = vld [vmem:[%s3754_s16 + $0x80] sm:$0xff] }
 0x18d   : > { %v769_v24 = vpop.f32.mrf.mxu0  ;;  %1316 = vmatprep.mubr.f32.mxu1 %v4747_v1  ;;  %v1854_v21 = vld [vmem:[%s4739_s7 + $0x1a0] sm:$0xff] }
 0x18e   : > { %v843_v25 = vmax.f32 %v811_v22, %v765_v19  ;;  %v770_v26 = vadd.f32 %v3396_v47, %v769_v24  ;;  %v866_v19 = vld [vmem:[%s3754_s16 + $0x98] sm:$0xff]  ;;  %v865_v22 = vld [vmem:[%s3754_s16 + $0x90] sm:$0xff] }
 0x18f   : > { %v771_v28 = vpop.f32.mrf.mxu0  ;;  %v1853_v24 = vld [vmem:[%s4739_s7 + $0x198] sm:$0xff] }
 0x190   : > { %v812_v29 = vmul.f32 0.1, %v770_v26  ;;  %2806 = vmatmul.mubr.msk.f32.gmra.mxu1 %vm987_vm0, %v843_v25  ;;  %v1852_v25 = vld [vmem:[%s4739_s7 + $0x190] sm:$0xff]  ;;  %v1851_v28 = vld [vmem:[%s4739_s7 + $0x188] sm:$0xff] }
 0x191   : > { %v774_v31 = vpop.f32.mrf.mxu0  ;;  %1322 = vmatprep.mubr.f32.mxu1 %v4747_v1 }
 0x192   : > { %v844_v32 = vmax.f32 %v812_v29, %v770_v26  ;;  %v775_v33 = vadd.f32 %v3396_v47, %v774_v31  ;;  %v867_v26 = vld [vmem:[%s3754_s16 + $0xa0] sm:$0xff]  ;;  %v872_v31 = vld [vmem:[%s3754_s16 + $0xc8] sm:$0xff] }
 0x193   : > { %v776_v35 = vpop.f32.mrf.mxu0  ;;  %v1850_v29 = vld [vmem:[%s4739_s7 + $0x180] sm:$0xff] }
 0x194   : > { %v813_v36 = vmul.f32 0.1, %v775_v33  ;;  %2807 = vmatmul.mubr.msk.f32.gmra.mxu1 %vm987_vm0, %v844_v32  ;;  %v1849_v32 = vld [vmem:[%s4739_s7 + $0x178] sm:$0xff] }
 0x195   : > { %v779_v38 = vpop.f32.mrf.mxu0  ;;  %1328 = vmatprep.mubr.f32.mxu1 %v4747_v1  ;;  %v874_v35 = vld [vmem:[%s3754_s16 + $0xd8] sm:$0xff] }
 0x196   : > { %v845_v39 = vmax.f32 %v813_v36, %v775_v33  ;;  %v780_v40 = vadd.f32 %v3396_v47, %v779_v38  ;;  %v1810_v47 = vld [vmem:[%s4739_s7 + $0x40] sm:$0xff]  ;;  %v1848_v33 = vld [vmem:[%s4739_s7 + $0x170] sm:$0xff]  ;;  %v1847_v36 = vld [vmem:[%s4739_s7 + $0x168] sm:$0xff] }
 0x197   : > { %v781_v42 = vpop.f32.mrf.mxu0  ;;  %1901 = vmatpush1.msra.mxu0 %v1810_v47  ;;  %v873_v38 = vld [vmem:[%s3754_s16 + $0xd0] sm:$0xff]  ;;  %v1843_v47 = vld [vmem:[%s4739_s7 + $0x148] sm:$0xff] }
 0x198   : > { %v814_v43 = vmul.f32 0.1, %v780_v40  ;;  %2808 = vmatmul.mubr.msk.f32.gmra.mxu1 %vm987_vm0, %v845_v39  ;;  %1902 = vmatprep.subr.mxu0 %v1809_v46  ;;  %v876_v39 = vld [vmem:[%s3754_s16 + $0xe8] sm:$0xff]  ;;  %v875_v42 = vld [vmem:[%s3754_s16 + $0xe0] sm:$0xff] }
 0x199   : > { %1334 = vmatprep.mubr.f32.mxu1 %v4747_v1  ;;  %1903 = vmatpush1.msra.mxu0 %v1808_v48  ;;  %v880_v46 = vld [vmem:[%s3754_s16 + $0x108] sm:$0xff]  ;;  %v1841_v48 = vld [vmem:[%s4739_s7 + $0x138] sm:$0xff] }
 0x19a   : > { %v846_v44 = vmax.f32 %v814_v43, %v780_v40  ;;  %1904 = vmatprep.subr.mxu0 %v1807_v51  ;;  %v1845_v40 = vld [vmem:[%s4739_s7 + $0x158] sm:$0xff] }
 0x19b   : > { %1905 = vmatpush1.msra.mxu0 %v1806_v52  ;;  %v878_v43 = vld [vmem:[%s3754_s16 + $0xf8] sm:$0xff]  ;;  %v1839_v52 = vld [vmem:[%s4739_s7 + $0x128] sm:$0xff] }
 0x19c   : > { %2809 = vmatmul.mubr.msk.f32.gmra.mxu1 %vm987_vm0, %v846_v44  ;;  %1906 = vmatprep.subr.mxu0 %v1805_v55  ;;  %v1842_v44 = vld [vmem:[%s4739_s7 + $0x140] sm:$0xff]  ;;  %v882_v51 = vld [vmem:[%s3754_s16 + $0x118] sm:$0xff] }
 0x19d   : > { %1405 = vmatprep.mubr.f32.mxu1 %v848_v45  ;;  %1907 = vmatpush1.msra.mxu0 %v1804_v56  ;;  %v877_v45 = vld [vmem:[%s3754_s16 + $0xf0] sm:$0xff]  ;;  %v884_v56 = vld [vmem:[%s3754_s16 + $0x128] sm:$0xff] }
 0x19e   : > { %1908 = vmatprep.subr.mxu0 %v1803_v59 }
 0x19f   : > { %1909 = vmatpush1.msra.mxu0 %v1802_v60  ;;  %v886_v60 = vld [vmem:[%s3754_s16 + $0x138] sm:$0xff] }
 0x1a0   : > { %1406 = vmatmul.mubr.f32.vlgmr.msra.gmra.mxu1 %v847_v49  ;;  %1910 = vmatprep.subr.mxu0 %v1865_v63  ;;  %v1840_v49 = vld [vmem:[%s4739_s7 + $0x130] sm:$0xff] }
 0x1a1   : > { %1411 = vmatprep.mubr.f32.mxu1 %v850_v50  ;;  %1911 = vmatpush2.msra.mxu0 %v1864_v0  ;;  %v879_v50 = vld [vmem:[%s3754_s16 + $0x100] sm:$0xff]  ;;  %v1836_v0 = vld [vmem:[%s4739_s7 + $0x110] sm:$0xff] }
 0x1a2   : > { %1912 = vmatprep.subr.mxu0 %v1863_v4 }
 0x1a3   : > { %1913 = vmatpush2.msra.mxu0 %v1862_v5  ;;  %v888_v5 = vld [vmem:[%s3754_s16 + $0x148] sm:$0xff] }
 0x1a4   : > { %1412 = vmatmul.mubr.f32.gmra.mxu1 %v849_v53  ;;  %1914 = vmatprep.subr.mxu0 %v1861_v8  ;;  %v887_v8 = vld [vmem:[%s3754_s16 + $0x140] sm:$0xff] }
 0x1a5   : > { %1417 = vmatprep.mubr.f32.mxu1 %v852_v54  ;;  %1915 = vmatpush2.msra.mxu0 %v1860_v9  ;;  %v881_v54 = vld [vmem:[%s3754_s16 + $0x110] sm:$0xff] }
 0x1a6   : > { %1916 = vmatprep.subr.mxu0 %v1859_v12  ;;  %v889_v12 = vld [vmem:[%s3754_s16 + $0x150] sm:$0xff] }
 0x1a7   : > { %1917 = vmatpush2.msra.mxu0 %v1858_v13 }
 0x1a8   : > { %1418 = vmatmul.mubr.f32.gmra.mxu1 %v851_v57  ;;  %1918 = vmatprep.subr.mxu0 %v1857_v16  ;;  %v891_v16 = vld [vmem:[%s3754_s16 + $0x160] sm:$0xff] }
 0x1a9   : > { %1423 = vmatprep.mubr.f32.mxu1 %v854_v58  ;;  %1919 = vmatpush2.msra.mxu0 %v1856_v17  ;;  %v883_v58 = vld [vmem:[%s3754_s16 + $0x120] sm:$0xff] }
 0x1aa   : > { %1920 = vmatprep.subr.mxu0 %v1855_v20  ;;  %v893_v20 = vld [vmem:[%s3754_s16 + $0x170] sm:$0xff] }
 0x1ab   : > { %1921 = vmatpush2.msra.mxu0 %v1854_v21 }
 0x1ac   : > { %1424 = vmatmul.mubr.f32.gmra.mxu1 %v853_v61  ;;  %1922 = vmatprep.subr.mxu0 %v1853_v24  ;;  %v1838_v61 = vld [vmem:[%s4739_s7 + $0x120] sm:$0xff] }
 0x1ad   : > { %1429 = vmatprep.mubr.f32.mxu1 %v856_v62  ;;  %1923 = vmatpush2.msra.mxu0 %v1852_v25  ;;  %v1837_v62 = vld [vmem:[%s4739_s7 + $0x118] sm:$0xff]  ;;  %v895_v24 = vld [vmem:[%s3754_s16 + $0x180] sm:$0xff] }
 0x1ae   : > { %1924 = vmatprep.subr.mxu0 %v1851_v28  ;;  %v897_v28 = vld [vmem:[%s3754_s16 + $0x190] sm:$0xff] }
 0x1af   : > { %1925 = vmatpush2.msra.mxu0 %v1850_v29 }
 0x1b0   : > { %1430 = vmatmul.mubr.f32.gmra.mxu1 %v855_v2  ;;  %1926 = vmatprep.subr.mxu0 %v1849_v32  ;;  %v885_v2 = vld [vmem:[%s3754_s16 + $0x130] sm:$0xff]  ;;  %v899_v32 = vld [vmem:[%s3754_s16 + $0x1a0] sm:$0xff] }
 0x1b1   : > { %1435 = vmatprep.mubr.f32.mxu1 %v858_v3  ;;  %1927 = vmatpush2.msra.mxu0 %v1848_v33  ;;  %v1835_v3 = vld [vmem:[%s4739_s7 + $0x108] sm:$0xff] }
 0x1b2   : > { %1928 = vmatprep.subr.mxu0 %v1847_v36  ;;  %v901_v36 = vld [vmem:[%s3754_s16 + $0x1b0] sm:$0xff] }
 0x1b3   : > { %1929 = vmatpush2.msra.mxu0 %v1846_v37 }
 0x1b4   : > { %1436 = vmatmul.mubr.f32.gmra.mxu1 %v857_v6  ;;  %1930 = vmatprep.subr.mxu0 %v1845_v40  ;;  %v1834_v6 = vld [vmem:[%s4739_s7 + $0x100] sm:$0xff] }
 0x1b5   : > { %1441 = vmatprep.mubr.f32.mxu1 %v860_v7  ;;  %1931 = vmatpush2.msra.mxu0 %v1844_v41  ;;  %v903_v40 = vld [vmem:[%s3754_s16 + $0x1c0] sm:$0xff] }
 0x1b6   : > { %1932 = vmatprep.subr.mxu0 %v1843_v47  ;;  %v905_v47 = vld [vmem:[%s3754_s16 + $0x1d0] sm:$0xff] }
 0x1b7   : > { %1933 = vmatpush2.msra.mxu0 %v1842_v44 }
 0x1b8   : > { %1442 = vmatmul.mubr.f32.gmra.mxu1 %v859_v10  ;;  %1934 = vmatprep.subr.mxu0 %v1841_v48  ;;  %v890_v10 = vld [vmem:[%s3754_s16 + $0x158] sm:$0xff]  ;;  %v907_v48 = vld [vmem:[%s3754_s16 + $0x1e0] sm:$0xff] }
 0x1b9   : > { %1447 = vmatprep.mubr.f32.mxu1 %v862_v11  ;;  %1935 = vmatpush2.msra.mxu0 %v1840_v49 }
 0x1ba   : > { %1936 = vmatprep.subr.mxu0 %v1839_v52  ;;  %v909_v52 = vld [vmem:[%s3754_s16 + $0x1f0] sm:$0xff] }
 0x1bb   : > { %1937 = vmatpush2.msra.mxu0 %v1838_v61 }
 0x1bc   : > { %1448 = vmatmul.mubr.f32.gmra.mxu1 %v861_v14  ;;  %1938 = vmatprep.subr.mxu0 %v1837_v62  ;;  %v892_v14 = vld [vmem:[%s3754_s16 + $0x168] sm:$0xff] }
 0x1bd   : > { %1453 = vmatprep.mubr.f32.mxu1 %v864_v15  ;;  %1939 = vmatpush2.msra.mxu0 %v1836_v0 }
 0x1be   : > { %1940 = vmatprep.subr.mxu0 %v1835_v3 }
 0x1bf   : > { %1941 = vmatpush2.msra.mxu0 %v1834_v6 }
 0x1c0   : > { %1454 = vmatmul.mubr.f32.gmra.mxu1 %v863_v18  ;;  %2366 = vmatprep.subr.mxu0 %v4747_v1  ;;  %v894_v18 = vld [vmem:[%s3754_s16 + $0x178] sm:$0xff] }
 0x1c1   : > { %1459 = vmatprep.mubr.f32.mxu1 %v866_v19 }
 0x1c4   : > { %1460 = vmatmul.mubr.f32.gmra.mxu1 %v865_v22  ;;  %v896_v22 = vld [vmem:[%s3754_s16 + $0x188] sm:$0xff] }
 0x1c5   : > { %1465 = vmatprep.mubr.f32.mxu1 %v868_v23 }
 0x1c8   : > { %1466 = vmatmul.mubr.f32.gmra.mxu1 %v867_v26  ;;  %v898_v26 = vld [vmem:[%s3754_s16 + $0x198] sm:$0xff] }
 0x1c9   : > { %1471 = vmatprep.mubr.f32.mxu1 %v870_v27 }
 0x1cc   : > { %1472 = vmatmul.mubr.f32.gmra.mxu1 %v869_v30  ;;  %v900_v30 = vld [vmem:[%s3754_s16 + $0x1a8] sm:$0xff] }
 0x1cd   : > { %1477 = vmatprep.mubr.f32.mxu1 %v872_v31 }
 0x1d0   : > { %1478 = vmatmul.mubr.f32.gmra.mxu1 %v871_v34  ;;  %v902_v34 = vld [vmem:[%s3754_s16 + $0x1b8] sm:$0xff] }
 0x1d1   : > { %1483 = vmatprep.mubr.f32.mxu1 %v874_v35 }
 0x1d4   : > { %1484 = vmatmul.mubr.f32.gmra.mxu1 %v873_v38  ;;  %v904_v38 = vld [vmem:[%s3754_s16 + $0x1c8] sm:$0xff] }
 0x1d5   : > { %1489 = vmatprep.mubr.f32.mxu1 %v876_v39 }
 0x1d8   : > { %1490 = vmatmul.mubr.f32.gmra.mxu1 %v875_v42  ;;  %v906_v42 = vld [vmem:[%s3754_s16 + $0x1d8] sm:$0xff] }
 0x1d9   : > { %1495 = vmatprep.mubr.f32.mxu1 %v878_v43 }
 0x1dc   : > { %1496 = vmatmul.mubr.f32.gmra.mxu1 %v877_v45  ;;  %v908_v45 = vld [vmem:[%s3754_s16 + $0x1e8] sm:$0xff] }
 0x1dd   : > { %1501 = vmatprep.mubr.f32.mxu1 %v880_v46 }
 0x1e0   : > { %v3902_v53 = vpop.f32.mrf.mxu1  ;;  %1502 = vmatmul.mubr.f32.gmra.mxu1 %v879_v50  ;;  %v910_v50 = vld [vmem:[%s3754_s16 + $0x1f8] sm:$0xff] }
 0x1e1   : > { %1507 = vmatprep.mubr.f32.mxu1 %v882_v51 }
 0x1e2   : > { %v3905_v55 = vpop.f32.mrf.mxu1 }
 0x1e4   : > { %v3908_v57 = vpop.f32.mrf.mxu1  ;;  %1508 = vmatmul.mubr.f32.gmra.mxu1 %v881_v54 }
 0x1e5   : > { %1513 = vmatprep.mubr.f32.mxu1 %v884_v56 }
 0x1e6   : > { %v3911_v59 = vpop.f32.mrf.mxu1 }
 0x1e8   : > { %v3920_v63 = vpop.f32.mrf.mxu1  ;;  %1514 = vmatmul.mubr.f32.gmra.mxu1 %v883_v58 }
 0x1e9   : > { %1519 = vmatprep.mubr.f32.mxu1 %v886_v60 }
 0x1ea   : > { %v3929_v4 = vpop.f32.mrf.mxu1 }
 0x1ec   : > { %v3935_v7 = vpop.f32.mrf.mxu1  ;;  %1520 = vmatmul.mubr.f32.gmra.mxu1 %v885_v2 }
 0x1ed   : > { %1525 = vmatprep.mubr.f32.mxu1 %v888_v5 }
 0x1ee   : > { %v3939_v9 = vpop.f32.mrf.mxu1 }
 0x1f0   : > { %v3942_v11 = vpop.f32.mrf.mxu1  ;;  %1526 = vmatmul.mubr.f32.gmra.mxu1 %v887_v8 }
 0x1f1   : > { %1531 = vmatprep.mubr.f32.mxu1 %v890_v10 }
 0x1f2   : > { %v3945_v13 = vpop.f32.mrf.mxu1 }
 0x1f4   : > { %v3948_v15 = vpop.f32.mrf.mxu1  ;;  %1532 = vmatmul.mubr.f32.gmra.mxu1 %v889_v12 }
 0x1f5   : > { %1537 = vmatprep.mubr.f32.mxu1 %v892_v14 }
 0x1f6   : > { %v3951_v17 = vpop.f32.mrf.mxu1 }
 0x1f8   : > { %v3954_v19 = vpop.f32.mrf.mxu1  ;;  %1538 = vmatmul.mubr.f32.gmra.mxu1 %v891_v16 }
 0x1f9   : > { %1543 = vmatprep.mubr.f32.mxu1 %v894_v18 }
 0x1fa   : > { %v3957_v21 = vpop.f32.mrf.mxu1 }
 0x1fc   : > { %v3960_v23 = vpop.f32.mrf.mxu1  ;;  %1544 = vmatmul.mubr.f32.gmra.mxu1 %v893_v20 }
 0x1fd   : > { %1549 = vmatprep.mubr.f32.mxu1 %v896_v22 }
 0x1fe   : > { %v3963_v25 = vpop.f32.mrf.mxu1 }
 0x200   : > { %v3966_v27 = vpop.f32.mrf.mxu1  ;;  %1550 = vmatmul.mubr.f32.gmra.mxu1 %v895_v24 }
 0x201   : > { %1555 = vmatprep.mubr.f32.mxu1 %v898_v26 }
 0x202   : > { %v3969_v29 = vpop.f32.mrf.mxu1 }
 0x204   : > { %v3972_v31 = vpop.f32.mrf.mxu1  ;;  %1556 = vmatmul.mubr.f32.gmra.mxu1 %v897_v28 }
 0x205   : > { %1561 = vmatprep.mubr.f32.mxu1 %v900_v30 }
 0x206   : > { %v3975_v33 = vpop.f32.mrf.mxu1 }
 0x208   : > { %v3978_v35 = vpop.f32.mrf.mxu1  ;;  %1562 = vmatmul.mubr.f32.gmra.mxu1 %v899_v32 }
 0x209   : > { %1567 = vmatprep.mubr.f32.mxu1 %v902_v34 }
 0x20a   : > { %v3981_v37 = vpop.f32.mrf.mxu1 }
 0x20c   : > { %v3984_v39 = vpop.f32.mrf.mxu1  ;;  %1568 = vmatmul.mubr.f32.gmra.mxu1 %v901_v36 }
 0x20d   : > { %1573 = vmatprep.mubr.f32.mxu1 %v904_v38 }
 0x20e   : > { %v3987_v41 = vpop.f32.mrf.mxu1 }
 0x210   : > { %v3990_v43 = vpop.f32.mrf.mxu1  ;;  %1574 = vmatmul.mubr.f32.gmra.mxu1 %v903_v40 }
 0x211   : > { %1579 = vmatprep.mubr.f32.mxu1 %v906_v42 }
 0x212   : > { %v3993_v44 = vpop.f32.mrf.mxu1 }
 0x214   : > { %v3996_v46 = vpop.f32.mrf.mxu1  ;;  %1580 = vmatmul.mubr.f32.gmra.mxu1 %v905_v47  ;;  %v1600_v47 = vlaneseq }
 0x215   : > { %1585 = vmatprep.mubr.f32.mxu1 %v908_v45 }
 0x216   : > { %v3999_v49 = vpop.f32.mrf.mxu1 }
 0x218   : > { %v4002_v51 = vpop.f32.mrf.mxu1  ;;  %1586 = vmatmul.mubr.f32.gmra.mxu1 %v907_v48 }
 0x219   : > { %1591 = vmatprep.mubr.f32.mxu1 %v910_v50  ;;  %v4067_v50 = vshrl.u32 %v1600_v47, 7 }
 0x21a   : > { %v4005_v54 = vpop.f32.mrf.mxu1 }
 0x21b   : > { %4775 = vst [vmem:[#allocation25_spill] sm:$0xff] %v4067_v50 }
 0x21c   : > { %v4007_v56 = vpop.f32.mrf.mxu1  ;;  %1592 = vmatmul.mubr.f32.gmra.mxu1 %v909_v52 }
 0x21e   : > { %v4009_v58 = vpop.f32.mrf.mxu1 }
 0x220   : > { %v4011_v60 = vpop.f32.mrf.mxu1 }
 0x222   : > { %v4013_v61 = vpop.f32.mrf.mxu1 }
 0x224   : > { %v4015_v62 = vpop.f32.mrf.mxu1 }
 0x226   : > { %v4017_v0 = vpop.f32.mrf.mxu1 }
 0x228   : > { %v4019_v2 = vpop.f32.mrf.mxu1 }
 0x22a   : > { %v4021_v3 = vpop.f32.mrf.mxu1 }
 0x22c   : > { %v4023_v5 = vpop.f32.mrf.mxu1 }
 0x22e   : > { %v4025_v6 = vpop.f32.mrf.mxu1 }
 0x230   : > { %v4027_v8 = vpop.f32.mrf.mxu1 }
 0x232   : > { %v4029_v10 = vpop.f32.mrf.mxu1 }
 0x234   : > { %v4031_v12 = vpop.f32.mrf.mxu1 }
 0x236   : > { %v4033_v14 = vpop.f32.mrf.mxu1 }
 0x238   : > { %v4035_v16 = vpop.f32.mrf.mxu1 }
 0x23a   : > { %v4037_v18 = vpop.f32.mrf.mxu1 }
 0x23b   : > { %4760 = vst [vmem:[#allocation10_spill] sm:$0xff] %v4037_v18 }
 0x23c   : > { %v4039_v20 = vpop.f32.mrf.mxu1 }
 0x23d   : > { %4761 = vst [vmem:[#allocation11_spill] sm:$0xff] %v4039_v20 }
 0x23e   : > { %v4041_v22 = vpop.f32.mrf.mxu1 }
 0x23f   : > { %4762 = vst [vmem:[#allocation12_spill] sm:$0xff] %v4041_v22 }
 0x240   : > { %v4043_v24 = vpop.f32.mrf.mxu1 }
 0x241   : > { %4763 = vst [vmem:[#allocation13_spill] sm:$0xff] %v4043_v24 }
 0x242   : > { %v4045_v26 = vpop.f32.mrf.mxu1 }
 0x243   : > { %4764 = vst [vmem:[#allocation14_spill] sm:$0xff] %v4045_v26 }
 0x244   : > { %v4047_v28 = vpop.f32.mrf.mxu1 }
 0x245   : > { %4765 = vst [vmem:[#allocation15_spill] sm:$0xff] %v4047_v28 }
 0x246   : > { %v4049_v30 = vpop.f32.mrf.mxu1 }
 0x247   : > { %4766 = vst [vmem:[#allocation16_spill] sm:$0xff] %v4049_v30  ;;  %v2341_v30 = vld [vmem:[%s4741_s9 + $0x70] sm:$0xff] }
 0x248   : > { %v4051_v32 = vpop.f32.mrf.mxu1 }
 0x249   : > { %4767 = vst [vmem:[#allocation17_spill] sm:$0xff] %v4051_v32 }
 0x24a   : > { %v4053_v34 = vpop.f32.mrf.mxu1 }
 0x24b   : > { %4768 = vst [vmem:[#allocation18_spill] sm:$0xff] %v4053_v34  ;;  %v4749_v34 = vsub.s32 0, %v4067_v50 }
 0x24c   : > { %v4055_v36 = vpop.f32.mrf.mxu1 }
 0x24d   : > { %4769 = vst [vmem:[#allocation19_spill] sm:$0xff] %v4055_v36 }
 0x24e   : > { %v4057_v38 = vpop.f32.mrf.mxu1 }
 0x24f   : > { %4770 = vst [vmem:[#allocation20_spill] sm:$0xff] %v4057_v38 }
 0x250   : > { %v4059_v40 = vpop.f32.mrf.mxu1 }
 0x251   : > { %4771 = vst [vmem:[#allocation21_spill] sm:$0xff] %v4059_v40  ;;  %v1598_v40 = vld [vmem:[%s4738_s6] sm:$0x3] }
 0x252   : > { %v4061_v42 = vpop.f32.mrf.mxu1  ;;  %v4084_v47 = vrot.slane %v1598_v40, %v4749_v34 }
 0x253   : > { %4772 = vst [vmem:[#allocation22_spill] sm:$0xff] %v4061_v42  ;;  %v4750_v42 = vsub.s32 1, %v4067_v50 }
 0x254   : > { %v4063_v45 = vpop.f32.mrf.mxu1 }
 0x255   : > { %4773 = vst [vmem:[#allocation23_spill] sm:$0xff] %v4063_v45  ;;  %v4780_v45 = vmov 0.0  }
 0x256   : > { %v4065_v48 = vpop.f32.mrf.mxu1 }
 0x257   : > { %4774 = vst [vmem:[#allocation24_spill] sm:$0xff] %v4065_v48  ;;  %v4092_v48 = vrot.slane %v1598_v40, %v4750_v42  ;;  %v4106_v40 = vld [vmem:[%s4741_s9 + $0x68] sm:$0xff] }
 0x258   : > { %v4069_v52 = vpop.f32.mrf.mxu1 }
 0x259   : > { %4776 = vst [vmem:[#allocation26_spill] sm:$0xff] %v4069_v52 }
 0x25a   : > { %v4071_v1 = vpop.f32.mrf.mxu1 }
 0x25b   : > { %4777 = vst [vmem:[#allocation27_spill] sm:$0xff] %v4071_v1  ;;  %v2342_v1 = vld [vmem:[%s4741_s9 + $0x78] sm:$0xff] }
 0x25c   : > { %v4074_v36 = vpop.f32.mrf.mxu1  ;;  %2857 = vmatpush1.msra.mxu1 %v2342_v1 }
 0x25d   : > { %4778 = vst [vmem:[#allocation28_spill] sm:$0xff] %v4074_v36  ;;  %2826 = vmatprep.subr.mxu1 %v4780_v45 }
 0x25e   : > { %v4080_v38 = vpop.f32.mrf.mxu1  ;;  %2858 = vmatpush1.msra.mxu1 %v2341_v30 }
 0x25f   : > { %4779 = vst [vmem:[#allocation29_spill] sm:$0xff] %v4080_v38  ;;  %2827 = vmatprep.subr.mxu1 %v4780_v45 }
 0x260   : > { %v1407_v52 = vpop.f32.mrf.mxu1  ;;  %2859 = vmatpush1.msra.mxu1 %v4106_v40 }
 0x261   : > { %v1408_v36 = vadd.f32 %v1407_v52, %v3902_v53  ;;  %2828 = vmatprep.subr.mxu1 %v4780_v45 }
 0x262   : > { %v1409_v32 = vpop.f32.mrf.mxu1 }
 0x263   : > { %v1610_v38 = vadd.f32 %v4084_v47, %v1408_v36  ;;  %v1410_v34 = vadd.f32 %v1409_v32, %v3905_v55 }
 0x264   : > { %v1413_v28 = vpop.f32.mrf.mxu1 }
 0x265   : > { %v1611_v26 = vadd.f32 %v4092_v48, %v1410_v34  ;;  %v1414_v53 = vadd.f32 %v1413_v28, %v3908_v57  ;;  %v1674_v36 = vmul.f32 0.1, %v1610_v38  ;;  %v4115_v57 = vld [vmem:[%s4741_s9 + $0x60] sm:$0xff] }
 0x266   : > { %v1415_v52 = vpop.f32.mrf.mxu1  ;;  %2860 = vmatpush1.msra.mxu1 %v4115_v57 }
 0x267   : > { %v1675_v55 = vmul.f32 0.1, %v1611_v26  ;;  %v1612_v32 = vadd.f32 %v4084_v47, %v1414_v53  ;;  %v1416_v42 = vadd.f32 %v1415_v52, %v3911_v59  ;;  %2829 = vmatprep.subr.mxu1 %v4780_v45  ;;  %v4124_v59 = vld [vmem:[%s4741_s9 + $0x58] sm:$0xff]  ;;  %v1738_v53 = vmax.f32 %v1674_v36, %v1610_v38 }
 0x268   : > { %v1419_v28 = vpop.f32.mrf.mxu1  ;;  %2861 = vmatpush1.msra.mxu1 %v4124_v59 }
 0x269   : > { %v1613_v34 = vadd.f32 %v4092_v48, %v1416_v42  ;;  %v1420_v50 = vadd.f32 %v1419_v28, %v3920_v63  ;;  %v1739_v24 = vmax.f32 %v1675_v55, %v1611_v26  ;;  %v1676_v52 = vmul.f32 0.1, %v1612_v32  ;;  %2830 = vmatprep.subr.mxu1 %v4780_v45  ;;  %v4133_v63 = vld [vmem:[%s4741_s9 + $0x50] sm:$0xff] }
 0x26a   : > { %v1421_v22 = vpop.f32.mrf.mxu1  ;;  %2862 = vmatpush1.msra.mxu1 %v4133_v63 }
 0x26b   : > { %v1677_v20 = vmul.f32 0.1, %v1613_v34  ;;  %v1614_v18 = vadd.f32 %v4084_v47, %v1420_v50  ;;  %v1422_v42 = vadd.f32 %v1421_v22, %v3929_v4  ;;  %1942 = vmatprep.mubr.f32.mxu0 %v1739_v24  ;;  %2831 = vmatprep.subr.mxu1 %v4780_v45  ;;  %v4142_v4 = vld [vmem:[%s4741_s9 + $0x48] sm:$0xff]  ;;  %v1740_v50 = vmax.f32 %v1676_v52, %v1612_v32 }
 0x26c   : > { %v1425_v26 = vpop.f32.mrf.mxu1  ;;  %1943 = vmatmul.mubr.f32.vlgmr.msra.gmra.mxu0 %v1738_v53  ;;  %2863 = vmatpush1.msra.mxu1 %v4142_v4 }
 0x26d   : > { %v1615_v38 = vadd.f32 %v4092_v48, %v1422_v42  ;;  %v1426_v36 = vadd.f32 %v1425_v26, %v3935_v7  ;;  %v1741_v55 = vmax.f32 %v1677_v20, %v1613_v34  ;;  %2367 = vmatpush1.msra.mxu0 %v2342_v1  ;;  %v1678_v22 = vmul.f32 0.1, %v1614_v18  ;;  %2832 = vmatprep.subr.mxu1 %v4780_v45  ;;  %v4152_v20 = vld [vmem:[%s4741_s9 + $0x40] sm:$0xff] }
 0x26e   : > { %v1427_v24 = vpop.f32.mrf.mxu1  ;;  %2368 = vmatprep.subr.mxu0 %v4780_v45  ;;  %2864 = vmatpush1.msra.mxu1 %v4152_v20 }
 0x26f   : > { %v1679_v28 = vmul.f32 0.1, %v1615_v38  ;;  %v1616_v53 = vadd.f32 %v4084_v47, %v1426_v36  ;;  %v1428_v7 = vadd.f32 %v1427_v24, %v3939_v9  ;;  %1948 = vmatprep.mubr.f32.mxu0 %v1741_v55  ;;  %2369 = vmatpush1.msra.mxu0 %v2341_v30  ;;  %v4161_v9 = vld [vmem:[%s4741_s9 + $0x38] sm:$0xff]  ;;  %v1742_v36 = vmax.f32 %v1678_v22, %v1614_v18 }
 0x270   : > { %v1431_v1 = vpop.f32.mrf.mxu1  ;;  %1949 = vmatmul.mubr.f32.gmra.mxu0 %v1740_v50  ;;  %2833 = vmatprep.subr.mxu1 %v4780_v45 }
 0x271   : > { %v1617_v32 = vadd.f32 %v4092_v48, %v1428_v7  ;;  %v1432_v34 = vadd.f32 %v1431_v1, %v3942_v11  ;;  %v1743_v52 = vmax.f32 %v1679_v28, %v1615_v38  ;;  %v1680_v42 = vmul.f32 0.1, %v1616_v53  ;;  %2370 = vmatprep.subr.mxu0 %v4780_v45  ;;  %2865 = vmatpush1.msra.mxu1 %v4161_v9 }
 0x272   : > { %v1433_v26 = vpop.f32.mrf.mxu1  ;;  %2371 = vmatpush1.msra.mxu0 %v4106_v40  ;;  %2834 = vmatprep.subr.mxu1 %v4780_v45 }
 0x273   : > { %v1681_v55 = vmul.f32 0.1, %v1617_v32  ;;  %v1618_v24 = vadd.f32 %v4084_v47, %v1432_v34  ;;  %v1434_v11 = vadd.f32 %v1433_v26, %v3945_v13  ;;  %1954 = vmatprep.mubr.f32.mxu0 %v1743_v52  ;;  %2372 = vmatprep.subr.mxu0 %v4780_v45  ;;  %v2333_v13 = vld [vmem:[%s4741_s9 + $0x30] sm:$0xff]  ;;  %v1744_v40 = vmax.f32 %v1680_v42, %v1616_v53 }
 0x274   : > { %v1437_v30 = vpop.f32.mrf.mxu1  ;;  %1955 = vmatmul.mubr.f32.gmra.mxu0 %v1742_v36  ;;  %2866 = vmatpush1.msra.mxu1 %v2333_v13 }
 0x275   : > { %v1619_v38 = vadd.f32 %v4092_v48, %v1434_v11  ;;  %v1438_v18 = vadd.f32 %v1437_v30, %v3948_v15  ;;  %v1745_v22 = vmax.f32 %v1681_v55, %v1617_v32  ;;  %2373 = vmatpush1.msra.mxu0 %v4115_v57  ;;  %v1682_v50 = vmul.f32 0.1, %v1618_v24  ;;  %2835 = vmatprep.subr.mxu1 %v4780_v45 }
 0x276   : > { %v1439_v28 = vpop.f32.mrf.mxu1  ;;  %2374 = vmatprep.subr.mxu0 %v4780_v45 }
 0x277   : > { %v1683_v7 = vmul.f32 0.1, %v1619_v38  ;;  %v1620_v1 = vadd.f32 %v4084_v47, %v1438_v18  ;;  %v1440_v15 = vadd.f32 %v1439_v28, %v3951_v17  ;;  %1960 = vmatprep.mubr.f32.mxu0 %v1745_v22  ;;  %2375 = vmatpush1.msra.mxu0 %v4124_v59  ;;  %v2332_v17 = vld [vmem:[%s4741_s9 + $0x28] sm:$0xff]  ;;  %v1746_v59 = vmax.f32 %v1682_v50, %v1618_v24 }
 0x278   : > { %v1443_v57 = vpop.f32.mrf.mxu1  ;;  %1961 = vmatmul.mubr.f32.gmra.mxu0 %v1744_v40  ;;  %2376 = vmatprep.subr.mxu0 %v4780_v45 }
 0x279   : > { %v1621_v32 = vadd.f32 %v4092_v48, %v1440_v15  ;;  %v1444_v34 = vadd.f32 %v1443_v57, %v3954_v19  ;;  %v1747_v53 = vmax.f32 %v1683_v7, %v1619_v38  ;;  %2377 = vmatpush1.msra.mxu0 %v4133_v63  ;;  %v1684_v52 = vmul.f32 0.1, %v1620_v1  ;;  %2867 = vmatpush1.msra.mxu1 %v2332_v17  ;;  %v2330_v7 = vld [vmem:[%s4741_s9 + $0x18] sm:$0xff] }
 0x27a   : > { %v1445_v42 = vpop.f32.mrf.mxu1  ;;  %2378 = vmatprep.subr.mxu0 %v4780_v45  ;;  %2836 = vmatprep.subr.mxu1 %v4780_v45 }
 0x27b   : > { %v1685_v26 = vmul.f32 0.1, %v1621_v32  ;;  %v1622_v36 = vadd.f32 %v4084_v47, %v1444_v34  ;;  %v1446_v19 = vadd.f32 %v1445_v42, %v3957_v21  ;;  %1966 = vmatprep.mubr.f32.mxu0 %v1747_v53  ;;  %2379 = vmatpush1.msra.mxu0 %v4142_v4  ;;  %v2331_v21 = vld [vmem:[%s4741_s9 + $0x20] sm:$0xff]  ;;  %v1748_v4 = vmax.f32 %v1684_v52, %v1620_v1  ;;  %v2329_v52 = vld [vmem:[%s4741_s9 + $0x10] sm:$0xff] }
 0x27c   : > { %v1449_v63 = vpop.f32.mrf.mxu1  ;;  %1967 = vmatmul.mubr.f32.gmra.mxu0 %v1746_v59  ;;  %2380 = vmatprep.subr.mxu0 %v4780_v45 }
 0x27d   : > { %v1623_v55 = vadd.f32 %v4092_v48, %v1446_v19  ;;  %v1450_v11 = vadd.f32 %v1449_v63, %v3960_v23  ;;  %v1749_v24 = vmax.f32 %v1685_v26, %v1621_v32  ;;  %2381 = vmatpush1.msra.mxu0 %v4152_v20  ;;  %v1686_v30 = vmul.f32 0.1, %v1622_v36  ;;  %2868 = vmatpush1.msra.mxu1 %v2331_v21  ;;  %v2328_v19 = vld [vmem:[%s4741_s9 + $0x8] sm:$0xff] }
 0x27e   : > { %v1451_v38 = vpop.f32.mrf.mxu1  ;;  %2382 = vmatprep.subr.mxu0 %v4780_v45  ;;  %2837 = vmatprep.subr.mxu1 %v4780_v45 }
 0x27f   : > { %v1687_v18 = vmul.f32 0.1, %v1623_v55  ;;  %v1624_v22 = vadd.f32 %v4084_v47, %v1450_v11  ;;  %v1452_v23 = vadd.f32 %v1451_v38, %v3963_v25  ;;  %1972 = vmatprep.mubr.f32.mxu0 %v1749_v24  ;;  %2383 = vmatpush1.msra.mxu0 %v4161_v9  ;;  %v1750_v15 = vmax.f32 %v1686_v30, %v1622_v36  ;;  %v2327_v30 = vld [vmem:[%s4741_s9] sm:$0xff] }
 0x280   : > { %v1455_v20 = vpop.f32.mrf.mxu1  ;;  %1973 = vmatmul.mubr.f32.gmra.mxu0 %v1748_v4  ;;  %2384 = vmatprep.subr.mxu0 %v4780_v45 }
 0x281   : > { %v1625_v50 = vadd.f32 %v4092_v48, %v1452_v23  ;;  %v1456_v28 = vadd.f32 %v1455_v20, %v3966_v27  ;;  %v1751_v40 = vmax.f32 %v1687_v18, %v1623_v55  ;;  %2385 = vmatpush1.msra.mxu0 %v2333_v13  ;;  %v1688_v25 = vmul.f32 0.1, %v1624_v22  ;;  %2869 = vmatpush1.msra.mxu1 %v2330_v7 }
 0x282   : > { %v1457_v1 = vpop.f32.mrf.mxu1  ;;  %2386 = vmatprep.subr.mxu0 %v4780_v45  ;;  %2838 = vmatprep.subr.mxu1 %v4780_v45 }
 0x283   : > { %v1689_v9 = vmul.f32 0.1, %v1625_v50  ;;  %v1626_v57 = vadd.f32 %v4084_v47, %v1456_v28  ;;  %v1458_v32 = vadd.f32 %v1457_v1, %v3969_v29  ;;  %1978 = vmatprep.mubr.f32.mxu0 %v1751_v40  ;;  %2387 = vmatpush1.msra.mxu0 %v2332_v17  ;;  %v1752_v59 = vmax.f32 %v1688_v25, %v1624_v22  ;;  %v2358_v22 = vld [vmem:[%s4741_s9 + $0xf8] sm:$0xff] }
 0x284   : > { %v1461_v27 = vpop.f32.mrf.mxu1  ;;  %1979 = vmatmul.mubr.f32.gmra.mxu0 %v1750_v15  ;;  %2388 = vmatprep.subr.mxu0 %v4780_v45 }
 0x285   : > { %v1627_v13 = vadd.f32 %v4092_v48, %v1458_v32  ;;  %v1462_v34 = vadd.f32 %v1461_v27, %v3972_v31  ;;  %v1753_v53 = vmax.f32 %v1689_v9, %v1625_v50  ;;  %2389 = vmatpush1.msra.mxu0 %v2331_v21  ;;  %v1690_v42 = vmul.f32 0.1, %v1626_v57  ;;  %2870 = vmatpush1.msra.mxu1 %v2329_v52  ;;  %v2356_v9 = vld [vmem:[%s4741_s9 + $0xe8] sm:$0xff] }
 0x286   : > { %v1463_v29 = vpop.f32.mrf.mxu1  ;;  %2390 = vmatprep.subr.mxu0 %v4780_v45  ;;  %2839 = vmatprep.subr.mxu1 %v4780_v45 }
 0x287   : > { %v1691_v17 = vmul.f32 0.1, %v1627_v13  ;;  %v1628_v26 = vadd.f32 %v4084_v47, %v1462_v34  ;;  %v1464_v36 = vadd.f32 %v1463_v29, %v3975_v33  ;;  %1984 = vmatprep.mubr.f32.mxu0 %v1753_v53  ;;  %2391 = vmatpush1.msra.mxu0 %v2330_v7  ;;  %v1754_v21 = vmax.f32 %v1690_v42, %v1626_v57  ;;  %v2357_v7 = vld [vmem:[%s4741_s9 + $0xf0] sm:$0xff]  ;;  %v2355_v53 = vld [vmem:[%s4741_s9 + $0xe0] sm:$0xff] }
 0x288   : > { %v1467_v31 = vpop.f32.mrf.mxu1  ;;  %1985 = vmatmul.mubr.f32.gmra.mxu0 %v1752_v59  ;;  %2392 = vmatprep.subr.mxu0 %v4780_v45  ;;  %v4267_v59 = vld [vmem:[%s4741_s9 + $0xd8] sm:$0xff] }
 0x289   : > { %v1629_v63 = vadd.f32 %v4092_v48, %v1464_v36  ;;  %v1468_v55 = vadd.f32 %v1467_v31, %v3978_v35  ;;  %v1755_v11 = vmax.f32 %v1691_v17, %v1627_v13  ;;  %2393 = vmatpush1.msra.mxu0 %v2329_v52  ;;  %v1692_v24 = vmul.f32 0.1, %v1628_v26  ;;  %2871 = vmatpush1.msra.mxu1 %v2328_v19 }
 0x28a   : > { %v1469_v33 = vpop.f32.mrf.mxu1  ;;  %2394 = vmatprep.subr.mxu0 %v4780_v45  ;;  %2840 = vmatprep.subr.mxu1 %v4780_v45 }
 0x28b   : > { %v1693_v38 = vmul.f32 0.1, %v1629_v63  ;;  %v1630_v4 = vadd.f32 %v4084_v47, %v1468_v55  ;;  %v1470_v18 = vadd.f32 %v1469_v33, %v3981_v37  ;;  %1990 = vmatprep.mubr.f32.mxu0 %v1755_v11  ;;  %2395 = vmatpush1.msra.mxu0 %v2328_v19  ;;  %v1756_v40 = vmax.f32 %v1692_v24, %v1628_v26  ;;  %v4285_v33 = vld [vmem:[%s4741_s9 + $0xc8] sm:$0xff] }
 0x28c   : > { %v1473_v35 = vpop.f32.mrf.mxu1  ;;  %1991 = vmatmul.mubr.f32.gmra.mxu0 %v1754_v21  ;;  %2396 = vmatprep.subr.mxu0 %v4780_v45 }
 0x28d   : > { %v1631_v23 = vadd.f32 %v4092_v48, %v1470_v18  ;;  %v1474_v20 = vadd.f32 %v1473_v35, %v3984_v39  ;;  %v1757_v50 = vmax.f32 %v1693_v38, %v1629_v63  ;;  %2397 = vmatpush1.msra.mxu0 %v2327_v30  ;;  %v1694_v28 = vmul.f32 0.1, %v1630_v4  ;;  %2872 = vmatpush1.msra.mxu1 %v2327_v30  ;;  %v4276_v63 = vld [vmem:[%s4741_s9 + $0xd0] sm:$0xff]  ;;  %v4295_v35 = vld [vmem:[%s4741_s9 + $0xc0] sm:$0xff] }
 0x28e   : > { %v1475_v37 = vpop.f32.mrf.mxu1  ;;  %2398 = vmatprep.subr.mxu0 %v4780_v45  ;;  %2841 = vmatprep.subr.mxu1 %v4780_v45 }
 0x28f   : > { %v1695_v25 = vmul.f32 0.1, %v1631_v23  ;;  %v1632_v1 = vadd.f32 %v4084_v47, %v1474_v20  ;;  %v1476_v15 = vadd.f32 %v1475_v37, %v3987_v41  ;;  %1996 = vmatprep.mubr.f32.mxu0 %v1757_v50  ;;  %2399 = vmatpush2.msra.mxu0 %v2358_v22  ;;  %v1758_v34 = vmax.f32 %v1694_v28, %v1630_v4  ;;  %v4304_v50 = vld [vmem:[%s4741_s9 + $0xb8] sm:$0xff] }
 0x290   : > { %v1479_v39 = vpop.f32.mrf.mxu1  ;;  %1997 = vmatmul.mubr.f32.gmra.mxu0 %v1756_v40  ;;  %2400 = vmatprep.subr.mxu0 %v4780_v45 }
 0x291   : > { %v1633_v57 = vadd.f32 %v4092_v48, %v1476_v15  ;;  %v1480_v32 = vadd.f32 %v1479_v39, %v3990_v43  ;;  %v1759_v27 = vmax.f32 %v1695_v25, %v1631_v23  ;;  %2401 = vmatpush2.msra.mxu0 %v2357_v7  ;;  %v1696_v13 = vmul.f32 0.1, %v1632_v1  ;;  %2873 = vmatpush2.msra.mxu1 %v2358_v22 }
 0x292   : > { %v1481_v41 = vpop.f32.mrf.mxu1  ;;  %2402 = vmatprep.subr.mxu0 %v4780_v45  ;;  %2842 = vmatprep.subr.mxu1 %v4780_v45 }
 0x293   : > { %v1697_v52 = vmul.f32 0.1, %v1633_v57  ;;  %v1634_v42 = vadd.f32 %v4084_v47, %v1480_v32  ;;  %v1482_v29 = vadd.f32 %v1481_v41, %v3993_v44  ;;  %2002 = vmatprep.mubr.f32.mxu0 %v1759_v27  ;;  %2403 = vmatpush2.msra.mxu0 %v2356_v9  ;;  %v1760_v19 = vmax.f32 %v1696_v13, %v1632_v1  ;;  %v4314_v1 = vld [vmem:[%s4741_s9 + $0xb0] sm:$0xff] }
 0x294   : > { %v1485_v43 = vpop.f32.mrf.mxu1  ;;  %2003 = vmatmul.mubr.f32.gmra.mxu0 %v1758_v34  ;;  %2404 = vmatprep.subr.mxu0 %v4780_v45 }
 0x295   : > { %v1635_v17 = vadd.f32 %v4092_v48, %v1482_v29  ;;  %v1486_v26 = vadd.f32 %v1485_v43, %v3996_v46  ;;  %v1761_v36 = vmax.f32 %v1697_v52, %v1633_v57  ;;  %2405 = vmatpush2.msra.mxu0 %v2355_v53  ;;  %v1698_v44 = vmul.f32 0.1, %v1634_v42  ;;  %2874 = vmatpush2.msra.mxu1 %v2357_v7  ;;  %v4323_v57 = vld [vmem:[%s4741_s9 + $0xa8] sm:$0xff] }
 0x296   : > { %v1487_v31 = vpop.f32.mrf.mxu1  ;;  %2406 = vmatprep.subr.mxu0 %v4780_v45  ;;  %2843 = vmatprep.subr.mxu1 %v4780_v45 }
 0x297   : > { %v1699_v55 = vmul.f32 0.1, %v1635_v17  ;;  %v1636_v11 = vadd.f32 %v4084_v47, %v1486_v26  ;;  %v1488_v46 = vadd.f32 %v1487_v31, %v3999_v49  ;;  %2008 = vmatprep.mubr.f32.mxu0 %v1761_v36  ;;  %2407 = vmatpush2.msra.mxu0 %v4267_v59  ;;  %v1762_v18 = vmax.f32 %v1698_v44, %v1634_v42 }
 0x298   : > { %v1491_v24 = vpop.f32.mrf.mxu1  ;;  %2009 = vmatmul.mubr.f32.gmra.mxu0 %v1760_v19  ;;  %2408 = vmatprep.subr.mxu0 %v4780_v45 }
 0x299   : > { %v1637_v21 = vadd.f32 %v4092_v48, %v1488_v46  ;;  %v1492_v30 = vadd.f32 %v1491_v24, %v4002_v51  ;;  %v1763_v38 = vmax.f32 %v1699_v55, %v1635_v17  ;;  %2409 = vmatpush2.msra.mxu0 %v4276_v63  ;;  %v1700_v49 = vmul.f32 0.1, %v1636_v11  ;;  %2875 = vmatpush2.msra.mxu1 %v2356_v9 }
 0x29a   : > { %v1493_v4 = vpop.f32.mrf.mxu1  ;;  %2410 = vmatprep.subr.mxu0 %v4780_v45  ;;  %2844 = vmatprep.subr.mxu1 %v4780_v45 }
 0x29b   : > { %v1701_v22 = vmul.f32 0.1, %v1637_v21  ;;  %v1638_v23 = vadd.f32 %v4084_v47, %v1492_v30  ;;  %v1494_v51 = vadd.f32 %v1493_v4, %v4005_v54  ;;  %2014 = vmatprep.mubr.f32.mxu0 %v1763_v38  ;;  %2411 = vmatpush2.msra.mxu0 %v4285_v33  ;;  %v1764_v25 = vmax.f32 %v1700_v49, %v1636_v11 }
 0x29c   : > { %v1497_v20 = vpop.f32.mrf.mxu1  ;;  %2015 = vmatmul.mubr.f32.gmra.mxu0 %v1762_v18  ;;  %2412 = vmatprep.subr.mxu0 %v4780_v45 }
 0x29d   : > { %v1639_v28 = vadd.f32 %v4092_v48, %v1494_v51  ;;  %v1498_v37 = vadd.f32 %v1497_v20, %v4007_v56  ;;  %v1765_v40 = vmax.f32 %v1701_v22, %v1637_v21  ;;  %2413 = vmatpush2.msra.mxu0 %v4295_v35  ;;  %v1702_v54 = vmul.f32 0.1, %v1638_v23  ;;  %2876 = vmatpush2.msra.mxu1 %v2355_v53  ;;  %v2346_v22 = vld [vmem:[%s4741_s9 + $0x98] sm:$0xff] }
 0x29e   : > { %v1499_v7 = vpop.f32.mrf.mxu1  ;;  %2414 = vmatprep.subr.mxu0 %v4780_v45  ;;  %2845 = vmatprep.subr.mxu1 %v4780_v45 }
 0x29f   : > { %v1703_v15 = vmul.f32 0.1, %v1639_v28  ;;  %v1640_v39 = vadd.f32 %v4084_v47, %v1498_v37  ;;  %v1500_v56 = vadd.f32 %v1499_v7, %v4009_v58  ;;  %2020 = vmatprep.mubr.f32.mxu0 %v1765_v40  ;;  %2415 = vmatpush2.msra.mxu0 %v4304_v50  ;;  %v1766_v34 = vmax.f32 %v1702_v54, %v1638_v23 }
 0x2a0   : > { %v1503_v9 = vpop.f32.mrf.mxu1  ;;  %2021 = vmatmul.mubr.f32.gmra.mxu0 %v1764_v25  ;;  %2416 = vmatprep.subr.mxu0 %v4780_v45  ;;  %v2344_v25 = vld [vmem:[%s4741_s9 + $0x88] sm:$0xff] }
 0x2a1   : > { %v1641_v32 = vadd.f32 %v4092_v48, %v1500_v56  ;;  %v1504_v27 = vadd.f32 %v1503_v9, %v4011_v60  ;;  %v1767_v13 = vmax.f32 %v1703_v15, %v1639_v28  ;;  %2417 = vmatpush2.msra.mxu0 %v4314_v1  ;;  %v1704_v58 = vmul.f32 0.1, %v1640_v39  ;;  %2877 = vmatpush2.msra.mxu1 %v4267_v59  ;;  %v2343_v56 = vld [vmem:[%s4741_s9 + $0x80] sm:$0xff] }
 0x2a2   : > { %v1505_v41 = vpop.f32.mrf.mxu1  ;;  %2418 = vmatprep.subr.mxu0 %v4780_v45  ;;  %2846 = vmatprep.subr.mxu1 %v4780_v45 }
 0x2a3   : > { %v1705_v53 = vmul.f32 0.1, %v1641_v32  ;;  %v1642_v52 = vadd.f32 %v4084_v47, %v1504_v27  ;;  %v1506_v42 = vadd.f32 %v1505_v41, %v4013_v61  ;;  %2026 = vmatprep.mubr.f32.mxu0 %v1767_v13  ;;  %2419 = vmatpush2.msra.mxu0 %v4323_v57  ;;  %v1768_v36 = vmax.f32 %v1704_v58, %v1640_v39 }
 0x2a4   : > { %v1509_v60 = vpop.f32.mrf.mxu1  ;;  %2027 = vmatmul.mubr.f32.gmra.mxu0 %v1766_v34  ;;  %2420 = vmatprep.subr.mxu0 %v4780_v45 }
 0x2a5   : > { %v1643_v29 = vadd.f32 %v4092_v48, %v1506_v42  ;;  %v1510_v43 = vadd.f32 %v1509_v60, %v4015_v62  ;;  %v1769_v17 = vmax.f32 %v1705_v53, %v1641_v32  ;;  %v1706_v59 = vmul.f32 0.1, %v1642_v52  ;;  %2878 = vmatpush2.msra.mxu1 %v4276_v63 }
 0x2a6   : > { %v1511_v26 = vpop.f32.mrf.mxu1  ;;  %2847 = vmatprep.subr.mxu1 %v4780_v45 }
 0x2a7   : > { %v1707_v61 = vmul.f32 0.1, %v1643_v29  ;;  %v1644_v44 = vadd.f32 %v4084_v47, %v1510_v43  ;;  %v1512_v31 = vadd.f32 %v1511_v26, %v4017_v0  ;;  %2032 = vmatprep.mubr.f32.mxu0 %v1769_v17  ;;  %2879 = vmatpush2.msra.mxu1 %v4285_v33  ;;  %v1770_v24 = vmax.f32 %v1706_v59, %v1642_v52  ;;  %v4781_v59 = vld [vmem:[#allocation10_spill] sm:$0xff] }
 0x2a8   : > { %v1515_v19 = vpop.f32.mrf.mxu1  ;;  %2033 = vmatmul.mubr.f32.gmra.mxu0 %v1768_v36  ;;  %2848 = vmatprep.subr.mxu1 %v4780_v45 }
 0x2a9   : > { %v1645_v62 = vadd.f32 %v4092_v48, %v1512_v31  ;;  %v1516_v55 = vadd.f32 %v1515_v19, %v4019_v2  ;;  %v1771_v11 = vmax.f32 %v1707_v61, %v1643_v29  ;;  %v1708_v63 = vmul.f32 0.1, %v1644_v44  ;;  %2880 = vmatpush2.msra.mxu1 %v4295_v35  ;;  %v2347_v2 = vld [vmem:[%s4741_s9 + $0xa0] sm:$0xff]  ;;  %v4782_v61 = vld [vmem:[#allocation11_spill] sm:$0xff] }
 0x2aa   : > { %v1517_v46 = vpop.f32.mrf.mxu1  ;;  %2849 = vmatprep.subr.mxu1 %v4780_v45  ;;  %2421 = vmatpush2.msra.mxu0 %v2347_v2 }
 0x2ab   : > { %v1709_v0 = vmul.f32 0.1, %v1645_v62  ;;  %v1646_v21 = vadd.f32 %v4084_v47, %v1516_v55  ;;  %v1518_v30 = vadd.f32 %v1517_v46, %v4021_v3  ;;  %2038 = vmatprep.mubr.f32.mxu0 %v1771_v11  ;;  %2881 = vmatpush2.msra.mxu1 %v4304_v50  ;;  %v1772_v35 = vmax.f32 %v1708_v63, %v1644_v44  ;;  %v2345_v50 = vld [vmem:[%s4741_s9 + $0x90] sm:$0xff] }
 0x2ac   : > { %v1521_v33 = vpop.f32.mrf.mxu1  ;;  %2039 = vmatmul.mubr.f32.gmra.mxu0 %v1770_v24  ;;  %2850 = vmatprep.subr.mxu1 %v4780_v45  ;;  %v4783_v46 = vld [vmem:[#allocation12_spill] sm:$0xff] }
 0x2ad   : > { %v1647_v38 = vadd.f32 %v4092_v48, %v1518_v30  ;;  %v1522_v49 = vadd.f32 %v1521_v33, %v4023_v5  ;;  %v1773_v4 = vmax.f32 %v1709_v0, %v1645_v62  ;;  %v1710_v3 = vmul.f32 0.1, %v1646_v21  ;;  %2422 = vmatprep.subr.mxu0 %v4780_v45  ;;  %2882 = vmatpush2.msra.mxu1 %v4314_v1  ;;  %v4784_v30 = vld [vmem:[#allocation13_spill] sm:$0xff] }
 0x2ae   : > { %v1523_v18 = vpop.f32.mrf.mxu1  ;;  %2423 = vmatpush2.msra.mxu0 %v2346_v22  ;;  %2851 = vmatprep.subr.mxu1 %v4780_v45 }
 0x2af   : > { %v1711_v23 = vmul.f32 0.1, %v1647_v38  ;;  %v1648_v51 = vadd.f32 %v4084_v47, %v1522_v49  ;;  %v1524_v5 = vadd.f32 %v1523_v18, %v4025_v6  ;;  %2044 = vmatprep.mubr.f32.mxu0 %v1773_v4  ;;  %2424 = vmatprep.subr.mxu0 %v4780_v45  ;;  %v1774_v7 = vmax.f32 %v1710_v3, %v1646_v21  ;;  %v4785_v18 = vld [vmem:[#allocation14_spill] sm:$0xff] }
 0x2b0   : > { %v1527_v20 = vpop.f32.mrf.mxu1  ;;  %2045 = vmatmul.mubr.f32.gmra.mxu0 %v1772_v35  ;;  %2883 = vmatpush2.msra.mxu1 %v4323_v57 }
 0x2b1   : > { %v1649_v28 = vadd.f32 %v4092_v48, %v1524_v5  ;;  %v1528_v37 = vadd.f32 %v1527_v20, %v4027_v8  ;;  %v1775_v40 = vmax.f32 %v1711_v23, %v1647_v38  ;;  %2425 = vmatpush2.msra.mxu0 %v2345_v50  ;;  %v1712_v54 = vmul.f32 0.1, %v1648_v51  ;;  %2852 = vmatprep.subr.mxu1 %v4780_v45 }
 0x2b2   : > { %v1529_v6 = vpop.f32.mrf.mxu1  ;;  %2426 = vmatprep.subr.mxu0 %v4780_v45  ;;  %2884 = vmatpush2.msra.mxu1 %v2347_v2 }
 0x2b3   : > { %v1713_v1 = vmul.f32 0.1, %v1649_v28  ;;  %v1650_v15 = vadd.f32 %v4084_v47, %v1528_v37  ;;  %v1530_v8 = vadd.f32 %v1529_v6, %v4029_v10  ;;  %2050 = vmatprep.mubr.f32.mxu0 %v1775_v40  ;;  %2427 = vmatpush2.msra.mxu0 %v2344_v25  ;;  %v1776_v13 = vmax.f32 %v1712_v54, %v1648_v51  ;;  %v4786_v51 = vld [vmem:[#allocation15_spill] sm:$0xff]  ;;  %v4787_v6 = vld [vmem:[#allocation16_spill] sm:$0xff] }
 0x2b4   : > { %v1533_v39 = vpop.f32.mrf.mxu1  ;;  %2051 = vmatmul.mubr.f32.gmra.mxu0 %v1774_v7  ;;  %2428 = vmatprep.subr.mxu0 %v4780_v45 }
 0x2b5   : > { %v1651_v9 = vadd.f32 %v4092_v48, %v1530_v8  ;;  %v1534_v32 = vadd.f32 %v1533_v39, %v4031_v12  ;;  %v1777_v57 = vmax.f32 %v1713_v1, %v1649_v28  ;;  %2429 = vmatpush2.msra.mxu0 %v2343_v56  ;;  %v1714_v27 = vmul.f32 0.1, %v1650_v15  ;;  %2853 = vmatprep.subr.mxu1 %v4780_v45 }
 0x2b6   : > { %v1535_v10 = vpop.f32.mrf.mxu1  ;;  %2885 = vmatpush2.msra.mxu1 %v2346_v22 }
 0x2b7   : > { %v1715_v58 = vmul.f32 0.1, %v1651_v9  ;;  %v1652_v41 = vadd.f32 %v4084_v47, %v1534_v32  ;;  %v1536_v34 = vadd.f32 %v1535_v10, %v4033_v14  ;;  %2056 = vmatprep.mubr.f32.mxu0 %v1777_v57  ;;  %2854 = vmatprep.subr.mxu1 %v4780_v45  ;;  %v1778_v43 = vmax.f32 %v1714_v27, %v1650_v15  ;;  %v4788_v15 = vld [vmem:[#allocation17_spill] sm:$0xff]  ;;  %v4789_v10 = vld [vmem:[#allocation18_spill] sm:$0xff] }
 0x2b8   : > { %v1539_v53 = vpop.f32.mrf.mxu1  ;;  %2057 = vmatmul.mubr.f32.gmra.mxu0 %v1776_v13  ;;  %2886 = vmatpush2.msra.mxu1 %v2345_v50 }
 0x2b9   : > { %v1653_v12 = vadd.f32 %v4092_v48, %v1536_v34  ;;  %v1540_v52 = vadd.f32 %v1539_v53, %v4035_v16  ;;  %v1779_v42 = vmax.f32 %v1715_v58, %v1651_v9  ;;  %v1716_v60 = vmul.f32 0.1, %v1652_v41  ;;  %2855 = vmatprep.subr.mxu1 %v4780_v45  ;;  %v4790_v34 = vld [vmem:[#allocation19_spill] sm:$0xff] }
 0x2ba   : > { %v1541_v29 = vpop.f32.mrf.mxu1  ;;  %2887 = vmatpush2.msra.mxu1 %v2344_v25 }
 0x2bb   : > { %v1717_v17 = vmul.f32 0.1, %v1653_v12  ;;  %v1654_v14 = vadd.f32 %v4084_v47, %v1540_v52  ;;  %v1542_v26 = vadd.f32 %v1541_v29, %v4781_v59  ;;  %2062 = vmatprep.mubr.f32.mxu0 %v1779_v42  ;;  %2856 = vmatprep.subr.mxu1 %v4780_v45  ;;  %v1780_v55 = vmax.f32 %v1716_v60, %v1652_v41 }
 0x2bc   : > { %v1545_v36 = vpop.f32.mrf.mxu1  ;;  %2063 = vmatmul.mubr.f32.gmra.mxu0 %v1778_v43  ;;  %2888 = vmatpush2.msra.mxu1 %v2343_v56 }
 0x2bd   : > { %v1655_v16 = vadd.f32 %v4092_v48, %v1542_v26  ;;  %v1546_v44 = vadd.f32 %v1545_v36, %v4782_v61  ;;  %v1781_v31 = vmax.f32 %v1717_v17, %v1653_v12  ;;  %v1718_v19 = vmul.f32 0.1, %v1654_v14  ;;  %v4791_v17 = vld [vmem:[#allocation20_spill] sm:$0xff]  ;;  %v4792_v36 = vld [vmem:[#allocation21_spill] sm:$0xff] }
 0x2be   : > { %v1547_v62 = vpop.f32.mrf.mxu1 }
 0x2bf   : > { %v1719_v11 = vmul.f32 0.1, %v1655_v16  ;;  %v1656_v63 = vadd.f32 %v4084_v47, %v1546_v44  ;;  %v1548_v24 = vadd.f32 %v1547_v62, %v4783_v46  ;;  %2068 = vmatprep.mubr.f32.mxu0 %v1781_v31  ;;  %v1782_v45 = vmax.f32 %v1718_v19, %v1654_v14 }
 0x2c0   : > { %v1551_v0 = vpop.f32.mrf.mxu1  ;;  %2069 = vmatmul.mubr.f32.gmra.mxu0 %v1780_v55 }
 0x2c1   : > { %v1657_v21 = vadd.f32 %v4092_v48, %v1548_v24  ;;  %v1552_v33 = vadd.f32 %v1551_v0, %v4784_v30  ;;  %v1783_v2 = vmax.f32 %v1719_v11, %v1655_v16  ;;  %v1720_v38 = vmul.f32 0.1, %v1656_v63  ;;  %v4793_v11 = vld [vmem:[#allocation22_spill] sm:$0xff]  ;;  %v4794_v0 = vld [vmem:[#allocation23_spill] sm:$0xff] }
 0x2c2   : > { %v1553_v49 = vpop.f32.mrf.mxu1 }
 0x2c3   : > { %v1721_v4 = vmul.f32 0.1, %v1657_v21  ;;  %v1658_v3 = vadd.f32 %v4084_v47, %v1552_v33  ;;  %v1554_v35 = vadd.f32 %v1553_v49, %v4785_v18  ;;  %2074 = vmatprep.mubr.f32.mxu0 %v1783_v2  ;;  %v1784_v37 = vmax.f32 %v1720_v38, %v1656_v63 }
 0x2c4   : > { %v1557_v22 = vpop.f32.mrf.mxu1  ;;  %2075 = vmatmul.mubr.f32.gmra.mxu0 %v1782_v45 }
 0x2c5   : > { %v1659_v23 = vadd.f32 %v4092_v48, %v1554_v35  ;;  %v1558_v5 = vadd.f32 %v1557_v22, %v4786_v51  ;;  %v1785_v20 = vmax.f32 %v1721_v4, %v1657_v21  ;;  %v1722_v50 = vmul.f32 0.1, %v1658_v3  ;;  %v4795_v4 = vld [vmem:[#allocation24_spill] sm:$0xff]  ;;  %v4796_v22 = vld [vmem:[#allocation26_spill] sm:$0xff] }
 0x2c6   : > { %v1559_v28 = vpop.f32.mrf.mxu1 }
 0x2c7   : > { %v1723_v40 = vmul.f32 0.1, %v1659_v23  ;;  %v1660_v54 = vadd.f32 %v4084_v47, %v1558_v5  ;;  %v1560_v7 = vadd.f32 %v1559_v28, %v4787_v6  ;;  %2080 = vmatprep.mubr.f32.mxu0 %v1785_v20  ;;  %v1786_v56 = vmax.f32 %v1722_v50, %v1658_v3 }
 0x2c8   : > { %v1563_v25 = vpop.f32.mrf.mxu1  ;;  %2081 = vmatmul.mubr.f32.gmra.mxu0 %v1784_v37 }
 0x2c9   : > { %v1661_v1 = vadd.f32 %v4092_v48, %v1560_v7  ;;  %v1564_v8 = vadd.f32 %v1563_v25, %v4788_v15  ;;  %v1787_v39 = vmax.f32 %v1723_v40, %v1659_v23  ;;  %v1724_v9 = vmul.f32 0.1, %v1660_v54  ;;  %v4797_v40 = vld [vmem:[#allocation27_spill] sm:$0xff]  ;;  %v4798_v25 = vld [vmem:[#allocation28_spill] sm:$0xff] }
 0x2ca   : > { %v1565_v32 = vpop.f32.mrf.mxu1 }
 0x2cb   : > { %v1725_v57 = vmul.f32 0.1, %v1661_v1  ;;  %v1662_v27 = vadd.f32 %v4084_v47, %v1564_v8  ;;  %v1566_v13 = vadd.f32 %v1565_v32, %v4789_v10  ;;  %2086 = vmatprep.mubr.f32.mxu0 %v1787_v39  ;;  %v1788_v52 = vmax.f32 %v1724_v9, %v1660_v54 }
 0x2cc   : > { %v1569_v58 = vpop.f32.mrf.mxu1  ;;  %2087 = vmatmul.mubr.f32.gmra.mxu0 %v1786_v56 }
 0x2cd   : > { %v1663_v41 = vadd.f32 %v4092_v48, %v1566_v13  ;;  %v1570_v53 = vadd.f32 %v1569_v58, %v4790_v34  ;;  %v1789_v12 = vmax.f32 %v1725_v57, %v1661_v1  ;;  %v1726_v42 = vmul.f32 0.1, %v1662_v27  ;;  %v4799_v57 = vld [vmem:[#allocation29_spill] sm:$0xff] }
 0x2ce   : > { %v1571_v60 = vpop.f32.mrf.mxu1 }
 0x2cf   : > { %v1727_v29 = vmul.f32 0.1, %v1663_v41  ;;  %v1664_v43 = vadd.f32 %v4084_v47, %v1570_v53  ;;  %v1572_v14 = vadd.f32 %v1571_v60, %v4791_v17  ;;  %2092 = vmatprep.mubr.f32.mxu0 %v1789_v12  ;;  %v1790_v44 = vmax.f32 %v1726_v42, %v1662_v27 }
 0x2d0   : > { %v1575_v59 = vpop.f32.mrf.mxu1  ;;  %2093 = vmatmul.mubr.f32.gmra.mxu0 %v1788_v52  ;;  %v4800_v52 = vld [vmem:[#allocation25_spill] sm:$0xff] }
 0x2d1   : > { %v1665_v26 = vadd.f32 %v4092_v48, %v1572_v14  ;;  %v1576_v16 = vadd.f32 %v1575_v59, %v4792_v36  ;;  %v1791_v61 = vmax.f32 %v1727_v29, %v1663_v41  ;;  %v1728_v31 = vmul.f32 0.1, %v1664_v43 }
 0x2d2   : > { %v1577_v19 = vpop.f32.mrf.mxu1  ;;  %v4801_v42 = vsub.s32 0, %v4800_v52 }
 0x2d3   : > { %v1729_v62 = vmul.f32 0.1, %v1665_v26  ;;  %v1666_v55 = vadd.f32 %v4084_v47, %v1576_v16  ;;  %v1578_v63 = vadd.f32 %v1577_v19, %v4793_v11  ;;  %2098 = vmatprep.mubr.f32.mxu0 %v1791_v61  ;;  %v1792_v33 = vmax.f32 %v1728_v31, %v1664_v43 }
 0x2d4   : > { %v1581_v46 = vpop.f32.mrf.mxu1  ;;  %2099 = vmatmul.mubr.f32.gmra.mxu0 %v1790_v44 }
 0x2d5   : > { %v1667_v24 = vadd.f32 %v4092_v48, %v1578_v63  ;;  %v1582_v21 = vadd.f32 %v1581_v46, %v4794_v0  ;;  %v1793_v30 = vmax.f32 %v1729_v62, %v1665_v26  ;;  %v1730_v2 = vmul.f32 0.1, %v1666_v55 }
 0x2d6   : > { %v1583_v38 = vpop.f32.mrf.mxu1 }
 0x2d7   : > { %v1731_v49 = vmul.f32 0.1, %v1667_v24  ;;  %v1668_v45 = vadd.f32 %v4084_v47, %v1582_v21  ;;  %v1584_v3 = vadd.f32 %v1583_v38, %v4795_v4  ;;  %2104 = vmatprep.mubr.f32.mxu0 %v1793_v30  ;;  %v1794_v5 = vmax.f32 %v1730_v2, %v1666_v55 }
 0x2d8   : > { %v1587_v18 = vpop.f32.mrf.mxu1  ;;  %2105 = vmatmul.mubr.f32.gmra.mxu0 %v1792_v33 }
 0x2d9   : > { %v1669_v35 = vadd.f32 %v4092_v48, %v1584_v3  ;;  %v1588_v23 = vadd.f32 %v1587_v18, %v4796_v22  ;;  %v1795_v51 = vmax.f32 %v1731_v49, %v1667_v24  ;;  %v1732_v20 = vmul.f32 0.1, %v1668_v45 }
 0x2da   : > { %v1589_v50 = vpop.f32.mrf.mxu1 }
 0x2db   : > { %v1733_v28 = vmul.f32 0.1, %v1669_v35  ;;  %v1670_v37 = vadd.f32 %v4084_v47, %v1588_v23  ;;  %v1590_v54 = vadd.f32 %v1589_v50, %v4797_v40  ;;  %2110 = vmatprep.mubr.f32.mxu0 %v1795_v51  ;;  %v1796_v8 = vmax.f32 %v1732_v20, %v1668_v45 }
 0x2dc   : > { %v1593_v6 = vpop.f32.mrf.mxu1  ;;  %2111 = vmatmul.mubr.f32.gmra.mxu0 %v1794_v5 }
 0x2dd   : > { %v1671_v7 = vadd.f32 %v4092_v48, %v1590_v54  ;;  %v1594_v1 = vadd.f32 %v1593_v6, %v4798_v25  ;;  %v1797_v15 = vmax.f32 %v1733_v28, %v1669_v35  ;;  %v1734_v39 = vmul.f32 0.1, %v1670_v37 }
 0x2de   : > { %v1595_v56 = vpop.f32.mrf.mxu1 }
 0x2df   : > { %v1735_v9 = vmul.f32 0.1, %v1671_v7  ;;  %v1672_v32 = vadd.f32 %v4084_v47, %v1594_v1  ;;  %v1596_v27 = vadd.f32 %v1595_v56, %v4799_v57  ;;  %2116 = vmatprep.mubr.f32.mxu0 %v1797_v15  ;;  %v1798_v58 = vmax.f32 %v1734_v39, %v1670_v37  ;;  %v1866_v47 = vld [vmem:[%s4740_s8] sm:$0x3] }
 0x2e0   : > { %2117 = vmatmul.mubr.f32.gmra.mxu0 %v1796_v8  ;;  %v4437_v60 = vrot.slane %v1866_v47, %v4801_v42 }
 0x2e1   : > { %v1673_v10 = vadd.f32 %v4092_v48, %v1596_v27  ;;  %v1799_v13 = vmax.f32 %v1735_v9, %v1671_v7  ;;  %v1736_v41 = vmul.f32 0.1, %v1672_v32  ;;  %v4802_v48 = vsub.s32 1, %v4800_v52 }
 0x2e3   : > { %v1737_v34 = vmul.f32 0.1, %v1673_v10  ;;  %2122 = vmatprep.mubr.f32.mxu0 %v1799_v13  ;;  %v1800_v12 = vmax.f32 %v1736_v41, %v1672_v32  ;;  %v4444_v29 = vrot.slane %v1866_v47, %v4802_v48 }
 0x2e4   : > { %2123 = vmatmul.mubr.f32.gmra.mxu0 %v1798_v58 }
 0x2e5   : > { %v1801_v53 = vmax.f32 %v1737_v34, %v1673_v10 }
 0x2e7   : > { %2128 = vmatprep.mubr.f32.mxu0 %v1801_v53 }
 0x2e8   : > { %2129 = vmatmul.mubr.f32.gmra.mxu0 %v1800_v12 }
 0x32c   : > { %v1944_v43 = vpop.f32.mrf.mxu0 }
 0x32d   : > { %v1945_v17 = vadd.f32 %v1944_v43, %v4437_v60 }
 0x32e   : > { %v1946_v14 = vpop.f32.mrf.mxu0 }
 0x32f   : > { %v2135_v59 = vmul.f32 0.1, %v1945_v17  ;;  %v1947_v26 = vadd.f32 %v1946_v14, %v4444_v29 }
 0x330   : > { %v1950_v36 = vpop.f32.mrf.mxu0 }
 0x331   : > { %v2199_v16 = vmax.f32 %v2135_v59, %v1945_v17  ;;  %v2136_v61 = vmul.f32 0.1, %v1947_v26  ;;  %v1951_v44 = vadd.f32 %v1950_v36, %v4437_v60 }
 0x332   : > { %v1952_v31 = vpop.f32.mrf.mxu0 }
 0x333   : > { %2263 = vst [vmem:[%s4450_s26] sm:$0xff] %v2199_v16  ;;  %v2200_v19 = vmax.f32 %v2136_v61, %v1947_v26  ;;  %v2137_v62 = vmul.f32 0.1, %v1951_v44  ;;  %v1953_v55 = vadd.f32 %v1952_v31, %v4444_v29 }
 0x334   : > { %v1956_v11 = vpop.f32.mrf.mxu0 }
 0x335   : > { %2264 = vst [vmem:[%s4450_s26 + $0x8] sm:$0xff] %v2200_v19  ;;  %v2201_v63 = vmax.f32 %v2137_v62, %v1951_v44  ;;  %v2138_v46 = vmul.f32 0.1, %v1953_v55  ;;  %v1957_v24 = vadd.f32 %v1956_v11, %v4437_v60  ;;  %2430 = vmatprep.mubr.f32.mxu0 %v2200_v19 }
 0x336   : > { %v1958_v0 = vpop.f32.mrf.mxu0  ;;  %2431 = vmatmul.mubr.f32.vlgmr.msra.gmra.mxu0 %v2199_v16 }
 0x337   : > { %2265 = vst [vmem:[%s4450_s26 + $0x10] sm:$0xff] %v2201_v63  ;;  %v2202_v21 = vmax.f32 %v2138_v46, %v1953_v55  ;;  %v2139_v30 = vmul.f32 0.1, %v1957_v24  ;;  %v1959_v33 = vadd.f32 %v1958_v0, %v4444_v29 }
 0x338   : > { %v1962_v2 = vpop.f32.mrf.mxu0 }
 0x339   : > { %2266 = vst [vmem:[%s4450_s26 + $0x18] sm:$0xff] %v2202_v21  ;;  %v2203_v38 = vmax.f32 %v2139_v30, %v1957_v24  ;;  %v2140_v49 = vmul.f32 0.1, %v1959_v33  ;;  %v1963_v45 = vadd.f32 %v1962_v2, %v4437_v60  ;;  %2435 = vmatprep.mubr.f32.mxu0 %v2202_v21 }
 0x33a   : > { %v1964_v4 = vpop.f32.mrf.mxu0  ;;  %2436 = vmatmul.mubr.f32.gmra.mxu0 %v2201_v63 }
 0x33b   : > { %2267 = vst [vmem:[%s4450_s26 + $0x20] sm:$0xff] %v2203_v38  ;;  %v2204_v3 = vmax.f32 %v2140_v49, %v1959_v33  ;;  %v2141_v18 = vmul.f32 0.1, %v1963_v45  ;;  %v1965_v35 = vadd.f32 %v1964_v4, %v4444_v29 }
 0x33c   : > { %v1968_v22 = vpop.f32.mrf.mxu0 }
 0x33d   : > { %2268 = vst [vmem:[%s4450_s26 + $0x28] sm:$0xff] %v2204_v3  ;;  %v2205_v23 = vmax.f32 %v2141_v18, %v1963_v45  ;;  %v2142_v51 = vmul.f32 0.1, %v1965_v35  ;;  %v1969_v5 = vadd.f32 %v1968_v22, %v4437_v60  ;;  %2440 = vmatprep.mubr.f32.mxu0 %v2204_v3 }
 0x33e   : > { %v1970_v20 = vpop.f32.mrf.mxu0  ;;  %2441 = vmatmul.mubr.f32.gmra.mxu0 %v2203_v38 }
 0x33f   : > { %2269 = vst [vmem:[%s4450_s26 + $0x30] sm:$0xff] %v2205_v23  ;;  %v2206_v50 = vmax.f32 %v2142_v51, %v1965_v35  ;;  %v2143_v28 = vmul.f32 0.1, %v1969_v5  ;;  %v1971_v37 = vadd.f32 %v1970_v20, %v4444_v29 }
 0x340   : > { %v1974_v40 = vpop.f32.mrf.mxu0 }
 0x341   : > { %2270 = vst [vmem:[%s4450_s26 + $0x38] sm:$0xff] %v2206_v50  ;;  %v2207_v54 = vmax.f32 %v2143_v28, %v1969_v5  ;;  %v2144_v6 = vmul.f32 0.1, %v1971_v37  ;;  %v1975_v7 = vadd.f32 %v1974_v40, %v4437_v60  ;;  %2445 = vmatprep.mubr.f32.mxu0 %v2206_v50 }
 0x342   : > { %v1976_v25 = vpop.f32.mrf.mxu0  ;;  %2446 = vmatmul.mubr.f32.gmra.mxu0 %v2205_v23 }
 0x343   : > { %2271 = vst [vmem:[%s4450_s26 + $0x40] sm:$0xff] %v2207_v54  ;;  %v2208_v1 = vmax.f32 %v2144_v6, %v1971_v37  ;;  %v2145_v15 = vmul.f32 0.1, %v1975_v7  ;;  %v1977_v8 = vadd.f32 %v1976_v25, %v4444_v29 }
 0x344   : > { %v1980_v39 = vpop.f32.mrf.mxu0 }
 0x345   : > { %2272 = vst [vmem:[%s4450_s26 + $0x48] sm:$0xff] %v2208_v1  ;;  %v2209_v56 = vmax.f32 %v2145_v15, %v1975_v7  ;;  %v2146_v9 = vmul.f32 0.1, %v1977_v8  ;;  %v1981_v32 = vadd.f32 %v1980_v39, %v4437_v60  ;;  %2450 = vmatprep.mubr.f32.mxu0 %v2208_v1 }
 0x346   : > { %v1982_v57 = vpop.f32.mrf.mxu0  ;;  %2451 = vmatmul.mubr.f32.gmra.mxu0 %v2207_v54 }
 0x347   : > { %2273 = vst [vmem:[%s4450_s26 + $0x50] sm:$0xff] %v2209_v56  ;;  %v2210_v27 = vmax.f32 %v2146_v9, %v1977_v8  ;;  %v2147_v10 = vmul.f32 0.1, %v1981_v32  ;;  %v1983_v13 = vadd.f32 %v1982_v57, %v4444_v29 }
 0x348   : > { %v1986_v58 = vpop.f32.mrf.mxu0 }
 0x349   : > { %2274 = vst [vmem:[%s4450_s26 + $0x58] sm:$0xff] %v2210_v27  ;;  %v2211_v41 = vmax.f32 %v2147_v10, %v1981_v32  ;;  %v2148_v34 = vmul.f32 0.1, %v1983_v13  ;;  %v1987_v53 = vadd.f32 %v1986_v58, %v4437_v60  ;;  %2455 = vmatprep.mubr.f32.mxu0 %v2210_v27 }
 0x34a   : > { %v1988_v12 = vpop.f32.mrf.mxu0  ;;  %2456 = vmatmul.mubr.f32.gmra.mxu0 %v2209_v56 }
 0x34b   : > { %2275 = vst [vmem:[%s4450_s26 + $0x60] sm:$0xff] %v2211_v41  ;;  %v2212_v47 = vmax.f32 %v2148_v34, %v1983_v13  ;;  %v2149_v52 = vmul.f32 0.1, %v1987_v53  ;;  %v1989_v42 = vadd.f32 %v1988_v12, %v4444_v29 }
 0x34c   : > { %v1992_v48 = vpop.f32.mrf.mxu0 }
 0x34d   : > { %2276 = vst [vmem:[%s4450_s26 + $0x68] sm:$0xff] %v2212_v47  ;;  %v2213_v43 = vmax.f32 %v2149_v52, %v1987_v53  ;;  %v2150_v17 = vmul.f32 0.1, %v1989_v42  ;;  %v1993_v14 = vadd.f32 %v1992_v48, %v4437_v60  ;;  %2460 = vmatprep.mubr.f32.mxu0 %v2212_v47 }
 0x34e   : > { %v1994_v59 = vpop.f32.mrf.mxu0  ;;  %2461 = vmatmul.mubr.f32.gmra.mxu0 %v2211_v41 }
 0x34f   : > { %2277 = vst [vmem:[%s4450_s26 + $0x70] sm:$0xff] %v2213_v43  ;;  %v2214_v26 = vmax.f32 %v2150_v17, %v1989_v42  ;;  %v2151_v36 = vmul.f32 0.1, %v1993_v14  ;;  %v1995_v16 = vadd.f32 %v1994_v59, %v4444_v29 }
 0x350   : > { %v1998_v61 = vpop.f32.mrf.mxu0 }
 0x351   : > { %2278 = vst [vmem:[%s4450_s26 + $0x78] sm:$0xff] %v2214_v26  ;;  %v2215_v44 = vmax.f32 %v2151_v36, %v1993_v14  ;;  %v2152_v31 = vmul.f32 0.1, %v1995_v16  ;;  %v1999_v19 = vadd.f32 %v1998_v61, %v4437_v60  ;;  %2465 = vmatprep.mubr.f32.mxu0 %v2214_v26 }
 0x352   : > { %v2000_v62 = vpop.f32.mrf.mxu0  ;;  %2466 = vmatmul.mubr.f32.gmra.mxu0 %v2213_v43 }
 0x353   : > { %2279 = vst [vmem:[%s4450_s26 + $0x80] sm:$0xff] %v2215_v44  ;;  %v2216_v55 = vmax.f32 %v2152_v31, %v1995_v16  ;;  %v2153_v11 = vmul.f32 0.1, %v1999_v19  ;;  %v2001_v63 = vadd.f32 %v2000_v62, %v4444_v29 }
 0x354   : > { %v2004_v46 = vpop.f32.mrf.mxu0 }
 0x355   : > { %2280 = vst [vmem:[%s4450_s26 + $0x88] sm:$0xff] %v2216_v55  ;;  %v2217_v24 = vmax.f32 %v2153_v11, %v1999_v19  ;;  %v2154_v0 = vmul.f32 0.1, %v2001_v63  ;;  %v2005_v21 = vadd.f32 %v2004_v46, %v4437_v60  ;;  %2470 = vmatprep.mubr.f32.mxu0 %v2216_v55 }
 0x356   : > { %v2006_v30 = vpop.f32.mrf.mxu0  ;;  %2471 = vmatmul.mubr.f32.gmra.mxu0 %v2215_v44 }
 0x357   : > { %2281 = vst [vmem:[%s4450_s26 + $0x90] sm:$0xff] %v2217_v24  ;;  %v2218_v33 = vmax.f32 %v2154_v0, %v2001_v63  ;;  %v2155_v2 = vmul.f32 0.1, %v2005_v21  ;;  %v2007_v38 = vadd.f32 %v2006_v30, %v4444_v29 }
 0x358   : > { %v2010_v49 = vpop.f32.mrf.mxu0 }
 0x359   : > { %2282 = vst [vmem:[%s4450_s26 + $0x98] sm:$0xff] %v2218_v33  ;;  %v2219_v45 = vmax.f32 %v2155_v2, %v2005_v21  ;;  %v2156_v4 = vmul.f32 0.1, %v2007_v38  ;;  %v2011_v3 = vadd.f32 %v2010_v49, %v4437_v60  ;;  %2475 = vmatprep.mubr.f32.mxu1 %v2218_v33 }
 0x35a   : > { %v2012_v18 = vpop.f32.mrf.mxu0  ;;  %2476 = vmatmul.mubr.f32.vlgmr.msra.gmra.mxu1 %v2217_v24 }
 0x35b   : > { %2283 = vst [vmem:[%s4450_s26 + $0xa0] sm:$0xff] %v2219_v45  ;;  %v2220_v35 = vmax.f32 %v2156_v4, %v2007_v38  ;;  %v2157_v22 = vmul.f32 0.1, %v2011_v3  ;;  %v2013_v23 = vadd.f32 %v2012_v18, %v4444_v29 }
 0x35c   : > { %v2016_v51 = vpop.f32.mrf.mxu0 }
 0x35d   : > { %2284 = vst [vmem:[%s4450_s26 + $0xa8] sm:$0xff] %v2220_v35  ;;  %v2221_v5 = vmax.f32 %v2157_v22, %v2011_v3  ;;  %v2158_v20 = vmul.f32 0.1, %v2013_v23  ;;  %v2017_v50 = vadd.f32 %v2016_v51, %v4437_v60  ;;  %2480 = vmatprep.mubr.f32.mxu1 %v2220_v35 }
 0x35e   : > { %v2018_v28 = vpop.f32.mrf.mxu0  ;;  %2481 = vmatmul.mubr.f32.gmra.mxu1 %v2219_v45 }
 0x35f   : > { %2285 = vst [vmem:[%s4450_s26 + $0xb0] sm:$0xff] %v2221_v5  ;;  %v2222_v37 = vmax.f32 %v2158_v20, %v2013_v23  ;;  %v2159_v40 = vmul.f32 0.1, %v2017_v50  ;;  %v2019_v54 = vadd.f32 %v2018_v28, %v4444_v29 }
 0x360   : > { %v2022_v6 = vpop.f32.mrf.mxu0 }
 0x361   : > { %2286 = vst [vmem:[%s4450_s26 + $0xb8] sm:$0xff] %v2222_v37  ;;  %v2223_v7 = vmax.f32 %v2159_v40, %v2017_v50  ;;  %v2160_v25 = vmul.f32 0.1, %v2019_v54  ;;  %v2023_v1 = vadd.f32 %v2022_v6, %v4437_v60  ;;  %2485 = vmatprep.mubr.f32.mxu1 %v2222_v37 }
 0x362   : > { %v2024_v15 = vpop.f32.mrf.mxu0  ;;  %2486 = vmatmul.mubr.f32.gmra.mxu1 %v2221_v5 }
 0x363   : > { %2287 = vst [vmem:[%s4450_s26 + $0xc0] sm:$0xff] %v2223_v7  ;;  %v2224_v8 = vmax.f32 %v2160_v25, %v2019_v54  ;;  %v2161_v39 = vmul.f32 0.1, %v2023_v1  ;;  %v2025_v56 = vadd.f32 %v2024_v15, %v4444_v29 }
 0x364   : > { %v2028_v9 = vpop.f32.mrf.mxu0 }
 0x365   : > { %2288 = vst [vmem:[%s4450_s26 + $0xc8] sm:$0xff] %v2224_v8  ;;  %v2225_v32 = vmax.f32 %v2161_v39, %v2023_v1  ;;  %v2162_v57 = vmul.f32 0.1, %v2025_v56  ;;  %v2029_v27 = vadd.f32 %v2028_v9, %v4437_v60  ;;  %2490 = vmatprep.mubr.f32.mxu1 %v2224_v8 }
 0x366   : > { %v2030_v10 = vpop.f32.mrf.mxu0  ;;  %2491 = vmatmul.mubr.f32.gmra.mxu1 %v2223_v7 }
 0x367   : > { %2289 = vst [vmem:[%s4450_s26 + $0xd0] sm:$0xff] %v2225_v32  ;;  %v2226_v13 = vmax.f32 %v2162_v57, %v2025_v56  ;;  %v2163_v58 = vmul.f32 0.1, %v2029_v27  ;;  %v2031_v41 = vadd.f32 %v2030_v10, %v4444_v29 }
 0x368   : > { %v2034_v34 = vpop.f32.mrf.mxu0 }
 0x369   : > { %2290 = vst [vmem:[%s4450_s26 + $0xd8] sm:$0xff] %v2226_v13  ;;  %v2227_v53 = vmax.f32 %v2163_v58, %v2029_v27  ;;  %v2164_v12 = vmul.f32 0.1, %v2031_v41  ;;  %v2035_v47 = vadd.f32 %v2034_v34, %v4437_v60  ;;  %2495 = vmatprep.mubr.f32.mxu1 %v2226_v13 }
 0x36a   : > { %v2036_v52 = vpop.f32.mrf.mxu0  ;;  %2496 = vmatmul.mubr.f32.gmra.mxu1 %v2225_v32 }
 0x36b   : > { %2291 = vst [vmem:[%s4450_s26 + $0xe0] sm:$0xff] %v2227_v53  ;;  %v2228_v42 = vmax.f32 %v2164_v12, %v2031_v41  ;;  %v2165_v48 = vmul.f32 0.1, %v2035_v47  ;;  %v2037_v43 = vadd.f32 %v2036_v52, %v4444_v29 }
 0x36c   : > { %v2040_v17 = vpop.f32.mrf.mxu0 }
 0x36d   : > { %2292 = vst [vmem:[%s4450_s26 + $0xe8] sm:$0xff] %v2228_v42  ;;  %v2229_v14 = vmax.f32 %v2165_v48, %v2035_v47  ;;  %v2166_v59 = vmul.f32 0.1, %v2037_v43  ;;  %v2041_v26 = vadd.f32 %v2040_v17, %v4437_v60  ;;  %2500 = vmatprep.mubr.f32.mxu1 %v2228_v42 }
 0x36e   : > { %v2042_v36 = vpop.f32.mrf.mxu0  ;;  %2501 = vmatmul.mubr.f32.gmra.mxu1 %v2227_v53 }
 0x36f   : > { %2293 = vst [vmem:[%s4450_s26 + $0xf0] sm:$0xff] %v2229_v14  ;;  %v2230_v16 = vmax.f32 %v2166_v59, %v2037_v43  ;;  %v2167_v61 = vmul.f32 0.1, %v2041_v26  ;;  %v2043_v44 = vadd.f32 %v2042_v36, %v4444_v29 }
 0x370   : > { %v2046_v31 = vpop.f32.mrf.mxu0 }
 0x371   : > { %2294 = vst [vmem:[%s4450_s26 + $0xf8] sm:$0xff] %v2230_v16  ;;  %v2231_v19 = vmax.f32 %v2167_v61, %v2041_v26  ;;  %v2168_v62 = vmul.f32 0.1, %v2043_v44  ;;  %v2047_v55 = vadd.f32 %v2046_v31, %v4437_v60  ;;  %2505 = vmatprep.mubr.f32.mxu1 %v2230_v16 }
 0x372   : > { %v2048_v11 = vpop.f32.mrf.mxu0  ;;  %2506 = vmatmul.mubr.f32.gmra.mxu1 %v2229_v14 }
 0x373   : > { %2295 = vst [vmem:[%s4450_s26 + $0x100] sm:$0xff] %v2231_v19  ;;  %v2232_v63 = vmax.f32 %v2168_v62, %v2043_v44  ;;  %v2169_v46 = vmul.f32 0.1, %v2047_v55  ;;  %v2049_v24 = vadd.f32 %v2048_v11, %v4444_v29 }
 0x374   : > { %v2052_v0 = vpop.f32.mrf.mxu0 }
 0x375   : > { %2296 = vst [vmem:[%s4450_s26 + $0x108] sm:$0xff] %v2232_v63  ;;  %v2233_v21 = vmax.f32 %v2169_v46, %v2047_v55  ;;  %v2170_v30 = vmul.f32 0.1, %v2049_v24  ;;  %v2053_v33 = vadd.f32 %v2052_v0, %v4437_v60  ;;  %2510 = vmatprep.mubr.f32.mxu1 %v2232_v63 }
 0x376   : > { %v2054_v2 = vpop.f32.mrf.mxu0  ;;  %2511 = vmatmul.mubr.f32.gmra.mxu1 %v2231_v19 }
 0x377   : > { %2297 = vst [vmem:[%s4450_s26 + $0x110] sm:$0xff] %v2233_v21  ;;  %v2234_v38 = vmax.f32 %v2170_v30, %v2049_v24  ;;  %v2171_v49 = vmul.f32 0.1, %v2053_v33  ;;  %v2055_v45 = vadd.f32 %v2054_v2, %v4444_v29 }
 0x378   : > { %v2058_v4 = vpop.f32.mrf.mxu0 }
 0x379   : > { %2298 = vst [vmem:[%s4450_s26 + $0x118] sm:$0xff] %v2234_v38  ;;  %v2235_v3 = vmax.f32 %v2171_v49, %v2053_v33  ;;  %v2172_v18 = vmul.f32 0.1, %v2055_v45  ;;  %v2059_v35 = vadd.f32 %v2058_v4, %v4437_v60  ;;  %2515 = vmatprep.mubr.f32.mxu1 %v2234_v38 }
 0x37a   : > { %v2060_v22 = vpop.f32.mrf.mxu0  ;;  %2516 = vmatmul.mubr.f32.gmra.mxu1 %v2233_v21 }
 0x37b   : > { %2299 = vst [vmem:[%s4450_s26 + $0x120] sm:$0xff] %v2235_v3  ;;  %v2236_v23 = vmax.f32 %v2172_v18, %v2055_v45  ;;  %v2173_v51 = vmul.f32 0.1, %v2059_v35  ;;  %v2061_v5 = vadd.f32 %v2060_v22, %v4444_v29 }
 0x37c   : > { %v2064_v20 = vpop.f32.mrf.mxu0 }
 0x37d   : > { %2300 = vst [vmem:[%s4450_s26 + $0x128] sm:$0xff] %v2236_v23  ;;  %v2237_v50 = vmax.f32 %v2173_v51, %v2059_v35  ;;  %v2174_v28 = vmul.f32 0.1, %v2061_v5  ;;  %v2065_v37 = vadd.f32 %v2064_v20, %v4437_v60  ;;  %2520 = vmatprep.mubr.f32.mxu1 %v2236_v23 }
 0x37e   : > { %v2066_v40 = vpop.f32.mrf.mxu0  ;;  %2521 = vmatmul.mubr.f32.gmra.mxu1 %v2235_v3 }
 0x37f   : > { %2301 = vst [vmem:[%s4450_s26 + $0x130] sm:$0xff] %v2237_v50  ;;  %v2238_v54 = vmax.f32 %v2174_v28, %v2061_v5  ;;  %v2175_v6 = vmul.f32 0.1, %v2065_v37  ;;  %v2067_v7 = vadd.f32 %v2066_v40, %v4444_v29 }
 0x380   : > { %v2070_v25 = vpop.f32.mrf.mxu0 }
 0x381   : > { %2302 = vst [vmem:[%s4450_s26 + $0x138] sm:$0xff] %v2238_v54  ;;  %v2239_v1 = vmax.f32 %v2175_v6, %v2065_v37  ;;  %v2176_v15 = vmul.f32 0.1, %v2067_v7  ;;  %v2071_v8 = vadd.f32 %v2070_v25, %v4437_v60  ;;  %2525 = vmatprep.mubr.f32.mxu1 %v2238_v54 }
 0x382   : > { %v2072_v39 = vpop.f32.mrf.mxu0  ;;  %2526 = vmatmul.mubr.f32.gmra.mxu1 %v2237_v50 }
 0x383   : > { %2303 = vst [vmem:[%s4450_s26 + $0x140] sm:$0xff] %v2239_v1  ;;  %v2240_v56 = vmax.f32 %v2176_v15, %v2067_v7  ;;  %v2177_v9 = vmul.f32 0.1, %v2071_v8  ;;  %v2073_v32 = vadd.f32 %v2072_v39, %v4444_v29 }
 0x384   : > { %v2076_v57 = vpop.f32.mrf.mxu0 }
 0x385   : > { %2304 = vst [vmem:[%s4450_s26 + $0x148] sm:$0xff] %v2240_v56  ;;  %v2241_v27 = vmax.f32 %v2177_v9, %v2071_v8  ;;  %v2178_v10 = vmul.f32 0.1, %v2073_v32  ;;  %v2077_v13 = vadd.f32 %v2076_v57, %v4437_v60  ;;  %2530 = vmatprep.mubr.f32.mxu1 %v2240_v56 }
 0x386   : > { %v2078_v58 = vpop.f32.mrf.mxu0  ;;  %2531 = vmatmul.mubr.f32.gmra.mxu1 %v2239_v1 }
 0x387   : > { %2305 = vst [vmem:[%s4450_s26 + $0x150] sm:$0xff] %v2241_v27  ;;  %v2242_v41 = vmax.f32 %v2178_v10, %v2073_v32  ;;  %v2179_v34 = vmul.f32 0.1, %v2077_v13  ;;  %v2079_v53 = vadd.f32 %v2078_v58, %v4444_v29 }
 0x388   : > { %v2082_v12 = vpop.f32.mrf.mxu0 }
 0x389   : > { %2306 = vst [vmem:[%s4450_s26 + $0x158] sm:$0xff] %v2242_v41  ;;  %v2243_v47 = vmax.f32 %v2179_v34, %v2077_v13  ;;  %v2180_v52 = vmul.f32 0.1, %v2079_v53  ;;  %v2083_v42 = vadd.f32 %v2082_v12, %v4437_v60  ;;  %2535 = vmatprep.mubr.f32.mxu1 %v2242_v41 }
 0x38a   : > { %v2084_v48 = vpop.f32.mrf.mxu0  ;;  %2536 = vmatmul.mubr.f32.gmra.mxu1 %v2241_v27 }
 0x38b   : > { %2307 = vst [vmem:[%s4450_s26 + $0x160] sm:$0xff] %v2243_v47  ;;  %v2244_v43 = vmax.f32 %v2180_v52, %v2079_v53  ;;  %v2181_v17 = vmul.f32 0.1, %v2083_v42  ;;  %v2085_v14 = vadd.f32 %v2084_v48, %v4444_v29 }
 0x38c   : > { %v2088_v59 = vpop.f32.mrf.mxu0 }
 0x38d   : > { %2308 = vst [vmem:[%s4450_s26 + $0x168] sm:$0xff] %v2244_v43  ;;  %v2245_v26 = vmax.f32 %v2181_v17, %v2083_v42  ;;  %v2182_v36 = vmul.f32 0.1, %v2085_v14  ;;  %v2089_v16 = vadd.f32 %v2088_v59, %v4437_v60  ;;  %2540 = vmatprep.mubr.f32.mxu1 %v2244_v43 }
 0x38e   : > { %v2090_v61 = vpop.f32.mrf.mxu0  ;;  %2541 = vmatmul.mubr.f32.gmra.mxu1 %v2243_v47 }
 0x38f   : > { %2309 = vst [vmem:[%s4450_s26 + $0x170] sm:$0xff] %v2245_v26  ;;  %v2246_v44 = vmax.f32 %v2182_v36, %v2085_v14  ;;  %v2183_v31 = vmul.f32 0.1, %v2089_v16  ;;  %v2091_v19 = vadd.f32 %v2090_v61, %v4444_v29 }
 0x390   : > { %v2094_v62 = vpop.f32.mrf.mxu0 }
 0x391   : > { %2310 = vst [vmem:[%s4450_s26 + $0x178] sm:$0xff] %v2246_v44  ;;  %v2247_v55 = vmax.f32 %v2183_v31, %v2089_v16  ;;  %v2184_v11 = vmul.f32 0.1, %v2091_v19  ;;  %v2095_v63 = vadd.f32 %v2094_v62, %v4437_v60  ;;  %2545 = vmatprep.mubr.f32.mxu1 %v2246_v44 }
 0x392   : > { %v2096_v46 = vpop.f32.mrf.mxu0  ;;  %2546 = vmatmul.mubr.f32.gmra.mxu1 %v2245_v26 }
 0x393   : > { %2311 = vst [vmem:[%s4450_s26 + $0x180] sm:$0xff] %v2247_v55  ;;  %v2248_v24 = vmax.f32 %v2184_v11, %v2091_v19  ;;  %v2185_v0 = vmul.f32 0.1, %v2095_v63  ;;  %v2097_v21 = vadd.f32 %v2096_v46, %v4444_v29 }
 0x394   : > { %v2100_v30 = vpop.f32.mrf.mxu0 }
 0x395   : > { %2312 = vst [vmem:[%s4450_s26 + $0x188] sm:$0xff] %v2248_v24  ;;  %v2249_v33 = vmax.f32 %v2185_v0, %v2095_v63  ;;  %v2186_v2 = vmul.f32 0.1, %v2097_v21  ;;  %v2101_v38 = vadd.f32 %v2100_v30, %v4437_v60  ;;  %2550 = vmatprep.mubr.f32.mxu1 %v2248_v24 }
 0x396   : > { %v2102_v49 = vpop.f32.mrf.mxu0  ;;  %2551 = vmatmul.mubr.f32.gmra.mxu1 %v2247_v55 }
 0x397   : > { %2313 = vst [vmem:[%s4450_s26 + $0x190] sm:$0xff] %v2249_v33  ;;  %v2250_v45 = vmax.f32 %v2186_v2, %v2097_v21  ;;  %v2187_v4 = vmul.f32 0.1, %v2101_v38  ;;  %v2103_v3 = vadd.f32 %v2102_v49, %v4444_v29 }
 0x398   : > { %v2106_v18 = vpop.f32.mrf.mxu0 }
 0x399   : > { %2314 = vst [vmem:[%s4450_s26 + $0x198] sm:$0xff] %v2250_v45  ;;  %v2251_v35 = vmax.f32 %v2187_v4, %v2101_v38  ;;  %v2188_v22 = vmul.f32 0.1, %v2103_v3  ;;  %v2107_v23 = vadd.f32 %v2106_v18, %v4437_v60  ;;  %2555 = vmatprep.mubr.f32.mxu1 %v2250_v45 }
 0x39a   : > { %v2108_v51 = vpop.f32.mrf.mxu0  ;;  %2556 = vmatmul.mubr.f32.gmra.mxu1 %v2249_v33 }
 0x39b   : > { %2315 = vst [vmem:[%s4450_s26 + $0x1a0] sm:$0xff] %v2251_v35  ;;  %v2252_v5 = vmax.f32 %v2188_v22, %v2103_v3  ;;  %v2189_v20 = vmul.f32 0.1, %v2107_v23  ;;  %v2109_v50 = vadd.f32 %v2108_v51, %v4444_v29 }
 0x39c   : > { %v2112_v28 = vpop.f32.mrf.mxu0 }
 0x39d   : > { %2316 = vst [vmem:[%s4450_s26 + $0x1a8] sm:$0xff] %v2252_v5  ;;  %v2253_v37 = vmax.f32 %v2189_v20, %v2107_v23  ;;  %v2190_v40 = vmul.f32 0.1, %v2109_v50  ;;  %v2113_v54 = vadd.f32 %v2112_v28, %v4437_v60  ;;  %2560 = vmatprep.mubr.f32.mxu1 %v2252_v5 }
 0x39e   : > { %v2114_v6 = vpop.f32.mrf.mxu0  ;;  %2561 = vmatmul.mubr.f32.gmra.mxu1 %v2251_v35 }
 0x39f   : > { %2317 = vst [vmem:[%s4450_s26 + $0x1b0] sm:$0xff] %v2253_v37  ;;  %v2254_v7 = vmax.f32 %v2190_v40, %v2109_v50  ;;  %v2191_v25 = vmul.f32 0.1, %v2113_v54  ;;  %v2115_v1 = vadd.f32 %v2114_v6, %v4444_v29 }
 0x3a0   : > { %v2118_v15 = vpop.f32.mrf.mxu0 }
 0x3a1   : > { %2318 = vst [vmem:[%s4450_s26 + $0x1b8] sm:$0xff] %v2254_v7  ;;  %v2255_v8 = vmax.f32 %v2191_v25, %v2113_v54  ;;  %v2192_v39 = vmul.f32 0.1, %v2115_v1  ;;  %v2119_v56 = vadd.f32 %v2118_v15, %v4437_v60  ;;  %2565 = vmatprep.mubr.f32.mxu1 %v2254_v7 }
 0x3a2   : > { %v2120_v9 = vpop.f32.mrf.mxu0  ;;  %2566 = vmatmul.mubr.f32.gmra.mxu1 %v2253_v37 }
 0x3a3   : > { %2319 = vst [vmem:[%s4450_s26 + $0x1c0] sm:$0xff] %v2255_v8  ;;  %v2256_v32 = vmax.f32 %v2192_v39, %v2115_v1  ;;  %v2193_v57 = vmul.f32 0.1, %v2119_v56  ;;  %v2121_v27 = vadd.f32 %v2120_v9, %v4444_v29 }
 0x3a4   : > { %v2124_v10 = vpop.f32.mrf.mxu0 }
 0x3a5   : > { %2320 = vst [vmem:[%s4450_s26 + $0x1c8] sm:$0xff] %v2256_v32  ;;  %v2257_v13 = vmax.f32 %v2193_v57, %v2119_v56  ;;  %v2194_v58 = vmul.f32 0.1, %v2121_v27  ;;  %v2125_v41 = vadd.f32 %v2124_v10, %v4437_v60  ;;  %2570 = vmatprep.mubr.f32.mxu1 %v2256_v32 }
 0x3a6   : > { %v2126_v34 = vpop.f32.mrf.mxu0  ;;  %2571 = vmatmul.mubr.f32.gmra.mxu1 %v2255_v8 }
 0x3a7   : > { %2321 = vst [vmem:[%s4450_s26 + $0x1d0] sm:$0xff] %v2257_v13  ;;  %v2258_v53 = vmax.f32 %v2194_v58, %v2121_v27  ;;  %v2195_v12 = vmul.f32 0.1, %v2125_v41  ;;  %v2127_v47 = vadd.f32 %v2126_v34, %v4444_v29 }
 0x3a8   : > { %v2130_v52 = vpop.f32.mrf.mxu0 }
 0x3a9   : > { %2322 = vst [vmem:[%s4450_s26 + $0x1d8] sm:$0xff] %v2258_v53  ;;  %v2259_v42 = vmax.f32 %v2195_v12, %v2125_v41  ;;  %v2196_v48 = vmul.f32 0.1, %v2127_v47  ;;  %v2131_v43 = vadd.f32 %v2130_v52, %v4437_v60  ;;  %2575 = vmatprep.mubr.f32.mxu1 %v2258_v53  ;;  %v4581_v60 = vld [vmem:[%s4742_s10] ss:$0 sm:$0xff] }
 0x3aa   : > { %v2132_v17 = vpop.f32.mrf.mxu0  ;;  %2576 = vmatmul.mubr.f32.gmra.mxu1 %v2257_v13 }
 0x3ab   : > { %2323 = vst [vmem:[%s4450_s26 + $0x1e0] sm:$0xff] %v2259_v42  ;;  %v2260_v14 = vmax.f32 %v2196_v48, %v2127_v47  ;;  %v2197_v59 = vmul.f32 0.1, %v2131_v43  ;;  %v2133_v26 = vadd.f32 %v2132_v17, %v4444_v29 }
 0x3ad   : > { %2324 = vst [vmem:[%s4450_s26 + $0x1e8] sm:$0xff] %v2260_v14  ;;  %v2261_v36 = vmax.f32 %v2197_v59, %v2131_v43  ;;  %v2198_v16 = vmul.f32 0.1, %v2133_v26  ;;  %2580 = vmatprep.mubr.f32.mxu1 %v2260_v14 }
 0x3ae   : > { %2581 = vmatmul.mubr.f32.gmra.mxu1 %v2259_v42 }
 0x3af   : > { %2325 = vst [vmem:[%s4450_s26 + $0x1f0] sm:$0xff] %v2261_v36  ;;  %v2262_v61 = vmax.f32 %v2198_v16, %v2133_v26 }
 0x3b1   : > { %2326 = vst [vmem:[%s4450_s26 + $0x1f8] sm:$0xff] %v2262_v61  ;;  %2585 = vmatprep.mubr.f32.mxu1 %v2262_v61  ;;  %s3031_s26 = smov [#allocation2]  }
 0x3b2   : > { %2586 = vmatmul.mubr.f32.gmra.mxu1 %v2261_v36  ;;  %s2942_s16 = sshll.u32 %s3031_s26, 4  ;;  %s2943_s16 = int_to_ptr.vmem [resolvable:$false] %s2942_s16 }
 0x3b3   : > { %s2944_s30 = scalar_lea.vmem %s2943_s16, 16384  ;;  %p2945_p0 = scmp.lt.s32.totalorder %s4590_s20, %s2943_s16 }
 0x3b4   : > { %p2946_p1 = scmp.lt.s32.totalorder %s2944_s30, %s2938_s17 }
 0x3b6   : > { %p2947_p2 = por %p2946_p1, %p2945_p0 }
 0x3b8   : > { %p2948_p3 = pnand %p2947_p2, %p2941_p13 }
 0x3f6   : > { %v2432_v29 = vpop.f32.mrf.mxu0 }
 0x3f7   : > { %v2433_v44 = vadd.f32 %v4581_v60, %v2432_v29 }
 0x3f8   : > { %v2434_v31 = vpop.f32.mrf.mxu0 }
 0x3f9   : > { %2951 = shalt.err (!%p2948_p3)
}
 0x3fa   : > { %s2952_s19 = scalar_lea.hbm %s4588_s1, 8192  ;;  %s2956_s26 = scalar_lea.hbm %s4743_s11, 16384 }
 0x3fb   : > { %p2953_p4 = scmp.ne.s32.totalorder %s4588_s1, %s2952_s19  ;;  %p2957_p9 = scmp.lt.s32.totalorder %s4588_s1, %s4743_s11 }
 0x3fc   : > { %p2958_p10 = scmp.lt.s32.totalorder %s2956_s26, %s2952_s19 }
 0x3fd   : > { %p2954_p7 = pnand %p2953_p4, %p3140_p5 }
 0x3fe   : > { %p2959_p11 = por %p2958_p10, %p2957_p9 }
 0x3ff   : > { %p2955_p8 = pneg %p2954_p7 }
 0x401   : > { %p2960_p12 = pnand %p2959_p11, %p2955_p8 }
 0x403   : > { %2963 = shalt.err (!%p2960_p12)
}
 0x404   : > { %s3032_s17 = smov 256   ;;  %s3033_s16 = smov 16   ;;  %v2437_v19 = vpop.f32.mrf.mxu0 }
 0x405   : > { %s4803_s30 = scalar_lea.sflag [#allocation3], %s4440_s15  ;;  %s4804_s28 = sshll.u32 %s4440_s15, 8  ;;  %v2438_v62 = vadd.f32 %v4581_v60, %v2437_v19 }
 0x406   : > { %2889 = dma.vmem_to_hbm [thread:$0]  (%p3140_p5), %s4590_s20, 8192, %s4588_s1, %s4803_s30, %s3032_s17, %s3032_s17, %s3033_s16   ;;  %v2439_v55 = vpop.f32.mrf.mxu0 }
 0x407   : > { %s4618_s29 = scalar_lea.vmem [#allocation4], %s4804_s28  ;;  %s2824_s23 = sshll.u32 %s3123_s25, 12 }
 0x408   : > { %2591 = vst [vmem:[%s4618_s29] sm:$0xff] %v2433_v44  ;;  %2592 = vst [vmem:[%s4618_s29 + $0x8] sm:$0xff] %v2438_v62  ;;  %v2442_v11 = vpop.f32.mrf.mxu0  ;;  %s2659_s20 = sshll.u32 %s4618_s29, 4  ;;  %s4686_s19 = scalar_lea.hbm %s4744_s12, %s2824_s23  ;;  %s4688_s20 = int_to_ptr.vmem [resolvable:$true] %s2659_s20 }
 0x409   : > { %v2443_v63 = vadd.f32 %v4581_v60, %v2442_v11  ;;  %s2629_s26 = scalar_lea.sflag [#allocation5], %s4440_s15  ;;  %s2964_s25 = scalar_lea.vmem %s4688_s20, 4096 }
 0x40a   : > { %v2444_v46 = vpop.f32.mrf.mxu0  ;;  %p2965_p13 = scmp.ne.s32.totalorder %s4688_s20, %s2964_s25  ;;  %s3034_s17 = smov [#allocation4]  }
 0x40b   : > { %2593 = vst [vmem:[%s4618_s29 + $0x10] sm:$0xff] %v2443_v63  ;;  %s2968_s16 = sshll.u32 %s3034_s17, 4  ;;  %s2969_s16 = int_to_ptr.vmem [resolvable:$false] %s2968_s16 }
 0x40c   : > { %v2447_v24 = vpop.f32.mrf.mxu0  ;;  %p2966_p0 = pnand %p2965_p13, %p3140_p5  ;;  %s2970_s30 = scalar_lea.vmem %s2969_s16, 8192 }
 0x40d   : > { %v2448_v0 = vadd.f32 %v4581_v60, %v2447_v24  ;;  %p2971_p2 = scmp.lt.s32.totalorder %s4688_s20, %s2969_s16  ;;  %p2972_p3 = scmp.lt.s32.totalorder %s2970_s30, %s2964_s25 }
 0x40e   : > { %v2449_v21 = vpop.f32.mrf.mxu0  ;;  %p2967_p1 = pneg %p2966_p0 }
 0x40f   : > { %2594 = vst [vmem:[%s4618_s29 + $0x18] sm:$0xff] %v2448_v0  ;;  %p2973_p4 = por %p2972_p3, %p2971_p2 }
 0x410   : > { %v2452_v30 = vpop.f32.mrf.mxu0 }
 0x411   : > { %v2453_v33 = vadd.f32 %v4581_v60, %v2452_v30  ;;  %p2974_p7 = pnand %p2973_p4, %p2967_p1 }
 0x412   : > { %v2454_v2 = vpop.f32.mrf.mxu0 }
 0x413   : > { %2595 = vst [vmem:[%s4618_s29 + $0x20] sm:$0xff] %v2453_v33 }
 0x414   : > { %v2457_v38 = vpop.f32.mrf.mxu0 }
 0x415   : > { %v2458_v49 = vadd.f32 %v4581_v60, %v2457_v38 }
 0x416   : > { %v2459_v45 = vpop.f32.mrf.mxu0 }
 0x417   : > { %2596 = vst [vmem:[%s4618_s29 + $0x28] sm:$0xff] %v2458_v49 }
 0x418   : > { %v2462_v4 = vpop.f32.mrf.mxu0 }
 0x419   : > { %v2463_v3 = vadd.f32 %v4581_v60, %v2462_v4 }
 0x41a   : > { %v2464_v18 = vpop.f32.mrf.mxu0  ;;  %v2477_v50 = vpop.f32.mrf.mxu1 }
 0x41b   : > { %2597 = vst [vmem:[%s4618_s29 + $0x30] sm:$0xff] %v2463_v3  ;;  %v2478_v28 = vadd.f32 %v4581_v60, %v2477_v50 }
 0x41c   : > { %v2467_v35 = vpop.f32.mrf.mxu0  ;;  %v2479_v37 = vpop.f32.mrf.mxu1 }
 0x41d   : > { %v2468_v22 = vadd.f32 %v4581_v60, %v2467_v35  ;;  %2600 = vst [vmem:[%s4618_s29 + $0x48] sm:$0xff] %v2478_v28 }
 0x41e   : > { %v2469_v23 = vpop.f32.mrf.mxu0  ;;  %v2482_v40 = vpop.f32.mrf.mxu1 }
 0x41f   : > { %2598 = vst [vmem:[%s4618_s29 + $0x38] sm:$0xff] %v2468_v22  ;;  %v2483_v54 = vadd.f32 %v4581_v60, %v2482_v40 }
 0x420   : > { %v2472_v51 = vpop.f32.mrf.mxu0  ;;  %v2484_v6 = vpop.f32.mrf.mxu1 }
 0x421   : > { %v2473_v5 = vadd.f32 %v4581_v60, %v2472_v51  ;;  %2601 = vst [vmem:[%s4618_s29 + $0x50] sm:$0xff] %v2483_v54 }
 0x422   : > { %v2474_v20 = vpop.f32.mrf.mxu0  ;;  %v2487_v7 = vpop.f32.mrf.mxu1 }
 0x423   : > { %2599 = vst [vmem:[%s4618_s29 + $0x40] sm:$0xff] %v2473_v5  ;;  %v2488_v25 = vadd.f32 %v4581_v60, %v2487_v7 }
 0x424   : > { %v2489_v1 = vpop.f32.mrf.mxu1 }
 0x425   : > { %2602 = vst [vmem:[%s4618_s29 + $0x58] sm:$0xff] %v2488_v25 }
 0x426   : > { %v2492_v15 = vpop.f32.mrf.mxu1 }
 0x427   : > { %v2493_v8 = vadd.f32 %v4581_v60, %v2492_v15 }
 0x428   : > { %v2494_v39 = vpop.f32.mrf.mxu1 }
 0x429   : > { %2603 = vst [vmem:[%s4618_s29 + $0x60] sm:$0xff] %v2493_v8 }
 0x42a   : > { %v2497_v56 = vpop.f32.mrf.mxu1 }
 0x42b   : > { %v2498_v9 = vadd.f32 %v4581_v60, %v2497_v56 }
 0x42c   : > { %v2499_v32 = vpop.f32.mrf.mxu1 }
 0x42d   : > { %2604 = vst [vmem:[%s4618_s29 + $0x68] sm:$0xff] %v2498_v9 }
 0x42e   : > { %v2502_v57 = vpop.f32.mrf.mxu1 }
 0x42f   : > { %v2503_v27 = vadd.f32 %v4581_v60, %v2502_v57 }
 0x430   : > { %v2504_v10 = vpop.f32.mrf.mxu1 }
 0x431   : > { %2605 = vst [vmem:[%s4618_s29 + $0x70] sm:$0xff] %v2503_v27 }
 0x432   : > { %v2507_v13 = vpop.f32.mrf.mxu1 }
 0x433   : > { %v2508_v58 = vadd.f32 %v4581_v60, %v2507_v13 }
 0x434   : > { %v2509_v41 = vpop.f32.mrf.mxu1 }
 0x435   : > { %2606 = vst [vmem:[%s4618_s29 + $0x78] sm:$0xff] %v2508_v58 }
 0x436   : > { %v2512_v34 = vpop.f32.mrf.mxu1 }
 0x437   : > { %v2513_v53 = vadd.f32 %v4581_v60, %v2512_v34 }
 0x438   : > { %v2514_v12 = vpop.f32.mrf.mxu1 }
 0x439   : > { %2607 = vst [vmem:[%s4618_s29 + $0x80] sm:$0xff] %v2513_v53 }
 0x43a   : > { %v2517_v47 = vpop.f32.mrf.mxu1 }
 0x43b   : > { %v2518_v52 = vadd.f32 %v4581_v60, %v2517_v47 }
 0x43c   : > { %v2519_v42 = vpop.f32.mrf.mxu1 }
 0x43d   : > { %2608 = vst [vmem:[%s4618_s29 + $0x88] sm:$0xff] %v2518_v52 }
 0x43e   : > { %v2522_v48 = vpop.f32.mrf.mxu1 }
 0x43f   : > { %v2523_v43 = vadd.f32 %v4581_v60, %v2522_v48 }
 0x440   : > { %v2524_v17 = vpop.f32.mrf.mxu1 }
 0x441   : > { %2609 = vst [vmem:[%s4618_s29 + $0x90] sm:$0xff] %v2523_v43 }
 0x442   : > { %v2527_v14 = vpop.f32.mrf.mxu1 }
 0x443   : > { %v2528_v59 = vadd.f32 %v4581_v60, %v2527_v14 }
 0x444   : > { %v2529_v26 = vpop.f32.mrf.mxu1 }
 0x445   : > { %2610 = vst [vmem:[%s4618_s29 + $0x98] sm:$0xff] %v2528_v59 }
 0x446   : > { %v2532_v36 = vpop.f32.mrf.mxu1 }
 0x447   : > { %v2533_v16 = vadd.f32 %v4581_v60, %v2532_v36 }
 0x448   : > { %v2534_v61 = vpop.f32.mrf.mxu1 }
 0x449   : > { %2611 = vst [vmem:[%s4618_s29 + $0xa0] sm:$0xff] %v2533_v16 }
 0x44a   : > { %v2537_v29 = vpop.f32.mrf.mxu1 }
 0x44b   : > { %v2538_v44 = vadd.f32 %v4581_v60, %v2537_v29 }
 0x44c   : > { %v2539_v31 = vpop.f32.mrf.mxu1 }
 0x44d   : > { %2612 = vst [vmem:[%s4618_s29 + $0xa8] sm:$0xff] %v2538_v44 }
 0x44e   : > { %v2542_v19 = vpop.f32.mrf.mxu1 }
 0x44f   : > { %v2543_v62 = vadd.f32 %v4581_v60, %v2542_v19 }
 0x450   : > { %v2544_v55 = vpop.f32.mrf.mxu1 }
 0x451   : > { %2613 = vst [vmem:[%s4618_s29 + $0xb0] sm:$0xff] %v2543_v62 }
 0x452   : > { %v2547_v11 = vpop.f32.mrf.mxu1 }
 0x453   : > { %v2548_v63 = vadd.f32 %v4581_v60, %v2547_v11 }
 0x454   : > { %v2549_v46 = vpop.f32.mrf.mxu1 }
 0x455   : > { %2614 = vst [vmem:[%s4618_s29 + $0xb8] sm:$0xff] %v2548_v63 }
 0x456   : > { %v2552_v24 = vpop.f32.mrf.mxu1 }
 0x457   : > { %v2553_v0 = vadd.f32 %v4581_v60, %v2552_v24 }
 0x458   : > { %v2554_v21 = vpop.f32.mrf.mxu1 }
 0x459   : > { %2615 = vst [vmem:[%s4618_s29 + $0xc0] sm:$0xff] %v2553_v0 }
 0x45a   : > { %v2557_v30 = vpop.f32.mrf.mxu1 }
 0x45b   : > { %v2558_v33 = vadd.f32 %v4581_v60, %v2557_v30 }
 0x45c   : > { %v2559_v2 = vpop.f32.mrf.mxu1 }
 0x45d   : > { %2616 = vst [vmem:[%s4618_s29 + $0xc8] sm:$0xff] %v2558_v33 }
 0x45e   : > { %v2562_v38 = vpop.f32.mrf.mxu1 }
 0x45f   : > { %v2563_v49 = vadd.f32 %v4581_v60, %v2562_v38 }
 0x460   : > { %v2564_v45 = vpop.f32.mrf.mxu1 }
 0x461   : > { %2617 = vst [vmem:[%s4618_s29 + $0xd0] sm:$0xff] %v2563_v49 }
 0x462   : > { %v2567_v4 = vpop.f32.mrf.mxu1 }
 0x463   : > { %v2568_v3 = vadd.f32 %v4581_v60, %v2567_v4 }
 0x464   : > { %v2569_v18 = vpop.f32.mrf.mxu1 }
 0x465   : > { %2618 = vst [vmem:[%s4618_s29 + $0xd8] sm:$0xff] %v2568_v3 }
 0x466   : > { %v2572_v35 = vpop.f32.mrf.mxu1 }
 0x467   : > { %v2573_v22 = vadd.f32 %v4581_v60, %v2572_v35 }
 0x468   : > { %v2574_v23 = vpop.f32.mrf.mxu1 }
 0x469   : > { %2619 = vst [vmem:[%s4618_s29 + $0xe0] sm:$0xff] %v2573_v22 }
 0x46a   : > { %v2577_v51 = vpop.f32.mrf.mxu1 }
 0x46b   : > { %v2578_v5 = vadd.f32 %v4581_v60, %v2577_v51 }
 0x46c   : > { %v2579_v20 = vpop.f32.mrf.mxu1 }
 0x46d   : > { %2620 = vst [vmem:[%s4618_s29 + $0xe8] sm:$0xff] %v2578_v5 }
 0x46e   : > { %v2582_v50 = vpop.f32.mrf.mxu1 }
 0x46f   : > { %v2583_v28 = vadd.f32 %v4581_v60, %v2582_v50 }
 0x470   : > { %v2584_v37 = vpop.f32.mrf.mxu1 }
 0x471   : > { %2621 = vst [vmem:[%s4618_s29 + $0xf0] sm:$0xff] %v2583_v28 }
 0x472   : > { %v2587_v40 = vpop.f32.mrf.mxu1 }
 0x473   : > { %v2588_v54 = vadd.f32 %v4581_v60, %v2587_v40 }
 0x474   : > { %v2589_v6 = vpop.f32.mrf.mxu1 }
 0x475   : > { %2622 = vst [vmem:[%s4618_s29 + $0xf8] sm:$0xff] %v2588_v54 }
 0x476   : > { %2977 = shalt.err (!%p2974_p7)
}
 0x477   : > { %s2978_s28 = scalar_lea.hbm %s4686_s19, 4096  ;;  %s2982_s1 = scalar_lea.hbm %s4744_s12, 8192 }
 0x478   : > { %p2979_p8 = scmp.ne.s32.totalorder %s4686_s19, %s2978_s28  ;;  %p2983_p11 = scmp.lt.s32.totalorder %s4686_s19, %s4744_s12 }
 0x479   : > { %p2984_p12 = scmp.lt.s32.totalorder %s2982_s1, %s2978_s28 }
 0x47a   : > { %p2980_p9 = pnand %p2979_p8, %p3140_p5 }
 0x47b   : > { %p2985_p13 = por %p2984_p12, %p2983_p11 }
 0x47c   : > { %p2981_p10 = pneg %p2980_p9 }
 0x47e   : > { %p2986_p0 = pnand %p2985_p13, %p2981_p10 }
 0x480   : > { %2989 = shalt.err (!%p2986_p0)
}
 0x481   : > { %s3035_s25 = smov 128   ;;  %s3036_s16 = smov 8  }
 0x482   : > { %2890 = dma.vmem_to_hbm [thread:$0]  (%p3140_p5), %s4688_s20, 4096, %s4686_s19, %s2629_s26, %s3035_s25, %s3035_s25, %s3036_s16  }
 0x483 PF: > { %p2900_p1 = scmp.ge.s32.totalorder %s3028_s24, 2  ;;  %s2674_s30 = sand.u32 1, %s3016_s21  }
 0x484   : > { %s2675_s28 = scalar_lea.sflag [#allocation3], %s2674_s30 }
 0x485   : > { %p2894_p2 = pnand %p2900_p1, %p3144_p6 }
 0x487   : > { %p2895_p3 = pneg %p2894_p2 }
 0x489   : > { %3007 = dma.done.wait (%p2895_p3), %s2675_s28, 8192  }
 0x48a   : > { %3009 = vsyncadd (%p2895_p3), %s2675_s28, 4294959104  ;;  %s2684_s29 = scalar_lea.sflag [#allocation5], %s2674_s30 }
 0x48b   : > { %3011 = dma.done.wait (%p2895_p3), %s2684_s29, 4096  }
 0x48c   : > { %3013 = vsyncadd (%p2895_p3), %s2684_s29, 4294963200  ;;  %s4805_s13 = sld [smem:[#allocation8_spill]]  ;;  %p26_p5 = scmp.ge.s32.totalorder %s3127_s27, 4  }
 0x48d   : > { %s4806_s23 = sld [smem:[#allocation9_spill]]  ;;  %s4807_s21 = smov %s3020_s22 }
 0x48e   : > { %s4809_s24 = smov %s3127_s27  ;;  %28 = sbr.rel (!%p26_p5) target bundleno = 7 (0x7), region = 119 }
 0x492   : > { %s4808_s22 = smov %s4805_s13 }
 0x493   :  { %2689 = vsyncpa [#allocation3], 1 }
 0x494   :  { %2691 = vsyncpa [#allocation3 + $0x1], 1 }
 0x495   :  { %2692 = vsyncpa [#allocation5], 1 }
 0x496   :  { %2694 = vsyncpa [#allocation5 + $0x1], 1 }

</bundles_post_ra>
